<compile_context>
chip_gen: v7x
topology: tpu7x:2x2x1
jax: 0.10.0
libtpu: 0.0.40
codegen_flags: <defaults>
</compile_context>

<pallas_src>
import functools

import jax
import jax.numpy as jnp
from jax.experimental import pallas as pl
from jax.experimental.pallas import tpu as pltpu


# ----------------------------------------------------------------------------
# Pallas kernel: Nb batch items per grid step.
# ----------------------------------------------------------------------------
def _g_fuse_kernel(H, W, C, Nb,
                   fea_pad_ref, coarse_ref, err_ref, fea_cf_ref,
                   w1_ref, b1_ref, w2_ref, b2_ref, wsa_ref,
                   out_ref):
    # fea_pad_ref : (Nb, H+2, W+2, C) f32  zero-padded feature map (NHWC)
    # coarse_ref  : (Nb, H+2, W+2)    f32  zero-padded coarse prediction
    # err_ref     : (Nb, H+2, W+2)    f32  zero-padded error prediction
    # fea_cf_ref  : (Nb, C, H*W)      f32  unpadded feature map, NCHW-flat
    # w*_ref      : (9*C, C)          bf16 im2col conv weights, BN scale folded
    # b*_ref      : (1, C)            f32  folded BatchNorm bias
    # wsa_ref     : (9,)              f32  SpatialAttention 3x3 taps (SMEM)
    # out_ref     : (Nb, C, H*W)      f32  residual output, NCHW-flat (lane dense)
    M = Nb * H * W
    fea_pad = fea_pad_ref[...]

    def conv3_bn_relu(gate_pad, w_ref, b_ref):
        # Gate (padding zeros preserved), cast to bf16 ONCE, then build the
        # im2col patch and run a single MXU matmul with f32 accumulation.
        sc_b = (fea_pad * gate_pad[..., None]).astype(jnp.bfloat16)
        patches = [sc_b[:, dy:dy + H, dx:dx + W, :].reshape(M, C)
                   for dy in range(3) for dx in range(3)]
        im2col = jnp.concatenate(patches, axis=-1)                  # (M, 9C)
        y = jnp.dot(im2col, w_ref[...],
                    preferred_element_type=jnp.float32)             # (M, C)
        return jnp.maximum(y + b_ref[...], 0.0)                     # BN bias + ReLU

    # TODO(synk): SCBlock's definition is not present in the provided source;
    # using a sigmoid-gated residual modulation fea * (sigmoid(pred) + 1)
    # (== fea*sigmoid(pred) + fea) as a stand-in; padding zeros are preserved.
    y1 = conv3_bn_relu(jax.nn.sigmoid(coarse_ref[...]) + 1.0, w1_ref, b1_ref)
    y2 = conv3_bn_relu(jax.nn.sigmoid(err_ref[...]) + 1.0, w2_ref, b2_ref)
    fuse = y1 + y2                                                   # (M, C)

    # SpatialAttention: channel max -> 3x3 conv (1->1, pad=1) -> sigmoid.
    # Implemented as 9 scalar * shifted-map adds (no banded matrix / MXU).
    m = jnp.max(fuse.reshape(Nb, H, W, C), axis=-1)                  # (Nb,H,W)
    zr = jnp.zeros((Nb, 1, W + 2), jnp.float32)
    zc = jnp.zeros((Nb, H, 1), jnp.float32)
    mpad = jnp.concatenate(
        [zr, jnp.concatenate([zc, m, zc], axis=2), zr], axis=1)      # (Nb,H+2,W+2)
    logit = jnp.zeros((Nb, H, W), jnp.float32)
    for dy in range(3):
        for dx in range(3):
            logit = logit + wsa_ref[dy * 3 + dx] * mpad[:, dy:dy + H, dx:dx + W]
    att = jax.nn.sigmoid(logit).reshape(Nb, 1, H * W)

    # res = att * fea + fea == fea * (att + 1); lane-dense NCHW-flat store.
    out_ref[...] = fea_cf_ref[...] * (att + 1.0)


# ----------------------------------------------------------------------------
# Wrapper helpers
# ----------------------------------------------------------------------------
def _pick_batch_block(N):
    # Prefer >=4 grid steps (DMA pipeline depth + v7x megacore), accept >=2.
    for nb in (8, 4, 2):
        if N % nb == 0 and N // nb >= 4:
            return nb
    for nb in (4, 2):
        if N % nb == 0 and N // nb >= 2:
            return nb
    return 1


def _vmem_limit_bytes():
    # Generation-aware scoped-VMEM budget: half of physical capacity,
    # capped at 96 MiB, floored at the 32 MiB default.
    try:
        cap = int(pltpu.get_tpu_info().vmem_capacity_bytes)
    except Exception:
        cap = 64 * 1024 * 1024
    return max(32 * 1024 * 1024, min(cap // 2, 96 * 1024 * 1024))


# ----------------------------------------------------------------------------
# Wrapper
# ----------------------------------------------------------------------------
def g_fuse_forward(fea_nchw, coarse_nchw, err_nchw, params):
    """fea: (N,C,H,W), coarse/err: (N,1,H,W)  ->  (N,C,H,W)."""
    w1, s1, b1, w2, s2, b2, wsa = params
    fea_nchw = fea_nchw.astype(jnp.float32)
    N, C, H, W = fea_nchw.shape
    Nb = _pick_batch_block(N)

    fea = jnp.transpose(fea_nchw, (0, 2, 3, 1))                      # NHWC
    coarse = coarse_nchw.astype(jnp.float32).reshape(N, H, W)
    err = err_nchw.astype(jnp.float32).reshape(N, H, W)

    fea_pad = jnp.pad(fea, ((0, 0), (1, 1), (1, 1), (0, 0)))
    coarse_pad = jnp.pad(coarse, ((0, 0), (1, 1), (1, 1)))
    err_pad = jnp.pad(err, ((0, 0), (1, 1), (1, 1)))
    # TODO(synk): the feature map is shipped twice (padded NHWC + NCHW-flat);
    # on v5e (HBM-bound first) derive fea_cf in-kernel from fea_pad instead.
    fea_cf = fea_nchw.reshape(N, C, H * W)               # residual, lane-dense

    # Fold BN scale into the conv weights in f32, then cast once to bf16.
    w1f = (w1.reshape(9 * C, C) * s1.reshape(1, C)).astype(jnp.bfloat16)
    w2f = (w2.reshape(9 * C, C) * s2.reshape(1, C)).astype(jnp.bfloat16)
    wsa_flat = wsa.reshape(9).astype(jnp.float32)        # SA taps -> SMEM

    img_spec = pl.BlockSpec((Nb, H + 2, W + 2, C), lambda n: (n, 0, 0, 0))
    map_spec = pl.BlockSpec((Nb, H + 2, W + 2), lambda n: (n, 0, 0))
    cf_spec = pl.BlockSpec((Nb, C, H * W), lambda n: (n, 0, 0))
    w_spec = pl.BlockSpec((9 * C, C), lambda n: (0, 0))
    b_spec = pl.BlockSpec((1, C), lambda n: (0, 0))
    sa_spec = pl.BlockSpec(memory_space=pltpu.MemorySpace.SMEM)

    grid_spec = pltpu.PrefetchScalarGridSpec(
        num_scalar_prefetch=0,
        grid=(N // Nb,),
        in_specs=[
            img_spec, map_spec, map_spec, cf_spec,
            w_spec, b_spec,
            w_spec, b_spec,
            sa_spec,
        ],
        out_specs=pl.BlockSpec((Nb, C, H * W), lambda n: (n, 0, 0)),
    )

    out_flat = pl.pallas_call(
        functools.partial(_g_fuse_kernel, H, W, C, Nb),
        out_shape=jax.ShapeDtypeStruct((N, C, H * W), jnp.float32),
        grid_spec=grid_spec,
        compiler_params=pltpu.CompilerParams(
            dimension_semantics=("parallel",),
            vmem_limit_bytes=_vmem_limit_bytes()),
    )(fea_pad, coarse_pad, err_pad, fea_cf,
      w1f, b1, w2f, b2, wsa_flat)

    return out_flat.reshape(N, C, H, W)                  # already NCHW


# ----------------------------------------------------------------------------
# Deterministic parameter init (mirrors the module's __init__ shapes)
# ----------------------------------------------------------------------------
def init_params(key, C, eps=1e-5):
    ks = jax.random.split(key, 5)

    def conv_w(k):
        # PyTorch layout (Cout, Cin, 3, 3), std=0.01 as in BasicConv2d.
        w = 0.01 * jax.random.normal(k, (C, C, 3, 3), jnp.float32)
        # -> (kh, kw, Cin, Cout) -> (9, Cin, Cout) per-offset layout.
        return jnp.transpose(w, (2, 3, 1, 0)).reshape(9, C, C)

    def bn(k):
        k1, k2, k3, k4 = jax.random.split(k, 4)
        gamma = 1.0 + 0.1 * jax.random.normal(k1, (C,), jnp.float32)
        beta = 0.1 * jax.random.normal(k2, (C,), jnp.float32)
        mean = 0.1 * jax.random.normal(k3, (C,), jnp.float32)
        var = jnp.abs(jax.random.normal(k4, (C,), jnp.float32)) + 0.5
        scale = gamma / jnp.sqrt(var + eps)              # folded eval-mode BN
        bias = beta - mean * scale
        return scale.reshape(1, C), bias.reshape(1, C)

    w1 = conv_w(ks[0]); s1, b1 = bn(ks[1])
    w2 = conv_w(ks[2]); s2, b2 = bn(ks[3])
    wsa = 0.3 * jax.random.normal(ks[4], (3, 3), jnp.float32)  # (1,1,3,3) conv
    return w1, s1, b1, w2, s2, b2, wsa


# ----------------------------------------------------------------------------
# Pure-JAX reference (identical BN-folded bf16 weights / same quantization)
# ----------------------------------------------------------------------------
def reference_forward(fea_nchw, coarse_nchw, err_nchw, params):
    w1, s1, b1, w2, s2, b2, wsa = params
    fea = jnp.transpose(fea_nchw, (0, 2, 3, 1)).astype(jnp.float32)
    coarse = jnp.transpose(coarse_nchw, (0, 2, 3, 1)).astype(jnp.float32)
    err = jnp.transpose(err_nchw, (0, 2, 3, 1)).astype(jnp.float32)
    C = fea.shape[-1]

    def conv3(x, w_hwio, precision):
        return jax.lax.conv_general_dilated(
            x, w_hwio, (1, 1), ((1, 1), (1, 1)),
            dimension_numbers=("NHWC", "HWIO", "NHWC"),
            preferred_element_type=jnp.float32,
            precision=precision)

    def sc(x, p):                                       # SC stand-in
        return x * (jax.nn.sigmoid(p) + 1.0)

    def cbr(x, w9, s, b):
        # Match kernel numerics: BN scale folded in f32, bf16 operands, f32 acc.
        wb = (w9.reshape(3, 3, C, C) * s.reshape(1, 1, 1, C)).astype(jnp.bfloat16)
        y = conv3(x.astype(jnp.bfloat16), wb, jax.lax.Precision.DEFAULT)
        return jnp.maximum(y + b.reshape(1, 1, 1, C), 0.0)

    fuse = cbr(sc(fea, coarse), w1, s1, b1) + cbr(sc(fea, err), w2, s2, b2)
    m = jnp.max(fuse, axis=-1, keepdims=True)
    att = jax.nn.sigmoid(conv3(m, wsa.reshape(3, 3, 1, 1),
                               jax.lax.Precision.HIGHEST))
    res = fea * (att + 1.0)
    return jnp.transpose(res, (0, 3, 1, 2))


if __name__ == "__main__":
    N, C, H, W = 2, 32, 16, 16          # inplanes=32 (sub_channel unused by SC stand-in)
    key = jax.random.PRNGKey(0)
    k_fea, k_c, k_e, k_p = jax.random.split(key, 4)

    fea = jax.random.normal(k_fea, (N, C, H, W), jnp.float32)
    coarse = jax.random.normal(k_c, (N, 1, H, W), jnp.float32)
    err = jax.random.normal(k_e, (N, 1, H, W), jnp.float32)
    params = init_params(k_p, C)

    out = jax.block_until_ready(g_fuse_forward(fea, coarse, err, params))
    ref = jax.block_until_ready(reference_forward(fea, coarse, err, params))

    assert out.shape == (N, C, H, W)
    max_err = float(jnp.max(jnp.abs(out - ref)))
    assert jnp.allclose(out, ref, rtol=1e-3, atol=1e-3), max_err
    print("KERNEL_OK")
</pallas_src>

<mosaic_0001>
module attributes {stable_mosaic.version = 11 : i64} {
  func.func @_g_fuse_kernel(%arg0: i32, %arg1: memref<1x18x18x32xf32, #tpu.memory_space<vmem>>, %arg2: memref<1x18x18xf32, #tpu.memory_space<vmem>>, %arg3: memref<1x18x18xf32, #tpu.memory_space<vmem>>, %arg4: memref<1x32x256xf32, #tpu.memory_space<vmem>>, %arg5: memref<288x32xbf16, #tpu.memory_space<vmem>>, %arg6: memref<1x32xf32, #tpu.memory_space<vmem>>, %arg7: memref<288x32xbf16, #tpu.memory_space<vmem>>, %arg8: memref<1x32xf32, #tpu.memory_space<vmem>>, %arg9: memref<9xf32, #tpu.memory_space<smem>>, %arg10: memref<1x32x256xf32, #tpu.memory_space<vmem>>) attributes {dimension_semantics = [#tpu.dimension_semantics<parallel>], iteration_bounds = array<i64: 2>, scalar_prefetch = 0 : i64, scratch_operands = 0 : i64, tpu.core_type = #tpu.core_type<tc>, window_params = [{transform_indices = @transform_0, window_bounds = array<i64: 1, 18, 18, 32>}, {transform_indices = @transform_1, window_bounds = array<i64: 1, 18, 18>}, {transform_indices = @transform_2, window_bounds = array<i64: 1, 18, 18>}, {transform_indices = @transform_3, window_bounds = array<i64: 1, 32, 256>}, {pipeline_mode = #tpu.pipeline_mode<synchronous>, transform_indices = @transform_4, window_bounds = array<i64: 288, 32>}, {pipeline_mode = #tpu.pipeline_mode<synchronous>, transform_indices = @transform_5, window_bounds = array<i64: 1, 32>}, {pipeline_mode = #tpu.pipeline_mode<synchronous>, transform_indices = @transform_6, window_bounds = array<i64: 288, 32>}, {pipeline_mode = #tpu.pipeline_mode<synchronous>, transform_indices = @transform_7, window_bounds = array<i64: 1, 32>}, {transform_indices = @transform_8, window_bounds = array<i64: 9>}, {transform_indices = @transform_9, window_bounds = array<i64: 1, 32, 256>}]} {
    %c0 = arith.constant 0 : index
    %c0_0 = arith.constant 0 : index
    %c0_1 = arith.constant 0 : index
    %c0_2 = arith.constant 0 : index
    %0 = vector.load %arg1[%c0, %c0_0, %c0_1, %c0_2] : memref<1x18x18x32xf32, #tpu.memory_space<vmem>>, vector<1x18x18x32xf32>
    %c0_3 = arith.constant 0 : index
    %c0_4 = arith.constant 0 : index
    %c0_5 = arith.constant 0 : index
    %1 = vector.load %arg2[%c0_3, %c0_4, %c0_5] : memref<1x18x18xf32, #tpu.memory_space<vmem>>, vector<1x18x18xf32>
    %2 = arith.negf %1 : vector<1x18x18xf32>
    %3 = math.exp %2 : vector<1x18x18xf32>
    %cst = arith.constant 1.000000e+00 : f32
    %4 = vector.broadcast %cst : f32 to vector<1x18x18xf32>
    %5 = arith.addf %4, %3 : vector<1x18x18xf32>
    %6 = arith.divf %4, %5 : vector<1x18x18xf32>
    %cst_6 = arith.constant 1.000000e+00 : f32
    %7 = vector.broadcast %cst_6 : f32 to vector<1x18x18xf32>
    %8 = arith.addf %6, %7 : vector<1x18x18xf32>
    %9 = vector.shape_cast %8 : vector<1x18x18xf32> to vector<1x18x18x1xf32>
    %10 = vector.broadcast %9 : vector<1x18x18x1xf32> to vector<1x18x18x32xf32>
    %11 = arith.mulf %0, %10 : vector<1x18x18x32xf32>
    %12 = arith.truncf %11 : vector<1x18x18x32xf32> to vector<1x18x18x32xbf16>
    %13 = vector.extract_strided_slice %12 {offsets = [0, 0, 0, 0], sizes = [1, 16, 16, 32], strides = [1, 1, 1, 1]} : vector<1x18x18x32xbf16> to vector<1x16x16x32xbf16>
    %14 = vector.shape_cast %13 : vector<1x16x16x32xbf16> to vector<256x32xbf16>
    %15 = vector.extract_strided_slice %12 {offsets = [0, 0, 1, 0], sizes = [1, 16, 16, 32], strides = [1, 1, 1, 1]} : vector<1x18x18x32xbf16> to vector<1x16x16x32xbf16>
    %16 = vector.shape_cast %15 : vector<1x16x16x32xbf16> to vector<256x32xbf16>
    %17 = vector.extract_strided_slice %12 {offsets = [0, 0, 2, 0], sizes = [1, 16, 16, 32], strides = [1, 1, 1, 1]} : vector<1x18x18x32xbf16> to vector<1x16x16x32xbf16>
    %18 = vector.shape_cast %17 : vector<1x16x16x32xbf16> to vector<256x32xbf16>
    %19 = vector.extract_strided_slice %12 {offsets = [0, 1, 0, 0], sizes = [1, 16, 16, 32], strides = [1, 1, 1, 1]} : vector<1x18x18x32xbf16> to vector<1x16x16x32xbf16>
    %20 = vector.shape_cast %19 : vector<1x16x16x32xbf16> to vector<256x32xbf16>
    %21 = vector.extract_strided_slice %12 {offsets = [0, 1, 1, 0], sizes = [1, 16, 16, 32], strides = [1, 1, 1, 1]} : vector<1x18x18x32xbf16> to vector<1x16x16x32xbf16>
    %22 = vector.shape_cast %21 : vector<1x16x16x32xbf16> to vector<256x32xbf16>
    %23 = vector.extract_strided_slice %12 {offsets = [0, 1, 2, 0], sizes = [1, 16, 16, 32], strides = [1, 1, 1, 1]} : vector<1x18x18x32xbf16> to vector<1x16x16x32xbf16>
    %24 = vector.shape_cast %23 : vector<1x16x16x32xbf16> to vector<256x32xbf16>
    %25 = vector.extract_strided_slice %12 {offsets = [0, 2, 0, 0], sizes = [1, 16, 16, 32], strides = [1, 1, 1, 1]} : vector<1x18x18x32xbf16> to vector<1x16x16x32xbf16>
    %26 = vector.shape_cast %25 : vector<1x16x16x32xbf16> to vector<256x32xbf16>
    %27 = vector.extract_strided_slice %12 {offsets = [0, 2, 1, 0], sizes = [1, 16, 16, 32], strides = [1, 1, 1, 1]} : vector<1x18x18x32xbf16> to vector<1x16x16x32xbf16>
    %28 = vector.shape_cast %27 : vector<1x16x16x32xbf16> to vector<256x32xbf16>
    %29 = vector.extract_strided_slice %12 {offsets = [0, 2, 2, 0], sizes = [1, 16, 16, 32], strides = [1, 1, 1, 1]} : vector<1x18x18x32xbf16> to vector<1x16x16x32xbf16>
    %30 = vector.shape_cast %29 : vector<1x16x16x32xbf16> to vector<256x32xbf16>
    %31 = tpu.concatenate %14, %16, %18, %20, %22, %24, %26, %28, %30 in 1 : vector<256x32xbf16>, vector<256x32xbf16>, vector<256x32xbf16>, vector<256x32xbf16>, vector<256x32xbf16>, vector<256x32xbf16>, vector<256x32xbf16>, vector<256x32xbf16>, vector<256x32xbf16> -> vector<256x288xbf16>
    %c0_7 = arith.constant 0 : index
    %c0_8 = arith.constant 0 : index
    %32 = vector.load %arg5[%c0_7, %c0_8] : memref<288x32xbf16, #tpu.memory_space<vmem>>, vector<288x32xbf16>
    %cst_9 = arith.constant dense<0.000000e+00> : vector<256x32xf32>
    %33 = tpu.matmul %31, %32, %cst_9 {dimension_numbers = #tpu.dot_dimension_numbers<[1], [0], [0], [1], [0, 0, 1, 1], [], []>} : vector<256x288xbf16>, vector<288x32xbf16>, vector<256x32xf32> -> vector<256x32xf32>
    %c0_10 = arith.constant 0 : index
    %c0_11 = arith.constant 0 : index
    %34 = vector.load %arg6[%c0_10, %c0_11] : memref<1x32xf32, #tpu.memory_space<vmem>>, vector<1x32xf32>
    %35 = vector.broadcast %34 : vector<1x32xf32> to vector<256x32xf32>
    %36 = arith.addf %33, %35 : vector<256x32xf32>
    %cst_12 = arith.constant 0.000000e+00 : f32
    %37 = vector.broadcast %cst_12 : f32 to vector<256x32xf32>
    %38 = arith.maximumf %36, %37 : vector<256x32xf32>
    %c0_13 = arith.constant 0 : index
    %c0_14 = arith.constant 0 : index
    %c0_15 = arith.constant 0 : index
    %39 = vector.load %arg3[%c0_13, %c0_14, %c0_15] : memref<1x18x18xf32, #tpu.memory_space<vmem>>, vector<1x18x18xf32>
    %40 = arith.negf %39 : vector<1x18x18xf32>
    %41 = math.exp %40 : vector<1x18x18xf32>
    %cst_16 = arith.constant 1.000000e+00 : f32
    %42 = vector.broadcast %cst_16 : f32 to vector<1x18x18xf32>
    %43 = arith.addf %42, %41 : vector<1x18x18xf32>
    %44 = arith.divf %42, %43 : vector<1x18x18xf32>
    %cst_17 = arith.constant 1.000000e+00 : f32
    %45 = vector.broadcast %cst_17 : f32 to vector<1x18x18xf32>
    %46 = arith.addf %44, %45 : vector<1x18x18xf32>
    %47 = vector.shape_cast %46 : vector<1x18x18xf32> to vector<1x18x18x1xf32>
    %48 = vector.broadcast %47 : vector<1x18x18x1xf32> to vector<1x18x18x32xf32>
    %49 = arith.mulf %0, %48 : vector<1x18x18x32xf32>
    %50 = arith.truncf %49 : vector<1x18x18x32xf32> to vector<1x18x18x32xbf16>
    %51 = vector.extract_strided_slice %50 {offsets = [0, 0, 0, 0], sizes = [1, 16, 16, 32], strides = [1, 1, 1, 1]} : vector<1x18x18x32xbf16> to vector<1x16x16x32xbf16>
    %52 = vector.shape_cast %51 : vector<1x16x16x32xbf16> to vector<256x32xbf16>
    %53 = vector.extract_strided_slice %50 {offsets = [0, 0, 1, 0], sizes = [1, 16, 16, 32], strides = [1, 1, 1, 1]} : vector<1x18x18x32xbf16> to vector<1x16x16x32xbf16>
    %54 = vector.shape_cast %53 : vector<1x16x16x32xbf16> to vector<256x32xbf16>
    %55 = vector.extract_strided_slice %50 {offsets = [0, 0, 2, 0], sizes = [1, 16, 16, 32], strides = [1, 1, 1, 1]} : vector<1x18x18x32xbf16> to vector<1x16x16x32xbf16>
    %56 = vector.shape_cast %55 : vector<1x16x16x32xbf16> to vector<256x32xbf16>
    %57 = vector.extract_strided_slice %50 {offsets = [0, 1, 0, 0], sizes = [1, 16, 16, 32], strides = [1, 1, 1, 1]} : vector<1x18x18x32xbf16> to vector<1x16x16x32xbf16>
    %58 = vector.shape_cast %57 : vector<1x16x16x32xbf16> to vector<256x32xbf16>
    %59 = vector.extract_strided_slice %50 {offsets = [0, 1, 1, 0], sizes = [1, 16, 16, 32], strides = [1, 1, 1, 1]} : vector<1x18x18x32xbf16> to vector<1x16x16x32xbf16>
    %60 = vector.shape_cast %59 : vector<1x16x16x32xbf16> to vector<256x32xbf16>
    %61 = vector.extract_strided_slice %50 {offsets = [0, 1, 2, 0], sizes = [1, 16, 16, 32], strides = [1, 1, 1, 1]} : vector<1x18x18x32xbf16> to vector<1x16x16x32xbf16>
    %62 = vector.shape_cast %61 : vector<1x16x16x32xbf16> to vector<256x32xbf16>
    %63 = vector.extract_strided_slice %50 {offsets = [0, 2, 0, 0], sizes = [1, 16, 16, 32], strides = [1, 1, 1, 1]} : vector<1x18x18x32xbf16> to vector<1x16x16x32xbf16>
    %64 = vector.shape_cast %63 : vector<1x16x16x32xbf16> to vector<256x32xbf16>
    %65 = vector.extract_strided_slice %50 {offsets = [0, 2, 1, 0], sizes = [1, 16, 16, 32], strides = [1, 1, 1, 1]} : vector<1x18x18x32xbf16> to vector<1x16x16x32xbf16>
    %66 = vector.shape_cast %65 : vector<1x16x16x32xbf16> to vector<256x32xbf16>
    %67 = vector.extract_strided_slice %50 {offsets = [0, 2, 2, 0], sizes = [1, 16, 16, 32], strides = [1, 1, 1, 1]} : vector<1x18x18x32xbf16> to vector<1x16x16x32xbf16>
    %68 = vector.shape_cast %67 : vector<1x16x16x32xbf16> to vector<256x32xbf16>
    %69 = tpu.concatenate %52, %54, %56, %58, %60, %62, %64, %66, %68 in 1 : vector<256x32xbf16>, vector<256x32xbf16>, vector<256x32xbf16>, vector<256x32xbf16>, vector<256x32xbf16>, vector<256x32xbf16>, vector<256x32xbf16>, vector<256x32xbf16>, vector<256x32xbf16> -> vector<256x288xbf16>
    %c0_18 = arith.constant 0 : index
    %c0_19 = arith.constant 0 : index
    %70 = vector.load %arg7[%c0_18, %c0_19] : memref<288x32xbf16, #tpu.memory_space<vmem>>, vector<288x32xbf16>
    %cst_20 = arith.constant dense<0.000000e+00> : vector<256x32xf32>
    %71 = tpu.matmul %69, %70, %cst_20 {dimension_numbers = #tpu.dot_dimension_numbers<[1], [0], [0], [1], [0, 0, 1, 1], [], []>} : vector<256x288xbf16>, vector<288x32xbf16>, vector<256x32xf32> -> vector<256x32xf32>
    %c0_21 = arith.constant 0 : index
    %c0_22 = arith.constant 0 : index
    %72 = vector.load %arg8[%c0_21, %c0_22] : memref<1x32xf32, #tpu.memory_space<vmem>>, vector<1x32xf32>
    %73 = vector.broadcast %72 : vector<1x32xf32> to vector<256x32xf32>
    %74 = arith.addf %71, %73 : vector<256x32xf32>
    %cst_23 = arith.constant 0.000000e+00 : f32
    %75 = vector.broadcast %cst_23 : f32 to vector<256x32xf32>
    %76 = arith.maximumf %74, %75 : vector<256x32xf32>
    %77 = arith.addf %38, %76 : vector<256x32xf32>
    %78 = vector.shape_cast %77 : vector<256x32xf32> to vector<1x16x16x32xf32>
    %cst_24 = arith.constant dense<0xFF800000> : vector<1x16x16xf32>
    %79 = vector.multi_reduction <maximumf>, %78, %cst_24 [3] : vector<1x16x16x32xf32> to vector<1x16x16xf32>
    %cst_25 = arith.constant 0.000000e+00 : f32
    %80 = vector.broadcast %cst_25 : f32 to vector<1x1x18xf32>
    %cst_26 = arith.constant 0.000000e+00 : f32
    %81 = vector.broadcast %cst_26 : f32 to vector<1x16x1xf32>
    %82 = tpu.concatenate %81, %79, %81 in 2 : vector<1x16x1xf32>, vector<1x16x16xf32>, vector<1x16x1xf32> -> vector<1x16x18xf32>
    %83 = tpu.concatenate %80, %82, %80 in 1 : vector<1x1x18xf32>, vector<1x16x18xf32>, vector<1x1x18xf32> -> vector<1x18x18xf32>
    %cst_27 = arith.constant 0.000000e+00 : f32
    %84 = vector.broadcast %cst_27 : f32 to vector<1x16x16xf32>
    %c0_28 = arith.constant 0 : index
    %85 = memref.load %arg9[%c0_28] : memref<9xf32, #tpu.memory_space<smem>>
    %86 = vector.extract_strided_slice %83 {offsets = [0, 0, 0], sizes = [1, 16, 16], strides = [1, 1, 1]} : vector<1x18x18xf32> to vector<1x16x16xf32>
    %87 = vector.broadcast %85 : f32 to vector<1x16x16xf32>
    %88 = arith.mulf %87, %86 : vector<1x16x16xf32>
    %89 = arith.addf %84, %88 : vector<1x16x16xf32>
    %c1 = arith.constant 1 : index
    %90 = memref.load %arg9[%c1] : memref<9xf32, #tpu.memory_space<smem>>
    %91 = vector.extract_strided_slice %83 {offsets = [0, 0, 1], sizes = [1, 16, 16], strides = [1, 1, 1]} : vector<1x18x18xf32> to vector<1x16x16xf32>
    %92 = vector.broadcast %90 : f32 to vector<1x16x16xf32>
    %93 = arith.mulf %92, %91 : vector<1x16x16xf32>
    %94 = arith.addf %89, %93 : vector<1x16x16xf32>
    %c2 = arith.constant 2 : index
    %95 = memref.load %arg9[%c2] : memref<9xf32, #tpu.memory_space<smem>>
    %96 = vector.extract_strided_slice %83 {offsets = [0, 0, 2], sizes = [1, 16, 16], strides = [1, 1, 1]} : vector<1x18x18xf32> to vector<1x16x16xf32>
    %97 = vector.broadcast %95 : f32 to vector<1x16x16xf32>
    %98 = arith.mulf %97, %96 : vector<1x16x16xf32>
    %99 = arith.addf %94, %98 : vector<1x16x16xf32>
    %c3 = arith.constant 3 : index
    %100 = memref.load %arg9[%c3] : memref<9xf32, #tpu.memory_space<smem>>
    %101 = vector.extract_strided_slice %83 {offsets = [0, 1, 0], sizes = [1, 16, 16], strides = [1, 1, 1]} : vector<1x18x18xf32> to vector<1x16x16xf32>
    %102 = vector.broadcast %100 : f32 to vector<1x16x16xf32>
    %103 = arith.mulf %102, %101 : vector<1x16x16xf32>
    %104 = arith.addf %99, %103 : vector<1x16x16xf32>
    %c4 = arith.constant 4 : index
    %105 = memref.load %arg9[%c4] : memref<9xf32, #tpu.memory_space<smem>>
    %106 = vector.extract_strided_slice %83 {offsets = [0, 1, 1], sizes = [1, 16, 16], strides = [1, 1, 1]} : vector<1x18x18xf32> to vector<1x16x16xf32>
    %107 = vector.broadcast %105 : f32 to vector<1x16x16xf32>
    %108 = arith.mulf %107, %106 : vector<1x16x16xf32>
    %109 = arith.addf %104, %108 : vector<1x16x16xf32>
    %c5 = arith.constant 5 : index
    %110 = memref.load %arg9[%c5] : memref<9xf32, #tpu.memory_space<smem>>
    %111 = vector.extract_strided_slice %83 {offsets = [0, 1, 2], sizes = [1, 16, 16], strides = [1, 1, 1]} : vector<1x18x18xf32> to vector<1x16x16xf32>
    %112 = vector.broadcast %110 : f32 to vector<1x16x16xf32>
    %113 = arith.mulf %112, %111 : vector<1x16x16xf32>
    %114 = arith.addf %109, %113 : vector<1x16x16xf32>
    %c6 = arith.constant 6 : index
    %115 = memref.load %arg9[%c6] : memref<9xf32, #tpu.memory_space<smem>>
    %116 = vector.extract_strided_slice %83 {offsets = [0, 2, 0], sizes = [1, 16, 16], strides = [1, 1, 1]} : vector<1x18x18xf32> to vector<1x16x16xf32>
    %117 = vector.broadcast %115 : f32 to vector<1x16x16xf32>
    %118 = arith.mulf %117, %116 : vector<1x16x16xf32>
    %119 = arith.addf %114, %118 : vector<1x16x16xf32>
    %c7 = arith.constant 7 : index
    %120 = memref.load %arg9[%c7] : memref<9xf32, #tpu.memory_space<smem>>
    %121 = vector.extract_strided_slice %83 {offsets = [0, 2, 1], sizes = [1, 16, 16], strides = [1, 1, 1]} : vector<1x18x18xf32> to vector<1x16x16xf32>
    %122 = vector.broadcast %120 : f32 to vector<1x16x16xf32>
    %123 = arith.mulf %122, %121 : vector<1x16x16xf32>
    %124 = arith.addf %119, %123 : vector<1x16x16xf32>
    %c8 = arith.constant 8 : index
    %125 = memref.load %arg9[%c8] : memref<9xf32, #tpu.memory_space<smem>>
    %126 = vector.extract_strided_slice %83 {offsets = [0, 2, 2], sizes = [1, 16, 16], strides = [1, 1, 1]} : vector<1x18x18xf32> to vector<1x16x16xf32>
    %127 = vector.broadcast %125 : f32 to vector<1x16x16xf32>
    %128 = arith.mulf %127, %126 : vector<1x16x16xf32>
    %129 = arith.addf %124, %128 : vector<1x16x16xf32>
    %130 = arith.negf %129 : vector<1x16x16xf32>
    %131 = math.exp %130 : vector<1x16x16xf32>
    %cst_29 = arith.constant 1.000000e+00 : f32
    %132 = vector.broadcast %cst_29 : f32 to vector<1x16x16xf32>
    %133 = arith.addf %132, %131 : vector<1x16x16xf32>
    %134 = arith.divf %132, %133 : vector<1x16x16xf32>
    %135 = vector.shape_cast %134 : vector<1x16x16xf32> to vector<1x1x256xf32>
    %c0_30 = arith.constant 0 : index
    %c0_31 = arith.constant 0 : index
    %c0_32 = arith.constant 0 : index
    %136 = vector.load %arg4[%c0_30, %c0_31, %c0_32] : memref<1x32x256xf32, #tpu.memory_space<vmem>>, vector<1x32x256xf32>
    %cst_33 = arith.constant 1.000000e+00 : f32
    %137 = vector.broadcast %cst_33 : f32 to vector<1x1x256xf32>
    %138 = arith.addf %135, %137 : vector<1x1x256xf32>
    %139 = vector.broadcast %138 : vector<1x1x256xf32> to vector<1x32x256xf32>
    %140 = arith.mulf %136, %139 : vector<1x32x256xf32>
    %c0_34 = arith.constant 0 : index
    %c0_35 = arith.constant 0 : index
    %c0_36 = arith.constant 0 : index
    %141 = vector.load %arg10[%c0_34, %c0_35, %c0_36] : memref<1x32x256xf32, #tpu.memory_space<vmem>>, vector<1x32x256xf32>
    tpu.vector_store %arg10[%c0_34, %c0_35, %c0_36], %140 {strides = array<i32>} : memref<1x32x256xf32, #tpu.memory_space<vmem>>, vector<1x32x256xf32>,
    return
  }
  func.func @transform_0(%arg0: i32) -> (i32, i32, i32, i32) {
    %c0_i32 = arith.constant 0 : i32
    %c0_i32_0 = arith.constant 0 : i32
    %c0_i32_1 = arith.constant 0 : i32
    %c0_i32_2 = arith.constant 0 : i32
    return %arg0, %c0_i32, %c0_i32_0, %c0_i32_1 : i32, i32, i32, i32
  }
  func.func @transform_1(%arg0: i32) -> (i32, i32, i32) {
    %c0_i32 = arith.constant 0 : i32
    %c0_i32_0 = arith.constant 0 : i32
    %c0_i32_1 = arith.constant 0 : i32
    return %arg0, %c0_i32, %c0_i32_0 : i32, i32, i32
  }
  func.func @transform_2(%arg0: i32) -> (i32, i32, i32) {
    %c0_i32 = arith.constant 0 : i32
    %c0_i32_0 = arith.constant 0 : i32
    %c0_i32_1 = arith.constant 0 : i32
    return %arg0, %c0_i32, %c0_i32_0 : i32, i32, i32
  }
  func.func @transform_3(%arg0: i32) -> (i32, i32, i32) {
    %c0_i32 = arith.constant 0 : i32
    %c0_i32_0 = arith.constant 0 : i32
    %c0_i32_1 = arith.constant 0 : i32
    return %arg0, %c0_i32, %c0_i32_0 : i32, i32, i32
  }
  func.func @transform_4(%arg0: i32) -> (i32, i32) {
    %c0_i32 = arith.constant 0 : i32
    %c0_i32_0 = arith.constant 0 : i32
    %c0_i32_1 = arith.constant 0 : i32
    return %c0_i32, %c0_i32_0 : i32, i32
  }
  func.func @transform_5(%arg0: i32) -> (i32, i32) {
    %c0_i32 = arith.constant 0 : i32
    %c0_i32_0 = arith.constant 0 : i32
    %c0_i32_1 = arith.constant 0 : i32
    return %c0_i32, %c0_i32_0 : i32, i32
  }
  func.func @transform_6(%arg0: i32) -> (i32, i32) {
    %c0_i32 = arith.constant 0 : i32
    %c0_i32_0 = arith.constant 0 : i32
    %c0_i32_1 = arith.constant 0 : i32
    return %c0_i32, %c0_i32_0 : i32, i32
  }
  func.func @transform_7(%arg0: i32) -> (i32, i32) {
    %c0_i32 = arith.constant 0 : i32
    %c0_i32_0 = arith.constant 0 : i32
    %c0_i32_1 = arith.constant 0 : i32
    return %c0_i32, %c0_i32_0 : i32, i32
  }
  func.func @transform_8(%arg0: i32) -> i32 {
    %c0_i32 = arith.constant 0 : i32
    %c0_i32_0 = arith.constant 0 : i32
    return %c0_i32 : i32
  }
  func.func @transform_9(%arg0: i32) -> (i32, i32, i32) {
    %c0_i32 = arith.constant 0 : i32
    %c0_i32_0 = arith.constant 0 : i32
    %c0_i32_1 = arith.constant 0 : i32
    return %arg0, %c0_i32, %c0_i32_0 : i32, i32, i32
  }
}

</mosaic_0001>

<bundles_post_ra>
// kernel: tpu_custom_call.1
= control target key start
LH: loop header
LB: loop body
LE: loop exit
PB: predicated region body
PF: predicated region fallthrough
CT: control target
= control target key end

     0   :  { %14 = vsyncpa [#allocation4], 0  ;;  %s7870_s0 = inlined_call_operand.vmem [shape: f32[2,18,18,32], index: 0, kind: input, shape index: {}]   ;;  %s7871_s1 = inlined_call_operand.vmem [shape: f32[2,18,18], index: 1, kind: input, shape index: {}]   ;;  %s7872_s2 = inlined_call_operand.vmem [shape: f32[2,18,18], index: 2, kind: input, shape index: {}]   ;;  %s7873_s3 = inlined_call_operand.vmem [shape: f32[2,32,256], index: 3, kind: input, shape index: {}]   ;;  %s7874_s4 = inlined_call_operand.vmem [shape: bf16[288,32], index: 4, kind: input, shape index: {}]   ;;  %s7875_s5 = inlined_call_operand.vmem [shape: f32[1,32], index: 5, kind: input, shape index: {}]   ;;  %s7876_s6 = inlined_call_operand.vmem [shape: bf16[288,32], index: 6, kind: input, shape index: {}]   ;;  %s7877_s7 = inlined_call_operand.vmem [shape: f32[1,32], index: 7, kind: input, shape index: {}]   ;;  %s7878_s8 = inlined_call_operand.vmem [shape: f32[9], index: 8, kind: input, shape index: {}]   ;;  %s7879_s9 = inlined_call_operand.hbm [shape: f32[2,32,256], index: 9, kind: output, shape index: {}]  }
   0x1   :  { %15 = vsyncpa [#allocation3], 0 }
   0x2   :  { %17 = vsyncpa [#allocation3 + $0x1], 0  ;;  %s5425_s30 = smov 0   ;;  %s5427_s10 = smov 0  }
   0x3   :  { %s5429_s11 = smov 0   ;;  %s5431_s12 = smov 0  }
   0x4 LB: > { %s5446_s13 = sadd.s32 4294967295, %s5358_s12   ;;  %s4660_s14 = sadd.s32 4294967294, %s5358_s12   ;;  %s5358_s12 = sphi %s5431_s12, %s8074_s12   ;;  %s5354_s11 = sphi %s5429_s11, %s8073_s11   ;;  %s5350_s10 = sphi %s5427_s10, %s8072_s10   ;;  %s5346_s30 = sphi %s5425_s30, %s8071_s30  }
   0x5   : > { %s5450_s15 = sadd.s32 1, %s5358_s12   ;;  %s239_s16 = sadd.s32 1, %s5354_s11 }
   0x6   : > { %s236_s17 = ssub.s32 %s5358_s12, %s5450_s15  ;;  %p249_p0 = scmp.ne.s32.totalorder %s5354_s11, %s5350_s10 }
   0x7   : > { %p237_p1 = scmp.eq.s32.totalorder %s236_s17, 0  ;;  %p250_p2 = scmp.eq.s32.totalorder %s5446_s13, 1 }
   0x8   : > { %p255_p3 = scmp.ne.s32.totalorder %s5350_s10, %s5346_s30  ;;  %p256_p4 = scmp.eq.s32.totalorder %s4660_s14, 1 }
   0x9   : > { %s5461_s18 = scalar_select %p237_p1, %s5354_s11, %s239_s16  }
   0xa   : > { %p5463_p5 = por %p250_p2, %p249_p0  ;;  %p5467_p6 = por %p256_p4, %p255_p3 }
   0xb   : > { %p4661_p7 = scmp.ge.s32.totalorder %s5358_s12, 1  ;;  %p263_p8 = scmp.lt.s32.totalorder %s5358_s12, 3 }
   0xc   : > { %p5117_p9 = scmp.eq.s32.totalorder %s5446_s13, 0  ;;  %s288_s24 = sshll.u32 %s7878_s8, 4  ;;  %s289_s24 = int_to_ptr.vmem [resolvable:$true] %s288_s24 }
   0xd   : > { %p5474_p10 = pnand %p4661_p7, %p263_p8  ;;  %s5277_s25 = scalar_lea.vmem %s289_s24, 16 }
   0xe   : > { %p5278_p13 = scmp.ne.s32.totalorder %s289_s24, %s5277_s25  ;;  %p5285_p3 = scmp.lt.s32.totalorder %s289_s24, %s289_s24 }
   0xf   : > { %p5109_p11 = pneg %p5474_p10  ;;  %p5286_p4 = scmp.lt.s32.totalorder %s5277_s25, %s5277_s25 }
  0x11   : > { %p5110_p12 = pnand %p5117_p9, %p5109_p11  ;;  %p5287_p7 = por %p5286_p4, %p5285_p3 }
  0x13   : > { %p5279_p0 = pneg %p5110_p12 }
  0x15   : > { %p5280_p1 = pnand %p5279_p0, %p5278_p13 }
  0x17   : > { %p5281_p2 = pneg %p5280_p1 }
  0x19   : > { %p5288_p8 = pnand %p5287_p7, %p5281_p2 }
  0x1b   : > { %5291 = shalt.err (!%p5288_p8)
}
  0x1c   : > { %s5360_s26 = smov [#allocation2]   ;;  %333 = sbr.rel (%p5474_p10) target bundleno = 1526 (0x5f6), region = 56 }
  0x1d   : > { %5112 = dma.vmem_to_smem (!%p5110_p12), %s289_s24, 16, %s5360_s26, [#allocation4]  }
  0x23   : > { %5337 = dma.done.wait (%p5117_p9), [#allocation4], 16  }
  0x24   : > { %5339 = vsyncadd (%p5117_p9), [#allocation4], 4294967280 }
  0x25   : > { %339 = sfence }
  0x26   : > { %p385_p11 = scmp.lt.s32.totalorder %s5446_s13, 1  ;;  %v7880_v4 = vlaneseq  ;;  %v5166_v15 = vld [vmem:[%s7874_s4 + $0x80] sm:$0xff]   ;;  %v5167_v19 = vld [vmem:[%s7874_s4 + $0x88] sm:$0xff]   ;;  %s5361_s21 = smov 64   ;;  %vm1344_vm0 = vcmask 261120   ;;  %vm1069_vm1 = vcmask 1046528  }
  0x27   : > { %5025 = vmatprep.subr.bf16.mxu1 %v5166_v15  ;;  %v5168_v55 = vld [vmem:[%s7874_s4 + $0x40] sm:$0xff]   ;;  %v5170_v62 = vld [vmem:[%s7874_s4 + $0x48] sm:$0xff]   ;;  %s7921_s24 = smov 96   ;;  %vm844_vm2 = vsmask.f32 7424  ;;  %vm1377_vm3 = vcmask 523264  }
  0x28   : > { %s5493_s27 = scalar_select %p385_p11, %s5446_s13, 1  ;;  %v5503_v5 = vshrl.u32 %v7880_v4, 7  ;;  %5026 = vmatpush3.bf16.msra.mxu1 %v5166_v15  ;;  %v5169_v57 = vld [vmem:[%s7874_s4] sm:$0xff]   ;;  %4765 = vmatprep.subr.bf16.mxu0 %v5168_v55  ;;  %v5171_v63 = vld [vmem:[%s7874_s4 + $0x8] sm:$0xff]   ;;  %vm1410_vm4 = vcmask 785408   ;;  %vm3987_vm5 = vcmask 138312  }
  0x29   : > { %5027 = vmatprep.subr.bf16.mxu1 %v5167_v19  ;;  %4766 = vmatpush3.bf16.msra.mxu0 %v5169_v57  ;;  %v5178_v57 = vld [vmem:[%s7874_s4 + $0x68] sm:$0xff]   ;;  %vm4124_vm6 = vcmask 1041409   ;;  %vm4126_vm7 = vcmask 1042434   ;;  %vm4128_vm8 = vcmask 1043459   ;;  %vm4130_vm9 = vcmask 1044484   ;;  %s7691_s26 = sld [smem:[#allocation2 + $0x1]] }
  0x2a   : > { %s5102_s28 = smul.u32 24, %s5493_s27  ;;  %7926 = vst [vmem:[#allocation8_spill] sm:$0xff] %v5503_v5  ;;  %v5506_v6 = vsub.s32 2, %v5503_v5  ;;  %v5509_v7 = vsub.s32 0, %v5503_v5  ;;  %v5514_v12 = vsub.s32 1, %v5503_v5  ;;  %v5528_v18 = vsub.s32 3, %v5503_v5  ;;  %4767 = vmatprep.subr.bf16.mxu0 %v5170_v62 }
  0x2b   : > { %v5535_v22 = vsub.s32 4, %v5503_v5  ;;  %v5539_v25 = vsub.s32 5, %v5503_v5  ;;  %v5543_v30 = vsub.s32 6, %v5503_v5  ;;  %v5547_v32 = vsub.s32 7, %v5503_v5  ;;  %v5179_v62 = vld [vmem:[%s7874_s4 + $0x28] sm:$0xff]   ;;  %s7702_s29 = sld [smem:[#allocation2 + $0x4]] }
  0x2c   : > { %s5499_s16 = scalar_lea.vmem %s7871_s1, %s5102_s28  ;;  %7927 = vst [vmem:[#allocation9_spill] sm:$0xff] %v5509_v7  ;;  %7928 = vst [vmem:[#allocation10_spill] sm:$0xff] %v5514_v12  ;;  %s5521_s22 = scalar_lea.vmem %s7872_s2, %s5102_s28  ;;  %5028 = vmatpush3.bf16.msra.mxu1 %v5167_v19  ;;  %vm4132_vm10 = vcmask 1045509   ;;  %vm4134_vm11 = vcmask 1046534   ;;  %vm4136_vm12 = vcmask 1047559   ;;  %vm4147_vm13 = vcmask 7168  }
  0x2d   : > { %v460_v0 = vld [vmem:[%s5499_s16] sm:$0xff]  ;;  %v461_v13 = vld [vmem:[%s5499_s16 + $0x8] sm:$0xff]  ;;  %7929 = vst [vmem:[#allocation11_spill] sm:$0xff] %v5539_v25  ;;  %7930 = vst [vmem:[#allocation12_spill] sm:$0xff] %v5543_v30  ;;  %s5101_s28 = smul.u32 432, %s5493_s27  ;;  %4768 = vmatpush3.bf16.msra.mxu0 %v5171_v63  ;;  %vm4150_vm14 = vcmask 138240  }
  0x2e   : > { %v4672_v1 = vmul.f32 -1.442695, %v460_v0  ;;  %v4673_v16 = vmul.f32 -1.442695, %v461_v13  ;;  %v2140_v17 = vld [vmem:[%s5521_s22] sm:$0xff]  ;;  %7931 = vst [vmem:[#allocation13_spill] sm:$0xff] %v5547_v32 }
  0x2f   : > { %v4710_v20 = vmul.f32 -1.442695, %v2140_v17  ;;  %s5582_s17 = scalar_lea.vmem %s7870_s0, %s5101_s28  ;;  %s5363_s28 = smov 32   ;;  %vm4155_vm15 = vcmask 1040384  }
  0x30   : > { %5202 = vpow2.f32 %v4672_v1  ;;  %v5585_v53 = vld [vmem:[%s5582_s17 + $0x30] sm:$0xff]  ;;  %v5591_v56 = vld [vmem:[%s5582_s17 + $0x38] sm:$0xff]  ;;  %v5607_v1 = vld [vmem:[%s5582_s17 + $0x8] sm:$0xff]  ;;  %s7712_s14 = sld [smem:[#allocation2 + $0x2]]  ;;  %s4750_s23 = sld [smem:[#allocation2 + $0x3]] }
  0x31   : > { %v5624_v13 = vld [vmem:[%s5582_s17 + $0x20] sm:$0xff]  ;;  %v439_v4 = vld [vmem:[%s5582_s17 + $0x108] sm:$0xff]  ;;  %s4755_s25 = sld [smem:[#allocation2 + $0x8]] }
  0x3a   : > { %v5203_v2 = vpop.eup %5202 }
  0x3b   : > { %v472_v3 = vadd.f32 1.0, %v5203_v2 }
  0x3d   : > { %5204 = vrcp.f32 %v472_v3  ;;  %v5610_v3 = vld [vmem:[%s5582_s17 + $0x18] sm:$0xff] }
  0x3e   : > { %5206 = vpow2.f32 %v4673_v16 }
  0x3f   : > { %5208 = vpow2.f32 %v4710_v20 }
  0x47   : > { %v5205_v8 = vpop.eup %5204 }
  0x48   : > { %v481_v9 = vadd.f32 1.0, %v5205_v8  ;;  %v5207_v23 = vpop.eup %5206 }
  0x49   : > { %v473_v26 = vadd.f32 1.0, %v5207_v23  ;;  %v5209_v27 = vpop.eup %5208 }
  0x4a   : > { %v517_v10 = vrot.slane %v481_v9, %v5506_v6  ;;  %v487_v11 = vrot.slane %v481_v9, %v5509_v7  ;;  %v502_v14 = vrot.slane %v481_v9, %v5514_v12  ;;  %v532_v21 = vrot.slane %v481_v9, %v5528_v18 }
  0x4b   : > { %v547_v24 = vrot.slane %v481_v9, %v5535_v22  ;;  %v562_v28 = vrot.slane %v481_v9, %v5539_v25  ;;  %5210 = vrcp.f32 %v473_v26  ;;  %v2152_v29 = vadd.f32 1.0, %v5209_v27  ;;  %v5638_v26 = vld [vmem:[%s5582_s17 + $0x40] sm:$0x3]  ;;  %v5175_v27 = vld [vmem:[%s7874_s4 + $0x18] sm:$0xff]  }
  0x4c   : > { %519 = vbcast.lane.b32.xlu1 %v517_v10, 256  ;;  %489 = vbcast.lane.b32.xlu0 %v487_v11, 256  ;;  %v577_v31 = vrot.slane %v481_v9, %v5543_v30  ;;  %v592_v33 = vrot.slane %v481_v9, %v5547_v32  ;;  %v5613_v9 = vld [vmem:[%s5582_s17] sm:$0xff] }
  0x4d   : > { %5212 = vrcp.f32 %v2152_v29 }
  0x50   : > { %523 = vbcast.lane.b32.xlu1 %v517_v10, 264  ;;  %493 = vbcast.lane.b32.xlu0 %v487_v11, 264 }
  0x54   : > { %504 = vbcast.lane.b32.xlu1 %v502_v14, 256  ;;  %497 = vbcast.lane.b32.xlu0 %v487_v11, 272  ;;  %v5621_v11 = vld [vmem:[%s5582_s17 + $0x10] sm:$0x3] }
  0x55   : > { %v5211_v34 = vpop.eup %5210 }
  0x56   : > { %v5550_v35 = vadd.f32 1.0, %v5211_v34 }
  0x57   : > { %v5213_v36 = vpop.eup %5212 }
  0x58   : > { %512 = vbcast.lane.b32.xlu1 %v502_v14, 272  ;;  %508 = vbcast.lane.b32.xlu0 %v502_v14, 264  ;;  %v607_v37 = vrot.slane %v5550_v35, %v5509_v7  ;;  %v2161_v38 = vadd.f32 1.0, %v5213_v36  ;;  %v622_v42 = vrot.slane %v5550_v35, %v5514_v12  ;;  %v637_v44 = vrot.slane %v5550_v35, %v5506_v6  ;;  %v5173_v14 = vld [vmem:[%s7874_s4 + $0x10] sm:$0xff]  }
  0x59   : > { %v652_v46 = vrot.slane %v5550_v35, %v5528_v18  ;;  %v667_v48 = vrot.slane %v5550_v35, %v5535_v22  ;;  %v5571_v50 = vrot.slane %v5550_v35, %v5539_v25 }
  0x5a   : > { %v2167_v39 = vrot.slane %v2161_v38, %v5509_v7  ;;  %v2197_v40 = vrot.slane %v2161_v38, %v5506_v6  ;;  %v2182_v41 = vrot.slane %v2161_v38, %v5514_v12  ;;  %v2212_v43 = vrot.slane %v2161_v38, %v5528_v18 }
  0x5b   : > { %v2227_v45 = vrot.slane %v2161_v38, %v5535_v22  ;;  %v2242_v47 = vrot.slane %v2161_v38, %v5539_v25  ;;  %v2257_v49 = vrot.slane %v2161_v38, %v5543_v30  ;;  %v5575_v51 = vrot.slane %v2161_v38, %v5547_v32  ;;  %v5176_v38 = vld [vmem:[%s7874_s4 + $0x60] sm:$0xff]  }
  0x5c   : > { %534 = vbcast.lane.b32.xlu1 %v532_v21, 256  ;;  %527 = vbcast.lane.b32.xlu0 %v517_v10, 272  ;;  %v5172_v10 = vld [vmem:[%s7874_s4 + $0x50] sm:$0xff]  }
  0x5d   : > { %4769 = vmatprep.subr.bf16.mxu0 %v5172_v10 }
  0x5e   : > { %4770 = vmatpush3.bf16.msra.mxu0 %v5173_v14 }
  0x60   : > { %542 = vbcast.lane.b32.xlu1 %v532_v21, 272  ;;  %538 = vbcast.lane.b32.xlu0 %v532_v21, 264 }
  0x64   : > { %549 = vbcast.lane.b32.xlu0 %v547_v24, 256  ;;  %553 = vbcast.lane.b32.xlu1 %v547_v24, 264 }
  0x68   : > { %557 = vbcast.lane.b32.xlu0 %v547_v24, 272  ;;  %564 = vbcast.lane.b32.xlu1 %v562_v28, 256  ;;  %v5174_v24 = vld [vmem:[%s7874_s4 + $0x58] sm:$0xff]  }
  0x69   : > { %4771 = vmatprep.subr.bf16.mxu0 %v5174_v24  ;;  %v5180_v24 = vld [vmem:[%s7874_s4 + $0x70] sm:$0xff]  }
  0x6a   : > { %4772 = vmatpush3.bf16.msra.mxu0 %v5175_v27 }
  0x6b   : > { %4773 = vmatprep.subr.bf16.mxu0 %v5176_v38  ;;  %v5181_v38 = vld [vmem:[%s7874_s4 + $0x30] sm:$0xff]  }
  0x6c   : > { %568 = vbcast.lane.b32.xlu0 %v562_v28, 264  ;;  %572 = vbcast.lane.b32.xlu1 %v562_v28, 272 }
  0x70   : > { %579 = vbcast.lane.b32.xlu0 %v577_v31, 256  ;;  %583 = vbcast.lane.b32.xlu1 %v577_v31, 264 }
  0x74   : > { %587 = vbcast.lane.b32.xlu0 %v577_v31, 272  ;;  %594 = vbcast.lane.b32.xlu1 %v592_v33, 256 }
  0x78   : > { %598 = vbcast.lane.b32.xlu0 %v592_v33, 264  ;;  %602 = vbcast.lane.b32.xlu1 %v592_v33, 272  ;;  %v5648_v33 = vld [vmem:[%s5582_s17 + $0x48] sm:$0xff] }
  0x7c   : > { %609 = vbcast.lane.b32.xlu0 %v607_v37, 256  ;;  %613 = vbcast.lane.b32.xlu1 %v607_v37, 264 }
  0x80   : > { %2169 = vbcast.lane.b32.xlu0 %v2167_v39, 256  ;;  %2173 = vbcast.lane.b32.xlu1 %v2167_v39, 264 }
  0x84   : > { %617 = vbcast.lane.b32.xlu0 %v607_v37, 272  ;;  %2199 = vbcast.lane.b32.xlu1 %v2197_v40, 256 }
  0x88   : > { %2203 = vbcast.lane.b32.xlu0 %v2197_v40, 264  ;;  %2177 = vbcast.lane.b32.xlu1 %v2167_v39, 272  ;;  %v5660_v39 = vld [vmem:[%s5582_s17 + $0x58] sm:$0x3] }
  0x8c   : > { %2184 = vbcast.lane.b32.xlu0 %v2182_v41, 256  ;;  %2188 = vbcast.lane.b32.xlu1 %v2182_v41, 264 }
  0x90   : > { %2192 = vbcast.lane.b32.xlu0 %v2182_v41, 272  ;;  %2207 = vbcast.lane.b32.xlu1 %v2197_v40, 272  ;;  %v5663_v40 = vld [vmem:[%s5582_s17 + $0x50] sm:$0xff]  ;;  %v5177_v41 = vld [vmem:[%s7874_s4 + $0x20] sm:$0xff]  }
  0x91   : > { %4774 = vmatpush3.bf16.msra.mxu0 %v5177_v41 }
  0x92   : > { %4775 = vmatprep.subr.bf16.mxu0 %v5178_v57 }
  0x94   : > { %624 = vbcast.lane.b32.xlu0 %v622_v42, 256  ;;  %628 = vbcast.lane.b32.xlu1 %v622_v42, 264 }
  0x95   : > { %4776 = vmatpush3.bf16.msra.mxu0 %v5179_v62  ;;  %v423_v62 = vld [vmem:[%s5582_s17 + $0x88] sm:$0x3] }
  0x96   : > { %4777 = vmatprep.subr.bf16.mxu0 %v5180_v24 }
  0x98   : > { %632 = vbcast.lane.b32.xlu0 %v622_v42, 272  ;;  %2214 = vbcast.lane.b32.xlu1 %v2212_v43, 256  ;;  %v5669_v42 = vld [vmem:[%s5582_s17 + $0x28] sm:$0x3] }
  0x99   : > { %4778 = vmatpush3.bf16.msra.mxu0 %v5181_v38 }
  0x9c   : > { %2218 = vbcast.lane.b32.xlu0 %v2212_v43, 264  ;;  %2222 = vbcast.lane.b32.xlu1 %v2212_v43, 272 }
  0xa0   : > { %639 = vbcast.lane.b32.xlu0 %v637_v44, 256  ;;  %643 = vbcast.lane.b32.xlu1 %v637_v44, 264 }
  0xa4   : > { %647 = vbcast.lane.b32.xlu0 %v637_v44, 272  ;;  %2229 = vbcast.lane.b32.xlu1 %v2227_v45, 256 }
  0xa8   : > { %2233 = vbcast.lane.b32.xlu0 %v2227_v45, 264  ;;  %658 = vbcast.lane.b32.xlu1 %v652_v46, 264 }
  0xac   : > { %2237 = vbcast.lane.b32.xlu0 %v2227_v45, 272  ;;  %2244 = vbcast.lane.b32.xlu1 %v2242_v47, 256 }
  0xb0   : > { %654 = vbcast.lane.b32.xlu0 %v652_v46, 256  ;;  %673 = vbcast.lane.b32.xlu1 %v667_v48, 264 }
  0xb4   : > { %662 = vbcast.lane.b32.xlu0 %v652_v46, 272  ;;  %2259 = vbcast.lane.b32.xlu1 %v2257_v49, 256 }
  0xb8   : > { %2248 = vbcast.lane.b32.xlu0 %v2242_v47, 264  ;;  %688 = vbcast.lane.b32.xlu1 %v5571_v50, 264 }
  0xbc   : > { %2252 = vbcast.lane.b32.xlu0 %v2242_v47, 272  ;;  %2274 = vbcast.lane.b32.xlu1 %v5575_v51, 256 }
  0xbe   : > { %v520_v52 = vpop.permute.xlu1 %519  ;;  %v490_v54 = vpop.permute.xlu0 %489 }
  0xbf   : > { %v760_v58 = vmul.f32 %v520_v52, %v5585_v53  ;;  %v754_v20 = vmul.f32 %v490_v54, %v5613_v9 }
  0xc0   : > { %669 = vbcast.lane.b32.xlu0 %v667_v48, 256 }
  0xc2   : > { %v524_v59 = vpop.permute.xlu1 %523  ;;  %v494_v60 = vpop.permute.xlu0 %493 }
  0xc3   : > { %v761_v61 = vmul.f32 %v524_v59, %v5591_v56  ;;  %v755_v15 = vmul.f32 %v494_v60, %v5607_v1  ;;  %v418_v59 = vld [vmem:[%s5582_s17 + $0x60] sm:$0xff]  ;;  %v419_v60 = vld [vmem:[%s5582_s17 + $0x68] sm:$0xff] }
  0xc4   : > { %677 = vbcast.lane.b32.xlu0 %v667_v48, 272 }
  0xc5   : > { %v5604_v0 = vpack.c.bf16 %v761_v61, %v760_v58  ;;  %v5643_v28 = vpack.c.bf16 %v755_v15, %v754_v20 }
  0xc6   : > { %v505_v2 = vpop.permute.xlu1 %504  ;;  %v498_v8 = vpop.permute.xlu0 %497 }
  0xc7   : > { %1280 = vrot.lane.b32.xlu1 %v5604_v0, %s5361_s21  ;;  %v757_v16 = vmul.f32 %v505_v2, %v5610_v3  ;;  %v756_v21 = vmul.f32 %v498_v8, %v5621_v11  ;;  %v848_v45 = vshll.u32 %v5643_v28, 16  ;;  %v1076_v48 = vrot.slane %v5604_v0, 1 }
  0xc8   : > { %2263 = vbcast.lane.b32.xlu0 %v2257_v49, 264  ;;  %v872_v61 = vshll.u32 %v5604_v0, 16 }
  0xc9   : > { %v5650_v36 = vpack.c.bf16 %v756_v21, %v756_v21  ;;  %v850_v10 = vrot.slane %v848_v45, 1 }
  0xca   : > { %v513_v17 = vpop.permute.xlu1 %512  ;;  %v509_v19 = vpop.permute.xlu0 %508 }
  0xcb   : > { %v758_v23 = vmul.f32 %v509_v19, %v5624_v13  ;;  %v759_v58 = vmul.f32 %v513_v17, %v5669_v42 }
  0xcc   : > { %2267 = vbcast.lane.b32.xlu0 %v2257_v49, 272  ;;  %v853_v49 = vshll.u32 %v5650_v36, 16 }
  0xcd   : > { %v5645_v29 = vpack.c.bf16 %v758_v23, %v757_v16  ;;  %v846_v16 = vshrl.u32 %v5643_v28, 16  ;;  %v5705_v27 = vpack.c.bf16 %v759_v58, %v759_v58 }
  0xce   : > { %v535_v31 = vpop.permute.xlu1 %534  ;;  %v528_v34 = vpop.permute.xlu0 %527  ;;  %v855_v19 = vrot.slane %v853_v49, 1  ;;  %v421_v49 = vld [vmem:[%s5582_s17 + $0x78] sm:$0xff] }
  0xcf   : > { %v762_v37 = vmul.f32 %v528_v34, %v5638_v26  ;;  %1216 = vrot.lane.b32.xlu1 %v5645_v29, %s7921_s24  ;;  %v763_v43 = vmul.f32 %v535_v31, %v5648_v33  ;;  %v860_v17 = vshll.u32 %v5645_v29, 16  ;;  %v420_v31 = vld [vmem:[%s5582_s17 + $0x70] sm:$0x3]  ;;  %v851_v41 = vor.u32 %v850_v10, %v846_v16 }
  0xd0   : > { %684 = vbcast.lane.b32.xlu0 %v5571_v50, 256  ;;  %v858_v10 = vshrl.u32 %v5645_v29, 16 }
  0xd1   : > { %v813_v44 = vpack.c.bf16 %v762_v37, %v762_v37  ;;  %v874_v37 = vrot.slane %v872_v61, 1  ;;  %v856_v57 = vsel %vm844_vm2, %v851_v41, %v855_v19 }
  0xd2   : > { %v543_v46 = vpop.permute.xlu1 %542  ;;  %v539_v47 = vpop.permute.xlu0 %538 }
  0xd3   : > { %v1077_v52 = vrot.slane %v813_v44, 1  ;;  %v765_v54 = vmul.f32 %v543_v46, %v5660_v39  ;;  %v764_v55 = vmul.f32 %v539_v47, %v5663_v40  ;;  %v877_v14 = vshll.u32 %v813_v44, 16 }
  0xd4   : > { %692 = vbcast.lane.b32.xlu0 %v5571_v50, 272  ;;  %v865_v44 = vshll.u32 %v5705_v27, 16 }
  0xd5   : > { %v5688_v63 = vpack.c.bf16 %v765_v54, %v765_v54  ;;  %v5690_v2 = vpack.c.bf16 %v764_v55, %v763_v43  ;;  %v5693_v8 = vsel %vm1069_vm1, %v1076_v48, %v1077_v52  ;;  %v870_v43 = vshrl.u32 %v5604_v0, 16 }
  0xd6   : > { %v550_v50 = vpop.permute.xlu0 %549  ;;  %5029 = vmatprep.mubr.msk.bf16.mxu1 %vm1344_vm0, %v5693_v8  ;;  %v554_v15 = vpop.permute.xlu1 %553  ;;  %v879_v45 = vrot.slane %v877_v14, 1  ;;  %v862_v52 = vrot.slane %v860_v17, 1  ;;  %v5183_v14 = vld [vmem:[%s7874_s4 + $0x38] sm:$0xff]   ;;  %v2141_v17 = vld [vmem:[%s5521_s22 + $0x8] sm:$0xff]  ;;  %v867_v19 = vrot.slane %v865_v44, 1 }
  0xd7   : > { %v1080_v20 = vrot.slane %v5688_v63, 1  ;;  %v766_v21 = vmul.f32 %v550_v50, %v418_v59  ;;  %1282 = vrot.lane.b32.xlu1 %v5690_v2, %s5361_s21  ;;  %v767_v23 = vmul.f32 %v554_v15, %v419_v60  ;;  %v1079_v34 = vrot.slane %v5690_v2, 1  ;;  %v5182_v59 = vld [vmem:[%s7874_s4 + $0x78] sm:$0xff]   ;;  %v422_v60 = vld [vmem:[%s5582_s17 + $0x80] sm:$0xff] }
  0xd8   : > { %2278 = vbcast.lane.b32.xlu0 %v5575_v51, 264  ;;  %v884_v58 = vshll.u32 %v5690_v2, 16  ;;  %v875_v61 = vor.u32 %v874_v37, %v870_v43  ;;  %4779 = vmatprep.subr.bf16.mxu0 %v5182_v59  ;;  %v1074_v43 = vrot.slane %v5705_v27, 1  ;;  %v425_v44 = vld [vmem:[%s5582_s17 + $0x98] sm:$0xff]  ;;  %v1073_v59 = vrot.slane %v5645_v29, 1 }
  0xd9   : > { %v5716_v47 = vsel %vm1069_vm1, %v1079_v34, %v1080_v20  ;;  %v5719_v54 = vpack.c.bf16 %v767_v23, %v766_v21  ;;  %v889_v20 = vshll.u32 %v5688_v63, 16  ;;  %4780 = vmatpush3.bf16.msra.mxu0 %v5183_v14  ;;  %v424_v63 = vld [vmem:[%s5582_s17 + $0x90] sm:$0xff] }
  0xda   : > { %v558_v46 = vpop.permute.xlu0 %557  ;;  %v565_v48 = vpop.permute.xlu1 %564  ;;  %5030 = vmatmul.mubr.msk.bf16.vlgmr.msra.gmra.mrb[0].mxu1 %vm1344_vm0, %v5716_v47  ;;  %v5743_v23 = vsel %vm844_vm2, %v875_v61, %v879_v45  ;;  %v886_v41 = vrot.slane %v884_v58, 1  ;;  %v4711_v45 = vmul.f32 -1.442695, %v2141_v17  ;;  %v1071_v17 = vrot.slane %v5650_v36, 1 }
  0xdb   : > { %7932 = vst [vmem:[#allocation14_spill] sm:$0xff] %v5719_v54  ;;  %v768_v55 = vmul.f32 %v558_v46, %v420_v31  ;;  %1218 = vrot.lane.b32.xlu1 %v5604_v0, %s7921_s24  ;;  %v769_v15 = vmul.f32 %v565_v48, %v421_v49  ;;  %v1082_v16 = vrot.slane %v5719_v54, 1  ;;  %v863_v31 = vor.u32 %v862_v52, %v858_v10 }
  0xdc   : > { %1152 = vrot.lane.b32.xlu0 %v856_v57, %s5363_s28  ;;  %v882_v52 = vshrl.u32 %v5690_v2, 16  ;;  %5214 = vpow2.f32 %v4711_v45  ;;  %v429_v45 = vld [vmem:[%s5582_s17 + $0xb8] sm:$0x3] }
  0xdd   : > { %v5737_v50 = vpack.c.bf16 %v768_v55, %v768_v55  ;;  %v891_v55 = vrot.slane %v889_v20, 1  ;;  %v5764_v27 = vsel %vm844_vm2, %v863_v31, %v867_v19  ;;  %v1075_v20 = vsel %vm1069_vm1, %v1073_v59, %v1074_v43  ;;  %v428_v43 = vld [vmem:[%s5582_s17 + $0xb0] sm:$0xff] }
  0xde   : > { %v569_v21 = vpop.permute.xlu0 %568  ;;  %v573_v24 = vpop.permute.xlu1 %572  ;;  %v887_v14 = vor.u32 %v886_v41, %v882_v52 }
  0xdf   : > { %v1083_v34 = vrot.slane %v5737_v50, 1  ;;  %v770_v37 = vmul.f32 %v569_v21, %v422_v60  ;;  %1284 = vrot.lane.b32.xlu1 %v5719_v54, %s5361_s21  ;;  %v771_v38 = vmul.f32 %v573_v24, %v423_v62  ;;  %v896_v60 = vshll.u32 %v5719_v54, 16  ;;  %v427_v24 = vld [vmem:[%s5582_s17 + $0xa8] sm:$0xff] }
  0xe0   : > { %1312 = vrot.lane.b32.xlu0 %v5743_v23, %s7921_s24  ;;  %v5787_v36 = vsel %vm844_vm2, %v887_v14, %v891_v55 }
  0xe1   : > { %v5753_v46 = vpack.c.bf16 %v770_v37, %v769_v15  ;;  %v5755_v48 = vpack.c.bf16 %v771_v38, %v771_v38  ;;  %v5758_v49 = vsel %vm1069_vm1, %v1082_v16, %v1083_v34  ;;  %v426_v15 = vld [vmem:[%s5582_s17 + $0xa0] sm:$0x3]  ;;  %v894_v34 = vshrl.u32 %v5719_v54, 16 }
  0xe2   : > { %v580_v57 = vpop.permute.xlu0 %579  ;;  %5033 = vmatprep.mubr.msk.bf16.mxu1 %vm1344_vm0, %v5758_v49  ;;  %v584_v58 = vpop.permute.xlu1 %583  ;;  %v898_v37 = vrot.slane %v896_v60, 1  ;;  %v901_v38 = vshll.u32 %v5737_v50, 16 }
  0xe3   : > { %7933 = vst [vmem:[#allocation15_spill] sm:$0xff] %v5753_v46  ;;  %v1086_v61 = vrot.slane %v5755_v48, 1  ;;  %v772_v62 = vmul.f32 %v580_v57, %v424_v63  ;;  %1220 = vrot.lane.b32.xlu1 %v5690_v2, %s7921_s24  ;;  %v773_v10 = vmul.f32 %v584_v58, %v425_v44  ;;  %v1085_v16 = vrot.slane %v5753_v46, 1 }
  0xe4   : > { %1154 = vrot.lane.b32.xlu0 %v5764_v27, %s5363_s28  ;;  %v1070_v44 = vrot.slane %v5643_v28, 1  ;;  %v899_v60 = vor.u32 %v898_v37, %v894_v34  ;;  %v430_v37 = vld [vmem:[%s5582_s17 + $0xc0] sm:$0xff] }
  0xe5   : > { %v5779_v31 = vsel %vm1069_vm1, %v1085_v16, %v1086_v61  ;;  %v5783_v41 = vpack.c.bf16 %v773_v10, %v772_v62  ;;  %v903_v61 = vrot.slane %v901_v38, 1 }
  0xe6   : > { %v588_v19 = vpop.permute.xlu0 %587  ;;  %v595_v21 = vpop.permute.xlu1 %594  ;;  %5034 = vmatmul.mubr.msk.bf16.gmra.mrb[4].mxu1 %vm1344_vm0, %v5779_v31  ;;  %v1072_v59 = vsel %vm1069_vm1, %v1070_v44, %v1071_v17 }
  0xe7   : > { %v774_v63 = vmul.f32 %v588_v19, %v426_v15  ;;  %1248 = vrot.lane.b32.xlu1 %v1075_v20, %s5363_s28  ;;  %v775_v50 = vmul.f32 %v595_v21, %v427_v24  ;;  %v1088_v57 = vrot.slane %v5783_v41, 1  ;;  %v5215_v19 = vpop.eup %5214  ;;  %v5818_v38 = vsel %vm844_vm2, %v899_v60, %v903_v61 }
  0xe8   : > { %1314 = vrot.lane.b32.xlu0 %v5787_v36, %s7921_s24  ;;  %v906_v60 = vshrl.u32 %v5753_v46, 16 }
  0xe9   : > { %v5796_v52 = vpack.c.bf16 %v774_v63, %v774_v63  ;;  %v908_v63 = vshll.u32 %v5753_v46, 16 }
  0xea   : > { %v599_v58 = vpop.permute.xlu0 %598  ;;  %v603_v55 = vpop.permute.xlu1 %602 }
  0xeb   : > { %v1089_v62 = vrot.slane %v5796_v52, 1  ;;  %v776_v10 = vmul.f32 %v599_v58, %v428_v43  ;;  %1184 = vrot.lane.b32.xlu1 %v1072_v59, %s5361_s21  ;;  %v777_v14 = vmul.f32 %v603_v55, %v429_v45  ;;  %v431_v43 = vld [vmem:[%s5582_s17 + $0xc8] sm:$0xff]  ;;  %v2153_v45 = vadd.f32 1.0, %v5215_v19  ;;  %v432_v19 = vld [vmem:[%s5582_s17 + $0xd0] sm:$0x3] }
  0xec   : > { %1156 = vrot.lane.b32.xlu0 %v5743_v23, %s5363_s28 }
  0xed   : > { %v5804_v15 = vpack.c.bf16 %v776_v10, %v775_v50  ;;  %v5806_v16 = vpack.c.bf16 %v777_v14, %v777_v14  ;;  %v5809_v17 = vsel %vm1069_vm1, %v1088_v57, %v1089_v62  ;;  %v913_v50 = vshll.u32 %v5755_v48, 16  ;;  %v462_v48 = vld [vmem:[%s5499_s16 + $0x10] sm:$0x3]  ;;  %s4752_s16 = sld [smem:[#allocation2 + $0x5]] }
  0xee   : > { %v610_v21 = vpop.permute.xlu0 %609  ;;  %v614_v24 = vpop.permute.xlu1 %613  ;;  %5037 = vmatprep.mubr.msk.bf16.mxu1 %vm1344_vm0, %v5809_v17  ;;  %v910_v14 = vrot.slane %v908_v63, 1  ;;  %5216 = vrcp.f32 %v2153_v45 }
  0xef   : > { %7934 = vst [vmem:[#allocation16_spill] sm:$0xff] %v5804_v15  ;;  %v1092_v34 = vrot.slane %v5806_v16, 1  ;;  %1250 = vrot.lane.b32.xlu1 %v5693_v8, %s5363_s28  ;;  %v1091_v44 = vrot.slane %v5804_v15, 1  ;;  %v778_v57 = vmul.f32 %v610_v21, %v430_v37  ;;  %v779_v61 = vmul.f32 %v614_v24, %v431_v43 }
  0xf0   : > { %1316 = vrot.lane.b32.xlu0 %v5818_v38, %s7921_s24  ;;  %v4674_v24 = vmul.f32 -1.442695, %v462_v48 }
  0xf1   : > { %v5827_v55 = vsel %vm1069_vm1, %v1091_v44, %v1092_v34  ;;  %v5841_v43 = vpack.c.bf16 %v779_v61, %v778_v57 }
  0xf2   : > { %v2170_v58 = vpop.permute.xlu0 %2169  ;;  %v2174_v59 = vpop.permute.xlu1 %2173  ;;  %5038 = vmatmul.mubr.msk.bf16.gmra.mrb[8].mxu1 %vm1344_vm0, %v5827_v55  ;;  %5218 = vpow2.f32 %v4674_v24 }
  0xf3   : > { %v2434_v62 = vmul.f32 %v2170_v58, %v5613_v9  ;;  %1186 = vrot.lane.b32.xlu1 %v1075_v20, %s5361_s21  ;;  %v2435_v10 = vmul.f32 %v2174_v59, %v5607_v1  ;;  %v915_v9 = vrot.slane %v913_v50, 1  ;;  %v911_v1 = vor.u32 %v910_v14, %v906_v60 }
  0xf4   : > { %1158 = vrot.lane.b32.xlu0 %v5787_v36, %s5363_s28  ;;  %v1094_v58 = vrot.slane %v5841_v43, 1 }
  0xf5   : > { %v5839_v21 = vpack.c.bf16 %v2435_v10, %v2434_v62  ;;  %v5857_v57 = vsel %vm844_vm2, %v911_v1, %v915_v9  ;;  %v434_v9 = vld [vmem:[%s5582_s17 + $0xe0] sm:$0xff] }
  0xf6   : > { %v618_v34 = vpop.permute.xlu0 %617  ;;  %v2200_v37 = vpop.permute.xlu1 %2199 }
  0xf7   : > { %7935 = vst [vmem:[#allocation17_spill] sm:$0xff] %v5839_v21  ;;  %v780_v20 = vmul.f32 %v618_v34, %v432_v19  ;;  %1252 = vrot.lane.b32.xlu1 %v5716_v47, %s5363_s28  ;;  %v2440_v44 = vmul.f32 %v2200_v37, %v5585_v53 }
  0xf8   : > { %2282 = vbcast.lane.b32.xlu0 %v5575_v51, 272  ;;  %v697_v51 = vrot.slane %v5550_v35, %v5543_v30  ;;  %v5217_v14 = vpop.eup %5216 }
  0xf9   : > { %v5846_v63 = vpack.c.bf16 %v780_v20, %v780_v20  ;;  %v5884_v24 = vadd.f32 1.0, %v5217_v14 }
  0xfa   : > { %v2204_v59 = vpop.permute.xlu0 %2203  ;;  %v5850_v62 = vpop.permute.xlu1 %2177 }
  0xfb   : > { %v1095_v45 = vrot.slane %v5846_v63, 1  ;;  %v2441_v50 = vmul.f32 %v2204_v59, %v5591_v56  ;;  %1188 = vrot.lane.b32.xlu1 %v5693_v8, %s5361_s21  ;;  %v435_v59 = vld [vmem:[%s5582_s17 + $0xe8] sm:$0x3] }
  0xfc   : > { %1318 = vrot.lane.b32.xlu0 %v5857_v57, %s7921_s24  ;;  %v5219_v37 = vpop.eup %5218 }
  0xfd   : > { %v5863_v53 = vpack.c.bf16 %v2441_v50, %v2440_v44  ;;  %v5866_v60 = vsel %vm1069_vm1, %v1094_v58, %v1095_v45  ;;  %v474_v44 = vadd.f32 1.0, %v5219_v37  ;;  %v5893_v45 = vrot.slane %v5884_v24, %v5509_v7 }
  0xfe   : > { %v2185_v61 = vpop.permute.xlu0 %2184  ;;  %v2189_v56 = vpop.permute.xlu1 %2188  ;;  %5041 = vmatprep.mubr.msk.bf16.mxu1 %vm1344_vm0, %v5866_v60 }
  0xff   : > { %v2437_v8 = vmul.f32 %v2185_v61, %v5610_v3  ;;  %1254 = vrot.lane.b32.xlu1 %v5758_v49, %s5363_s28  ;;  %v2438_v10 = vmul.f32 %v2189_v56, %v5624_v13  ;;  %v712_v3 = vrot.slane %v5550_v35, %v5547_v32  ;;  %v433_v13 = vld [vmem:[%s5582_s17 + $0xd8] sm:$0xff]  ;;  %5220 = vrcp.f32 %v474_v44 }
 0x100   : > { %699 = vbcast.lane.b32.xlu0 %v697_v51, 256  ;;  %v437_v44 = vld [vmem:[%s5582_s17 + $0xf8] sm:$0xff] }
 0x101   : > { %v5874_v48 = vpack.c.bf16 %v2438_v10, %v2437_v8 }
 0x102   : > { %v5876_v19 = vpop.permute.xlu0 %2192  ;;  %v5878_v34 = vpop.permute.xlu1 %2207 }
 0x103   : > { %1286 = vrot.lane.b32.xlu1 %v5753_v46, %s5361_s21 }
 0x104   : > { %707 = vbcast.lane.b32.xlu0 %v697_v51, 272 }
 0x106   : > { %v625_v20 = vpop.permute.xlu0 %624  ;;  %v629_v1 = vpop.permute.xlu1 %628 }
 0x107   : > { %1190 = vrot.lane.b32.xlu1 %v5716_v47, %s5361_s21  ;;  %v781_v58 = vmul.f32 %v625_v20, %v433_v13  ;;  %v782_v50 = vmul.f32 %v629_v1, %v434_v9  ;;  %v436_v1 = vld [vmem:[%s5582_s17 + $0xf0] sm:$0xff] }
 0x108   : > { %718 = vbcast.lane.b32.xlu0 %v712_v3, 264 }
 0x109   : > { %v5895_v35 = vpack.c.bf16 %v782_v50, %v781_v58 }
 0x10a   : > { %v633_v61 = vpop.permute.xlu0 %632  ;;  %v2215_v56 = vpop.permute.xlu1 %2214 }
 0x10b   : > { %v783_v8 = vmul.f32 %v633_v61, %v435_v59  ;;  %1222 = vrot.lane.b32.xlu1 %v5719_v54, %s7921_s24  ;;  %v2443_v10 = vmul.f32 %v2215_v56, %v5648_v33  ;;  %v1097_v14 = vrot.slane %v5895_v35, 1 }
 0x10c   : > { %2289 = vbcast.lane.b32.xlu0 %v5893_v45, 256 }
 0x10d   : > { %v5900_v47 = vpack.c.bf16 %v783_v8, %v783_v8 }
 0x10e   : > { %v2219_v37 = vpop.permute.xlu0 %2218  ;;  %v5904_v13 = vpop.permute.xlu1 %2222 }
 0x10f   : > { %v1098_v9 = vrot.slane %v5900_v47, 1  ;;  %v2444_v20 = vmul.f32 %v2219_v37, %v5663_v40  ;;  %703 = vbcast.lane.b32.xlu1 %v697_v51, 264  ;;  %v438_v40 = vld [vmem:[%s5582_s17 + $0x100] sm:$0x3]  ;;  %v5221_v51 = vpop.eup %5220 }
 0x110   : > { %1256 = vrot.lane.b32.xlu0 %v5779_v31, %s5363_s28 }
 0x111   : > { %v5912_v58 = vpack.c.bf16 %v2444_v20, %v2443_v10  ;;  %v5915_v33 = vsel %vm1069_vm1, %v1097_v14, %v1098_v9  ;;  %v483_v9 = vadd.f32 1.0, %v5221_v51  ;;  %v440_v51 = vld [vmem:[%s5582_s17 + $0x110] sm:$0xff] }
 0x112   : > { %v640_v59 = vpop.permute.xlu0 %639  ;;  %v644_v50 = vpop.permute.xlu1 %643  ;;  %5042 = vmatmul.mubr.msk.bf16.gmra.mrb[12].mxu1 %vm1344_vm0, %v5915_v33 }
 0x113   : > { %7936 = vst [vmem:[#allocation18_spill] sm:$0xff] %v5912_v58  ;;  %v784_v61 = vmul.f32 %v640_v59, %v436_v1  ;;  %714 = vbcast.lane.b32.xlu1 %v712_v3, 256  ;;  %v785_v56 = vmul.f32 %v644_v50, %v437_v44  ;;  %v920_v59 = vshll.u32 %v5783_v41, 16  ;;  %v727_v50 = vrot.slane %v483_v9, %v5509_v7 }
 0x114   : > { %1288 = vrot.lane.b32.xlu0 %v5783_v41, %s5361_s21 }
 0x115   : > { %v5922_v10 = vpack.c.bf16 %v785_v56, %v784_v61  ;;  %v925_v56 = vshll.u32 %v5796_v52, 16 }
 0x116   : > { %v648_v8 = vpop.permute.xlu0 %647  ;;  %v5924_v14 = vpop.permute.xlu1 %2229 }
 0x117   : > { %v786_v37 = vmul.f32 %v648_v8, %v438_v40  ;;  %722 = vbcast.lane.b32.xlu1 %v712_v3, 272  ;;  %7937 = vst [vmem:[#allocation19_spill] sm:$0xff] %v5922_v10  ;;  %v1100_v1 = vrot.slane %v5922_v10, 1  ;;  %v918_v8 = vshrl.u32 %v5783_v41, 16  ;;  %v927_v5 = vrot.slane %v925_v56, 1 }
 0x118   : > { %1192 = vrot.lane.b32.xlu0 %v5758_v49, %s5361_s21 }
 0x119   : > { %v5928_v20 = vpack.c.bf16 %v786_v37, %v786_v37  ;;  %v922_v37 = vrot.slane %v920_v59, 1  ;;  %v441_v59 = vld [vmem:[%s5582_s17 + $0x118] sm:$0x3] }
 0x11a   : > { %v5931_v44 = vpop.permute.xlu0 %2233  ;;  %v659_v49 = vpop.permute.xlu1 %658 }
 0x11b   : > { %v1101_v3 = vrot.slane %v5928_v20, 1  ;;  %2293 = vbcast.lane.b32.xlu1 %v5893_v45, 264  ;;  %v923_v7 = vor.u32 %v922_v37, %v918_v8  ;;  %v930_v8 = vshrl.u32 %v5804_v15, 16 }
 0x11c   : > { %1224 = vrot.lane.b32.xlu0 %v5753_v46, %s7921_s24 }
 0x11d   : > { %v5940_v61 = vsel %vm1069_vm1, %v1100_v1, %v1101_v3  ;;  %v742_v1 = vrot.slane %v483_v9, %v5514_v12  ;;  %v788_v3 = vmul.f32 %v659_v49, %v440_v51  ;;  %v5960_v54 = vsel %vm844_vm2, %v923_v7, %v927_v5 }
 0x11e   : > { %7938 = vst [vmem:[#allocation20_spill] sm:$0xff] %v5940_v61  ;;  %v5943_v40 = vpop.permute.xlu0 %2237  ;;  %5045 = vmatprep.mubr.msk.bf16.mxu1 %vm1344_vm0, %v5940_v61  ;;  %v5954_v46 = vpop.permute.xlu1 %2244  ;;  %v932_v7 = vshll.u32 %v5804_v15, 16 }
 0x11f   : > { %1160 = vrot.lane.b32.xlu1 %v5818_v38, %s5363_s28 }
 0x120   : > { %733 = vbcast.lane.b32.xlu0 %v727_v50, 264  ;;  %v934_v37 = vrot.slane %v932_v7, 1 }
 0x122   : > { %v655_v52 = vpop.permute.xlu0 %654 }
 0x123   : > { %v787_v32 = vmul.f32 %v655_v52, %v439_v4  ;;  %2297 = vbcast.lane.b32.xlu1 %v5893_v45, 272  ;;  %v2302_v4 = vrot.slane %v5884_v24, %v5514_v12  ;;  %v674_v45 = vpop.permute.xlu1 %673  ;;  %v442_v52 = vld [vmem:[%s5582_s17 + $0x120] sm:$0xff] }
 0x124   : > { %744 = vbcast.lane.b32.xlu0 %v742_v1, 256 }
 0x125   : > { %v5957_v30 = vpack.c.bf16 %v788_v3, %v787_v32  ;;  %v443_v3 = vld [vmem:[%s5582_s17 + $0x128] sm:$0xff] }
 0x126   : > { %v663_v61 = vpop.permute.xlu0 %662 }
 0x127   : > { %v789_v25 = vmul.f32 %v663_v61, %v441_v59  ;;  %1320 = vrot.lane.b32.xlu1 %v5960_v54, %s7921_s24  ;;  %v1103_v49 = vrot.slane %v5957_v30, 1  ;;  %v5981_v51 = vpop.permute.xlu1 %2259 }
 0x128   : > { %752 = vbcast.lane.b32.xlu0 %v742_v1, 272  ;;  %7943 = vst [vmem:[#allocation25_spill] sm:$0xff] %v5981_v51 }
 0x129   : > { %v5966_v9 = vpack.c.bf16 %v789_v25, %v789_v25  ;;  %v937_v25 = vshll.u32 %v5806_v16, 16 }
 0x12a   : > { %v5969_v32 = vpop.permute.xlu0 %2248 }
 0x12b   : > { %7939 = vst [vmem:[#allocation21_spill] sm:$0xff] %v5966_v9  ;;  %7940 = vst [vmem:[#allocation22_spill] sm:$0xff] %v5969_v32  ;;  %v1104_v5 = vrot.slane %v5966_v9, 1  ;;  %729 = vbcast.lane.b32.xlu1 %v727_v50, 256  ;;  %v689_v16 = vpop.permute.xlu1 %688  ;;  %v5184_v9 = vld [vmem:[%s7876_s6 + $0x40] sm:$0xff]  }
 0x12c   : > { %2308 = vbcast.lane.b32.xlu0 %v2302_v4, 264  ;;  %4895 = vmatprep.subr.bf16.mxu1 %v5184_v9  ;;  %v5187_v9 = vld [vmem:[%s7876_s6 + $0x8] sm:$0xff]  }
 0x12d   : > { %v5974_v61 = vsel %vm1069_vm1, %v1103_v49, %v1104_v5  ;;  %v939_v49 = vrot.slane %v937_v25, 1  ;;  %v791_v5 = vmul.f32 %v674_v45, %v443_v3  ;;  %v2439_v3 = vmul.f32 %v5876_v19, %v5669_v42  ;;  %v446_v19 = vld [vmem:[%s5582_s17 + $0x140] sm:$0xff] }
 0x12e   : > { %7941 = vst [vmem:[#allocation23_spill] sm:$0xff] %v5974_v61  ;;  %v5976_v56 = vpop.permute.xlu0 %2252  ;;  %5046 = vmatmul.mubr.msk.bf16.gmra.mrb[16].mxu1 %vm1344_vm0, %v5974_v61  ;;  %v935_v61 = vor.u32 %v934_v37, %v930_v8  ;;  %v2436_v8 = vmul.f32 %v5850_v62, %v5621_v11  ;;  %v445_v11 = vld [vmem:[%s5582_s17 + $0x138] sm:$0xff]  ;;  %v5189_v62 = vld [vmem:[%s7876_s6 + $0x10] sm:$0xff]  }
 0x12f   : > { %7942 = vst [vmem:[#allocation24_spill] sm:$0xff] %v5976_v56  ;;  %737 = vbcast.lane.b32.xlu1 %v727_v50, 272  ;;  %v444_v56 = vld [vmem:[%s5582_s17 + $0x130] sm:$0x3] }
 0x130   : > { %1162 = vrot.lane.b32.xlu0 %v5857_v57, %s5363_s28  ;;  %v5992_v7 = vsel %vm844_vm2, %v935_v61, %v939_v49  ;;  %v6047_v42 = vpack.c.bf16 %v2436_v8, %v2436_v8 }
 0x132   : > { %v670_v59 = vpop.permute.xlu0 %669 }
 0x133   : > { %v790_v12 = vmul.f32 %v670_v59, %v442_v52  ;;  %748 = vbcast.lane.b32.xlu1 %v742_v1, 264  ;;  %v6001_v1 = vrot.slane %v5884_v24, %v5506_v6  ;;  %v5188_v52 = vld [vmem:[%s7876_s6 + $0x50] sm:$0xff]  }
 0x134   : > { %2312 = vbcast.lane.b32.xlu0 %v2302_v4, 272 }
 0x135   : > { %v5989_v51 = vpack.c.bf16 %v791_v5, %v790_v12  ;;  %v5185_v12 = vld [vmem:[%s7876_s6] sm:$0xff]   ;;  %v2527_v5 = vshll.u32 %v5839_v21, 16 }
 0x136   : > { %v678_v32 = vpop.permute.xlu0 %677  ;;  %4896 = vmatpush3.bf16.msra.mxu1 %v5185_v12 }
 0x137   : > { %v792_v50 = vmul.f32 %v678_v32, %v444_v56  ;;  %2304 = vbcast.lane.b32.xlu1 %v2302_v4, 256  ;;  %v6010_v32 = vpop.permute.xlu1 %2274  ;;  %v1106_v6 = vrot.slane %v5989_v51, 1  ;;  %v5186_v56 = vld [vmem:[%s7876_s6 + $0x48] sm:$0xff]  }
 0x138   : > { %1322 = vrot.lane.b32.xlu0 %v5992_v7, %s7921_s24  ;;  %7944 = vst [vmem:[#allocation26_spill] sm:$0xff] %v6010_v32  ;;  %4897 = vmatprep.subr.bf16.mxu1 %v5186_v56  ;;  %v5191_v56 = vld [vmem:[%s7876_s6 + $0x18] sm:$0xff]  }
 0x139   : > { %v6006_v45 = vpack.c.bf16 %v792_v50, %v792_v50  ;;  %v6051_v50 = vpack.c.bf16 %v2439_v3, %v2439_v3  ;;  %v2532_v3 = vshll.u32 %v6047_v42, 16 }
 0x13a   : > { %v6008_v4 = vpop.permute.xlu0 %2263  ;;  %4898 = vmatpush3.bf16.msra.mxu1 %v5187_v9  ;;  %v794_v9 = vmul.f32 %v689_v16, %v446_v19  ;;  %v2751_v16 = vrot.slane %v5874_v48, 1  ;;  %v5192_v19 = vld [vmem:[%s7876_s6 + $0x60] sm:$0xff]  }
 0x13b   : > { %v1107_v61 = vrot.slane %v6006_v45, 1  ;;  %1258 = vrot.lane.b32.xlu1 %v5809_v17, %s5363_s28  ;;  %v6045_v59 = vpop.permute.xlu1 %1280  ;;  %4899 = vmatprep.subr.bf16.mxu1 %v5188_v52 }
 0x13c   : > { %2319 = vbcast.lane.b32.xlu0 %v6001_v1, 256 }
 0x13d   : > { %v6024_v25 = vsel %vm1069_vm1, %v1106_v6, %v1107_v61  ;;  %v5190_v61 = vld [vmem:[%s7876_s6 + $0x58] sm:$0xff]   ;;  %v447_v6 = vld [vmem:[%s5582_s17 + $0x148] sm:$0x3] }
 0x13e   : > { %7945 = vst [vmem:[#allocation27_spill] sm:$0xff] %v6024_v25  ;;  %v6028_v37 = vpop.permute.xlu0 %2267  ;;  %5049 = vmatprep.mubr.msk.bf16.mxu1 %vm1344_vm0, %v6024_v25  ;;  %4900 = vmatpush3.bf16.msra.mxu1 %v5189_v62  ;;  %v2752_v62 = vrot.slane %v6051_v50, 1 }
 0x13f   : > { %1290 = vrot.lane.b32.xlu1 %v5804_v15, %s5361_s21  ;;  %4901 = vmatprep.subr.bf16.mxu1 %v5190_v61 }
 0x140   : > { %1260 = vrot.lane.b32.xlu0 %v5827_v55, %s5363_s28 }
 0x141   : > { %v6064_v8 = vpop.permute.xlu1 %1216 }
 0x142   : > { %v685_v49 = vpop.permute.xlu0 %684  ;;  %4902 = vmatpush3.bf16.msra.mxu1 %v5191_v56 }
 0x143   : > { %v793_v12 = vmul.f32 %v685_v49, %v445_v11  ;;  %1194 = vrot.lane.b32.xlu1 %v5779_v31, %s5361_s21  ;;  %v2525_v31 = vshrl.u32 %v5839_v21, 16  ;;  %v2529_v11 = vrot.slane %v2527_v5, 1  ;;  %v5193_v5 = vld [vmem:[%s7876_s6 + $0x20] sm:$0xff]   ;;  %4903 = vmatprep.subr.bf16.mxu1 %v5192_v19  ;;  %v5194_v19 = vld [vmem:[%s7876_s6 + $0x68] sm:$0xff]  }
 0x144   : > { %1292 = vrot.lane.b32.xlu0 %v5841_v43, %s5361_s21 }
 0x145   : > { %v6069_v49 = vpack.c.bf16 %v794_v9, %v793_v12  ;;  %v2530_v56 = vor.u32 %v2529_v11, %v2525_v31  ;;  %v944_v9 = vshll.u32 %v5841_v43, 16 }
 0x146   : > { %v693_v52 = vpop.permute.xlu0 %692  ;;  %4904 = vmatpush3.bf16.msra.mxu1 %v5193_v5  ;;  %v942_v5 = vshrl.u32 %v5841_v43, 16 }
 0x147   : > { %7946 = vst [vmem:[#allocation28_spill] sm:$0xff] %v6069_v49  ;;  %v795_v25 = vmul.f32 %v693_v52, %v447_v6  ;;  %1226 = vrot.lane.b32.xlu1 %v5783_v41, %s7921_s24  ;;  %v2534_v52 = vrot.slane %v2532_v3, 1  ;;  %v5195_v3 = vld [vmem:[%s7876_s6 + $0x28] sm:$0xff]   ;;  %4905 = vmatprep.subr.bf16.mxu1 %v5194_v19 }
 0x148   : > { %1196 = vrot.lane.b32.xlu0 %v5809_v17, %s5361_s21  ;;  %v6092_v17 = vsel %vm1069_vm1, %v2751_v16, %v2752_v62  ;;  %v949_v62 = vshll.u32 %v5846_v63, 16  ;;  %v5196_v63 = vld [vmem:[%s7876_s6 + $0x70] sm:$0xff]  }
 0x149   : > { %v6082_v61 = vpack.c.bf16 %v795_v25, %v795_v25  ;;  %v6084_v12 = vpop.permute.xlu1 %1282  ;;  %v1109_v25 = vrot.slane %v6069_v49, 1  ;;  %v2535_v49 = vsel %vm844_vm2, %v2530_v56, %v2534_v52  ;;  %v2442_v56 = vmul.f32 %v5878_v34, %v5638_v26 }
 0x14a   : > { %v6086_v6 = vpop.permute.xlu0 %2278  ;;  %4906 = vmatpush3.bf16.msra.mxu1 %v5195_v3 }
 0x14b   : > { %7947 = vst [vmem:[#allocation29_spill] sm:$0xff] %v6082_v61  ;;  %7948 = vst [vmem:[#allocation30_spill] sm:$0xff] %v6086_v6  ;;  %v1110_v32 = vrot.slane %v6082_v61, 1  ;;  %2323 = vbcast.lane.b32.xlu1 %v6001_v1, 264  ;;  %v946_v6 = vrot.slane %v944_v9, 1  ;;  %v2749_v61 = vrot.slane %v6047_v42, 1  ;;  %4907 = vmatprep.subr.bf16.mxu1 %v5196_v63  ;;  %v6139_v26 = vpack.c.bf16 %v2442_v56, %v2442_v56 }
 0x14c   : > { %2926 = vrot.lane.b32.xlu0 %v6092_v17, %s5363_s28  ;;  %v5197_v9 = vld [vmem:[%s7876_s6 + $0x30] sm:$0xff]   ;;  %v951_v42 = vrot.slane %v949_v62, 1  ;;  %v5199_v62 = vld [vmem:[%s7876_s6 + $0x38] sm:$0xff]   ;;  %v2549_v56 = vshrl.u32 %v5863_v53, 16 }
 0x14d   : > { %v6103_v31 = vpop.permute.xlu1 %1218  ;;  %v6106_v11 = vsel %vm1069_vm1, %v1109_v25, %v1110_v32  ;;  %v2748_v32 = vrot.slane %v5839_v21, 1  ;;  %v947_v19 = vor.u32 %v946_v6, %v942_v5  ;;  %v2332_v6 = vrot.slane %v5884_v24, %v5528_v18 }
 0x14e   : > { %7949 = vst [vmem:[#allocation31_spill] sm:$0xff] %v6106_v11  ;;  %5050 = vmatmul.mubr.msk.bf16.gmra.mrb[20].mxu1 %vm1344_vm0, %v6106_v11  ;;  %v1153_v16 = vpop.permute.xlu0 %1152  ;;  %v956_v18 = vshll.u32 %v5895_v35, 16 }
 0x14f   : > { %1164 = vrot.lane.b32.xlu1 %v5960_v54, %s5363_s28  ;;  %v2750_v3 = vsel %vm1069_vm1, %v2748_v32, %v2749_v61  ;;  %4908 = vmatpush3.bf16.msra.mxu1 %v5197_v9  ;;  %v2551_v61 = vshll.u32 %v5863_v53, 16  ;;  %v2556_v32 = vshll.u32 %v6139_v26, 16 }
 0x150   : > { %2830 = vrot.lane.b32.xlu0 %v2535_v49, %s5363_s28  ;;  %v5198_v49 = vld [vmem:[%s7876_s6 + $0x78] sm:$0xff]  }
 0x151   : > { %v6124_v25 = vpop.permute.xlu1 %1284  ;;  %4909 = vmatprep.subr.bf16.mxu1 %v5198_v49 }
 0x152   : > { %v1313_v52 = vpop.permute.xlu0 %1312 }
 0x153   : > { %2327 = vbcast.lane.b32.xlu1 %v6001_v1, 272  ;;  %v6142_v1 = vsel %vm844_vm2, %v947_v19, %v951_v42  ;;  %4910 = vmatpush3.bf16.msra.mxu1 %v5199_v62  ;;  %v2553_v19 = vrot.slane %v2551_v61, 1  ;;  %v1346_v62 = vsel %vm1344_vm0, %v5643_v28, %v1153_v16 }
 0x154   : > { %2862 = vrot.lane.b32.xlu0 %v2750_v3, %s5361_s21 }
 0x155   : > { %v6137_v63 = vpop.permute.xlu1 %1220  ;;  %v2554_v21 = vor.u32 %v2553_v19, %v2549_v56  ;;  %v2445_v56 = vmul.f32 %v5904_v13, %v5660_v39 }
 0x156   : > { %v1155_v34 = vpop.permute.xlu0 %1154 }
 0x157   : > { %1324 = vrot.lane.b32.xlu1 %v6142_v1, %s7921_s24 }
 0x158   : > { %2894 = vrot.lane.b32.xlu0 %v5874_v48, %s7921_s24 }
 0x159   : > { %v1249_v5 = vpop.permute.xlu1 %1248 }
 0x15a   : > { %v1461_v9 = vsel %vm1344_vm0, %v5764_v27, %v1249_v5  ;;  %v1315_v42 = vpop.permute.xlu0 %1314  ;;  %v2558_v27 = vrot.slane %v2556_v32, 1 }
 0x15b   : > { %1228 = vrot.lane.b32.xlu1 %v5804_v15, %s7921_s24  ;;  %v1508_v3 = vsel %vm1377_vm3, %v1461_v9, %v6045_v59  ;;  %v961_v15 = vshll.u32 %v5900_v47, 16  ;;  %v958_v9 = vrot.slane %v956_v18, 1 }
 0x15c   : > { %2338 = vbcast.lane.b32.xlu0 %v2332_v6, 264  ;;  %v1540_v49 = vsel %vm1410_vm4, %v1508_v3, %v1313_v52  ;;  %v954_v52 = vshrl.u32 %v5895_v35, 16  ;;  %v6175_v47 = vsel %vm844_vm2, %v2554_v21, %v2558_v27 }
 0x15d   : > { %v1185_v11 = vpop.permute.xlu1 %1184  ;;  %1818 = vmatprep.mubr.bf16.mxu0 %v1540_v49  ;;  %v963_v32 = vrot.slane %v961_v15, 1  ;;  %v6187_v49 = vpack.c.bf16 %v2445_v56, %v2445_v56  ;;  %v2755_v56 = vrot.slane %v6139_v26, 1 }
 0x15e   : > { %v1379_v5 = vsel %vm1377_vm3, %v1346_v62, %v1185_v11  ;;  %v1157_v61 = vpop.permute.xlu0 %1156  ;;  %v959_v19 = vor.u32 %v958_v9, %v954_v52  ;;  %v2561_v62 = vshrl.u32 %v5912_v58, 16 }
 0x15f   : > { %2958 = vrot.lane.b32.xlu1 %v5863_v53, %s5361_s21  ;;  %v1412_v59 = vsel %vm1410_vm4, %v1379_v5, %v6064_v8 }
 0x160   : > { %1166 = vrot.lane.b32.xlu0 %v5992_v7, %s5363_s28  ;;  %1819 = vmatmul.mubr.bf16.vlgmr.msra.gmra.mrb[0].mxu0 %v1412_v59  ;;  %v6190_v39 = vsel %vm844_vm2, %v959_v19, %v963_v32  ;;  %v2537_v19 = vshrl.u32 %v5874_v48, 16 }
 0x161   : > { %v1251_v28 = vpop.permute.xlu1 %1250 }
 0x162   : > { %v1464_v11 = vsel %vm1344_vm0, %v5743_v23, %v1251_v28  ;;  %v1317_v16 = vpop.permute.xlu0 %1316  ;;  %v1348_v23 = vsel %vm1344_vm0, %v5645_v29, %v1155_v34  ;;  %v2539_v28 = vshll.u32 %v5874_v48, 16 }
 0x163   : > { %2990 = vrot.lane.b32.xlu1 %v6175_v47, %s7921_s24  ;;  %v1510_v8 = vsel %vm1377_vm3, %v1464_v11, %v6084_v12  ;;  %v2563_v12 = vshll.u32 %v5912_v58, 16 }
 0x164   : > { %2342 = vbcast.lane.b32.xlu0 %v2332_v6, 272  ;;  %v1543_v3 = vsel %vm1410_vm4, %v1510_v8, %v1315_v42 }
 0x165   : > { %v1187_v18 = vpop.permute.xlu1 %1186  ;;  %1826 = vmatprep.mubr.bf16.mxu0 %v1543_v3  ;;  %v2565_v27 = vrot.slane %v2563_v12, 1  ;;  %v2541_v3 = vrot.slane %v2539_v28, 1 }
 0x166   : > { %v1381_v15 = vsel %vm1377_vm3, %v1348_v23, %v1187_v18  ;;  %v1159_v21 = vpop.permute.xlu0 %1158  ;;  %v6233_v23 = vrot.slane %v5884_v24, %v5535_v22  ;;  %v450_v22 = vld [vmem:[%s5582_s17 + $0x160] sm:$0x3] }
 0x167   : > { %2334 = vbcast.lane.b32.xlu1 %v2332_v6, 256  ;;  %v1415_v13 = vsel %vm1410_vm4, %v1381_v15, %v6103_v31  ;;  %v2568_v6 = vshll.u32 %v6187_v49, 16  ;;  %v2566_v32 = vor.u32 %v2565_v27, %v2561_v62  ;;  %v2542_v12 = vor.u32 %v2541_v3, %v2537_v19  ;;  %v448_v27 = vld [vmem:[%s5582_s17 + $0x150] sm:$0xff] }
 0x168   : > { %1326 = vrot.lane.b32.xlu0 %v6190_v39, %s7921_s24  ;;  %1827 = vmatmul.mubr.bf16.gmra.mrb[4].mxu0 %v1415_v13  ;;  %v968_v19 = vshll.u32 %v5922_v10, 16 }
 0x169   : > { %v1253_v29 = vpop.permute.xlu1 %1252  ;;  %v2570_v11 = vrot.slane %v2568_v6, 1 }
 0x16a   : > { %v1467_v34 = vsel %vm1344_vm0, %v5787_v36, %v1253_v29  ;;  %v6199_v42 = vpop.permute.xlu0 %2282  ;;  %v1350_v36 = vsel %vm1344_vm0, %v5604_v0, %v1157_v61  ;;  %v2754_v61 = vrot.slane %v5863_v53, 1 }
 0x16b   : > { %1262 = vrot.lane.b32.xlu1 %v5866_v60, %s5363_s28  ;;  %v1512_v31 = vsel %vm1377_vm3, %v1467_v34, %v6124_v25 }
 0x16c   : > { %1230 = vrot.lane.b32.xlu0 %v5841_v43, %s7921_s24  ;;  %v1546_v5 = vsel %vm1410_vm4, %v1512_v31, %v1317_v16  ;;  %v2544_v16 = vshll.u32 %v6051_v50, 16  ;;  %v1352_v31 = vsel %vm1344_vm0, %v5690_v2, %v1159_v21 }
 0x16d   : > { %v1189_v59 = vpop.permute.xlu1 %1188  ;;  %1834 = vmatprep.mubr.bf16.mxu0 %v1546_v5 }
 0x16e   : > { %v1383_v52 = vsel %vm1377_vm3, %v1350_v36, %v1189_v59  ;;  %v1319_v9 = vpop.permute.xlu0 %1318  ;;  %v2546_v18 = vrot.slane %v2544_v16, 1 }
 0x16f   : > { %1294 = vrot.lane.b32.xlu1 %v5895_v35, %s5361_s21  ;;  %v1418_v25 = vsel %vm1410_vm4, %v1383_v52, %v6137_v63  ;;  %v6227_v63 = vsel %vm844_vm2, %v2566_v32, %v2570_v11  ;;  %v2758_v32 = vrot.slane %v6187_v49, 1 }
 0x170   : > { %2960 = vrot.lane.b32.xlu0 %v5912_v58, %s5361_s21  ;;  %1835 = vmatmul.mubr.bf16.gmra.mrb[8].mxu0 %v1418_v25  ;;  %v6247_v6 = vsel %vm844_vm2, %v2542_v12, %v2546_v18 }
 0x171   : > { %v1255_v0 = vpop.permute.xlu1 %1254 }
 0x172   : > { %v700_v8 = vpop.permute.xlu0 %699  ;;  %v1470_v50 = vsel %vm1344_vm0, %v5818_v38, %v1255_v0  ;;  %v452_v0 = vld [vmem:[%s5582_s17 + $0x170] sm:$0xff] }
 0x173   : > { %1198 = vrot.lane.b32.xlu1 %v5827_v55, %s5361_s21  ;;  %v6239_v55 = vsel %vm1069_vm1, %v2754_v61, %v2755_v56  ;;  %v796_v2 = vmul.f32 %v700_v8, %v448_v27  ;;  %v2757_v61 = vrot.slane %v5912_v58, 1 }
 0x174   : > { %2992 = vrot.lane.b32.xlu0 %v6227_v63, %s7921_s24  ;;  %7950 = vst [vmem:[#allocation32_spill] sm:$0xff] %v6239_v55 }
 0x175   : > { %v1287_v26 = vpop.permute.xlu1 %1286  ;;  %v6284_v18 = vsel %vm1069_vm1, %v2757_v61, %v2758_v32 }
 0x176   : > { %v1514_v15 = vsel %vm1377_vm3, %v1470_v50, %v1287_v26  ;;  %v708_v13 = vpop.permute.xlu0 %707  ;;  %7951 = vst [vmem:[#allocation33_spill] sm:$0xff] %v6284_v18 }
 0x177   : > { %2928 = vrot.lane.b32.xlu1 %v6239_v55, %s5363_s28  ;;  %v1549_v29 = vsel %vm1410_vm4, %v1514_v15, %v1319_v9  ;;  %v798_v62 = vmul.f32 %v708_v13, %v450_v22  ;;  %v449_v9 = vld [vmem:[%s5582_s17 + $0x158] sm:$0xff]  ;;  %v973_v13 = vshll.u32 %v5928_v20, 16  ;;  %v970_v22 = vrot.slane %v968_v19, 1 }
 0x178   : > { %2349 = vbcast.lane.b32.xlu0 %v6233_v23, 256  ;;  %1842 = vmatprep.mubr.bf16.mxu0 %v1549_v29  ;;  %v453_v15 = vld [vmem:[%s5582_s17 + $0x178] sm:$0x3]  ;;  %v966_v29 = vshrl.u32 %v5922_v10, 16 }
 0x179   : > { %v1191_v38 = vpop.permute.xlu1 %1190  ;;  %v6263_v21 = vpack.c.bf16 %v798_v62, %v798_v62 }
 0x17a   : > { %v719_v34 = vpop.permute.xlu0 %718  ;;  %v1385_v5 = vsel %vm1377_vm3, %v1352_v31, %v1191_v38  ;;  %v5234_v38 = vld [vmem:[%s5582_s17 + $0x68] sm:$0xff]  ;;  %v5235_v31 = vld [vmem:[%s5582_s17 + $0x60] sm:$0xff] }
 0x17b   : > { %2832 = vrot.lane.b32.xlu1 %v6247_v6, %s5363_s28  ;;  %v1113_v16 = vrot.slane %v6263_v21, 1  ;;  %v800_v49 = vmul.f32 %v719_v34, %v452_v0  ;;  %v2447_v34 = vmul.f32 %v5234_v38, %v5931_v44  ;;  %v2446_v62 = vmul.f32 %v5235_v31, %v5924_v14 }
 0x17c   : > { %1264 = vrot.lane.b32.xlu0 %v5915_v33, %s5363_s28  ;;  %v980_v38 = vshll.u32 %v5957_v30, 16 }
 0x17d   : > { %v1223_v36 = vpop.permute.xlu1 %1222  ;;  %v6310_v44 = vpack.c.bf16 %v2447_v34, %v2446_v62  ;;  %v5237_v62 = vld [vmem:[%s5582_s17 + $0x78] sm:$0xff] }
 0x17e   : > { %v6257_v59 = vpop.permute.xlu0 %2289  ;;  %v1421_v52 = vsel %vm1410_vm4, %v1385_v5, %v1223_v36 }
 0x17f   : > { %2864 = vrot.lane.b32.xlu1 %v6092_v17, %s5361_s21  ;;  %1843 = vmatmul.mubr.bf16.gmra.mrb[12].mxu0 %v1421_v52  ;;  %v451_v17 = vld [vmem:[%s5582_s17 + $0x168] sm:$0xff]  ;;  %v975_v52 = vrot.slane %v973_v13, 1  ;;  %7953 = vst [vmem:[#allocation35_spill] sm:$0xff] %v6310_v44  ;;  %v2575_v19 = vshll.u32 %v6310_v44, 16 }
 0x180   : > { %1296 = vrot.lane.b32.xlu0 %v5922_v10, %s5361_s21 }
 0x181   : > { %v704_v28 = vpop.permute.xlu1 %703 }
 0x182   : > { %v797_v11 = vmul.f32 %v704_v28, %v449_v9  ;;  %v6267_v25 = vpop.permute.xlu0 %1256  ;;  %v5236_v28 = vld [vmem:[%s5582_s17 + $0x70] sm:$0x3] }
 0x183   : > { %2896 = vrot.lane.b32.xlu1 %v5863_v53, %s7921_s24  ;;  %v2448_v14 = vmul.f32 %v5236_v28, %v5943_v40  ;;  %v1473_v34 = vsel %vm1344_vm0, %v5857_v57, %v6267_v25  ;;  %v5238_v25 = vld [vmem:[%s5582_s17 + $0x80] sm:$0xff] }
 0x184   : > { %v6276_v56 = vpack.c.bf16 %v797_v11, %v796_v2  ;;  %1200 = vrot.lane.b32.xlu0 %v5866_v60, %s5361_s21  ;;  %v971_v2 = vor.u32 %v970_v22, %v966_v29  ;;  %v2573_v29 = vshrl.u32 %v6310_v44, 16  ;;  %v2577_v22 = vrot.slane %v2575_v19, 1  ;;  %v7956_v19 = vld [vmem:[#allocation21_spill] sm:$0xff] }
 0x185   : > { %v715_v8 = vpop.permute.xlu1 %714  ;;  %v985_v57 = vshll.u32 %v7956_v19, 16  ;;  %v456_v19 = vld [vmem:[%s5582_s17 + $0x190] sm:$0x3] }
 0x186   : > { %v799_v3 = vmul.f32 %v715_v8, %v451_v17  ;;  %v1289_v50 = vpop.permute.xlu0 %1288  ;;  %v1112_v26 = vrot.slane %v6276_v56, 1  ;;  %v6327_v8 = vsel %vm844_vm2, %v971_v2, %v975_v52 }
 0x187   : > { %2353 = vbcast.lane.b32.xlu1 %v6233_v23, 264  ;;  %v1516_v52 = vsel %vm1377_vm3, %v1473_v34, %v1289_v50  ;;  %v454_v50 = vld [vmem:[%s5582_s17 + $0x180] sm:$0xff] }
 0x188   : > { %2930 = vrot.lane.b32.xlu0 %v6284_v18, %s5363_s28  ;;  %v6290_v60 = vsel %vm1069_vm1, %v1112_v26, %v1113_v16  ;;  %v6300_v27 = vpack.c.bf16 %v800_v49, %v799_v3  ;;  %v6324_v16 = vpack.c.bf16 %v2448_v14, %v2448_v14  ;;  %v7955_v3 = vld [vmem:[#allocation14_spill] sm:$0xff] }
 0x189   : > { %v723_v12 = vpop.permute.xlu1 %722  ;;  %5053 = vmatprep.mubr.msk.bf16.mxu1 %vm1344_vm0, %v6290_v60 }
 0x18a   : > { %7952 = vst [vmem:[#allocation34_spill] sm:$0xff] %v6300_v27  ;;  %v801_v5 = vmul.f32 %v723_v12, %v453_v15  ;;  %v1193_v36 = vpop.permute.xlu0 %1192  ;;  %v1115_v0 = vrot.slane %v6300_v27, 1  ;;  %v2580_v13 = vshll.u32 %v6324_v16, 16 }
 0x18b   : > { %1168 = vrot.lane.b32.xlu1 %v6142_v1, %s5363_s28 }
 0x18c   : > { %v6304_v20 = vpack.c.bf16 %v801_v5, %v801_v5  ;;  %2834 = vrot.lane.b32.xlu0 %v6175_v47, %s5363_s28  ;;  %v2449_v5 = vmul.f32 %v5237_v62, %v5954_v46  ;;  %v2582_v28 = vrot.slane %v2580_v13, 1  ;;  %v459_v13 = vld [vmem:[%s5582_s17 + $0x1a8] sm:$0x3] }
 0x18d   : > { %v6308_v9 = vpop.permute.xlu1 %2293 }
 0x18e   : > { %v1116_v11 = vrot.slane %v6304_v20, 1  ;;  %v1225_v32 = vpop.permute.xlu0 %1224 }
 0x18f   : > { %2357 = vbcast.lane.b32.xlu1 %v6233_v23, 272  ;;  %v7954_v23 = vld [vmem:[#allocation11_spill] sm:$0xff] }
 0x190   : > { %2866 = vrot.lane.b32.xlu0 %v6239_v55, %s5361_s21  ;;  %v6320_v17 = vsel %vm1069_vm1, %v1115_v0, %v1116_v11  ;;  %v2362_v49 = vrot.slane %v5884_v24, %v7954_v23  ;;  %v2578_v0 = vor.u32 %v2577_v22, %v2573_v29  ;;  %v7957_v23 = vld [vmem:[#allocation22_spill] sm:$0xff] }
 0x191   : > { %v1161_v61 = vpop.permute.xlu1 %1160  ;;  %5054 = vmatmul.mubr.msk.bf16.gmra.mrb[24].mxu1 %vm1344_vm0, %v6320_v17 }
 0x192   : > { %v734_v40 = vpop.permute.xlu0 %733  ;;  %v1354_v26 = vsel %vm1344_vm0, %v7955_v3, %v1161_v61  ;;  %v978_v61 = vshrl.u32 %v5957_v30, 16  ;;  %v455_v3 = vld [vmem:[%s5582_s17 + $0x188] sm:$0xff] }
 0x193   : > { %1328 = vrot.lane.b32.xlu1 %v6327_v8, %s7921_s24  ;;  %v1387_v31 = vsel %vm1377_vm3, %v1354_v26, %v1193_v36  ;;  %v2450_v36 = vmul.f32 %v5238_v25, %v7957_v23  ;;  %v982_v26 = vrot.slane %v980_v38, 1  ;;  %v803_v22 = vmul.f32 %v734_v40, %v455_v3  ;;  %v7958_v38 = vld [vmem:[#allocation24_spill] sm:$0xff]  ;;  %v457_v40 = vld [vmem:[%s5582_s17 + $0x198] sm:$0xff] }
 0x194   : > { %2898 = vrot.lane.b32.xlu0 %v5912_v58, %s7921_s24  ;;  %v1424_v46 = vsel %vm1410_vm4, %v1387_v31, %v1225_v32  ;;  %v5239_v32 = vld [vmem:[%s5582_s17 + $0x88] sm:$0x3] }
 0x195   : > { %v6338_v15 = vpop.permute.xlu1 %2297  ;;  %v2451_v31 = vmul.f32 %v5239_v32, %v7958_v38  ;;  %v983_v25 = vor.u32 %v982_v26, %v978_v61 }
 0x196   : > { %v745_v12 = vpop.permute.xlu0 %744 }
 0x197   : > { %1232 = vrot.lane.b32.xlu1 %v5895_v35, %s7921_s24 }
 0x198   : > { %2368 = vbcast.lane.b32.xlu0 %v2362_v49, 264 }
 0x199   : > { %v1321_v2 = vpop.permute.xlu1 %1320 }
 0x19a   : > { %v753_v14 = vpop.permute.xlu0 %752  ;;  %v1552_v11 = vsel %vm1410_vm4, %v1516_v52, %v1321_v2  ;;  %v6368_v52 = vsel %vm844_vm2, %v2578_v0, %v2582_v28  ;;  %v987_v2 = vrot.slane %v985_v57, 1  ;;  %v6380_v57 = vpack.c.bf16 %v2451_v31, %v2451_v31 }
 0x19b   : > { %2962 = vrot.lane.b32.xlu1 %v6310_v44, %s5361_s21  ;;  %1850 = vmatprep.mubr.bf16.mxu0 %v1552_v11  ;;  %v6370_v11 = vpack.c.bf16 %v2450_v36, %v2449_v5  ;;  %v807_v23 = vmul.f32 %v753_v14, %v459_v13  ;;  %v458_v36 = vld [vmem:[%s5582_s17 + $0x1a0] sm:$0xff] }
 0x19c   : > { %1170 = vrot.lane.b32.xlu0 %v6190_v39, %s5363_s28  ;;  %1851 = vmatmul.mubr.bf16.gmra.mrb[16].mxu0 %v1424_v46  ;;  %v6383_v5 = vsel %vm844_vm2, %v983_v25, %v987_v2  ;;  %v7960_v2 = vld [vmem:[#allocation20_spill] sm:$0xff] }
 0x19d   : > { %v730_v29 = vpop.permute.xlu1 %729  ;;  %v6387_v32 = vpack.c.bf16 %v807_v23, %v807_v23 }
 0x19e   : > { %v802_v34 = vmul.f32 %v730_v29, %v454_v50  ;;  %v6365_v62 = vpop.permute.xlu0 %2308  ;;  %v2587_v50 = vshll.u32 %v6370_v11, 16  ;;  %v805_v29 = vmul.f32 %v745_v12, %v457_v40  ;;  %v2585_v12 = vshrl.u32 %v6370_v11, 16 }
 0x19f   : > { %2994 = vrot.lane.b32.xlu1 %v6368_v52, %s7921_s24  ;;  %7959 = vst [vmem:[#allocation11_spill] sm:$0xff] %v6387_v32  ;;  %v1150_v31 = vrot.slane %v6387_v32, 1 }
 0x1a0   : > { %2372 = vbcast.lane.b32.xlu0 %v2362_v49, 272  ;;  %v6378_v46 = vpack.c.bf16 %v803_v22, %v802_v34  ;;  %v2592_v34 = vshll.u32 %v6380_v57, 16  ;;  %v2589_v38 = vrot.slane %v2587_v50, 1 }
 0x1a1   : > { %v738_v3 = vpop.permute.xlu1 %737 }
 0x1a2   : > { %v804_v28 = vmul.f32 %v738_v3, %v456_v19  ;;  %v1163_v0 = vpop.permute.xlu0 %1162 }
 0x1a3   : > { %2364 = vbcast.lane.b32.xlu1 %v2362_v49, 256  ;;  %v1132_v49 = vrot.slane %v6378_v46, 1 }
 0x1a4   : > { %v6389_v14 = vpack.c.bf16 %v804_v28, %v804_v28  ;;  %1330 = vrot.lane.b32.xlu0 %v6383_v5, %s7921_s24  ;;  %v2594_v28 = vrot.slane %v2592_v34, 1 }
 0x1a5   : > { %v749_v61 = vpop.permute.xlu1 %748 }
 0x1a6   : > { %v1133_v26 = vrot.slane %v6389_v14, 1  ;;  %v806_v13 = vmul.f32 %v749_v61, %v458_v36  ;;  %v6394_v22 = vpop.permute.xlu0 %2312  ;;  %v2590_v36 = vor.u32 %v2589_v38, %v2585_v12  ;;  %v2761_v61 = vrot.slane %v6324_v16, 1  ;;  %v7966_v16 = vld [vmem:[#allocation12_spill] sm:$0xff] }
 0x1a7   : > { %1266 = vrot.lane.b32.xlu1 %v7960_v2, %s5363_s28 }
 0x1a8   : > { %v6402_v19 = vpack.c.bf16 %v806_v13, %v805_v29  ;;  %1234 = vrot.lane.b32.xlu0 %v5922_v10, %s7921_s24  ;;  %v6407_v25 = vsel %vm1069_vm1, %v1132_v49, %v1133_v26  ;;  %v2760_v49 = vrot.slane %v6310_v44, 1  ;;  %v6431_v12 = vsel %vm844_vm2, %v2590_v36, %v2594_v28 }
 0x1a9   : > { %7962 = vst [vmem:[#allocation21_spill] sm:$0xff] %v6407_v25  ;;  %v6409_v23 = vpop.permute.xlu1 %2304  ;;  %5057 = vmatprep.mubr.msk.bf16.mxu1 %vm1344_vm0, %v6407_v25 }
 0x1aa   : > { %7961 = vst [vmem:[#allocation14_spill] sm:$0xff] %v6402_v19  ;;  %v1323_v40 = vpop.permute.xlu0 %1322  ;;  %v1149_v3 = vrot.slane %v6402_v19, 1  ;;  %v6447_v28 = vsel %vm1069_vm1, %v2760_v49, %v2761_v61 }
 0x1ab   : > { %1298 = vrot.lane.b32.xlu1 %v5957_v30, %s5361_s21  ;;  %7968 = vst [vmem:[#allocation36_spill] sm:$0xff] %v6447_v28 }
 0x1ac   : > { %2964 = vrot.lane.b32.xlu0 %v6370_v11, %s5361_s21  ;;  %v1151_v50 = vsel %vm1069_vm1, %v1149_v3, %v1150_v31  ;;  %v6439_v31 = vrot.slane %v5884_v24, %v7966_v16 }
 0x1ad   : > { %v1259_v29 = vpop.permute.xlu1 %1258  ;;  %5058 = vmatmul.mubr.msk.bf16.gmra.mrb[28].mxu1 %vm1344_vm0, %v1151_v50  ;;  %v6421_v26 = vpop.f32.mrb[0].mxu1 }
 0x1ae   : > { %7963 = vst [vmem:[#allocation22_spill] sm:$0xff] %v6421_v26  ;;  %v6423_v13 = vpop.permute.xlu0 %2319  ;;  %v6426_v34 = vpop.f32.mrb[1].mxu1  ;;  %v1476_v3 = vsel %vm1344_vm0, %v5960_v54, %v1259_v29  ;;  %v7969_v54 = vld [vmem:[#allocation15_spill] sm:$0xff] }
 0x1af   : > { %7964 = vst [vmem:[#allocation24_spill] sm:$0xff] %v6426_v34  ;;  %1202 = vrot.lane.b32.xlu1 %v5915_v33, %s5361_s21  ;;  %v6433_v38 = vpop.f32.mrb[2].mxu1  ;;  %v7970_v29 = vld [vmem:[#allocation23_spill] sm:$0xff] }
 0x1b0   : > { %7965 = vst [vmem:[#allocation20_spill] sm:$0xff] %v6433_v38  ;;  %2996 = vrot.lane.b32.xlu0 %v6431_v12, %s7921_s24  ;;  %v6443_v50 = vpop.f32.mrb[3].mxu1 }
 0x1b1   : > { %7967 = vst [vmem:[#allocation12_spill] sm:$0xff] %v6443_v50  ;;  %v1291_v55 = vpop.permute.xlu1 %1290 }
 0x1b2   : > { %v1518_v33 = vsel %vm1377_vm3, %v1476_v3, %v1291_v55  ;;  %v1261_v25 = vpop.permute.xlu0 %1260  ;;  %v1356_v55 = vsel %vm1344_vm0, %v7969_v54, %v1163_v0 }
 0x1b3   : > { %2932 = vrot.lane.b32.xlu1 %v6447_v28, %s5363_s28  ;;  %v1555_v36 = vsel %vm1410_vm4, %v1518_v33, %v1323_v40  ;;  %v1479_v26 = vsel %vm1344_vm0, %v5992_v7, %v1261_v25 }
 0x1b4   : > { %2379 = vbcast.lane.b32.xlu0 %v6439_v31, 256  ;;  %1858 = vmatprep.mubr.bf16.mxu0 %v1555_v36 }
 0x1b5   : > { %v1195_v16 = vpop.permute.xlu1 %1194 }
 0x1b6   : > { %v1293_v38 = vpop.permute.xlu0 %1292  ;;  %v1389_v61 = vsel %vm1377_vm3, %v1356_v55, %v1195_v16 }
 0x1b7   : > { %2836 = vrot.lane.b32.xlu1 %v6227_v63, %s5363_s28  ;;  %v1520_v58 = vsel %vm1377_vm3, %v1479_v26, %v1293_v38 }
 0x1b8   : > { %1268 = vrot.lane.b32.xlu0 %v7970_v29, %s5363_s28 }
 0x1b9   : > { %v1227_v49 = vpop.permute.xlu1 %1226  ;;  %v6461_v33 = vpop.f32.mrb[4].mxu1 }
 0x1ba   : > { %v1197_v3 = vpop.permute.xlu0 %1196  ;;  %v1427_v40 = vsel %vm1410_vm4, %v1389_v61, %v1227_v49  ;;  %7971 = vst [vmem:[#allocation15_spill] sm:$0xff] %v6461_v33  ;;  %v6465_v36 = vpop.f32.mrb[5].mxu1  ;;  %v2764_v61 = vrot.slane %v6380_v57, 1  ;;  %v2763_v49 = vrot.slane %v6370_v11, 1  ;;  %v2142_v33 = vld [vmem:[%s5521_s22 + $0x10] sm:$0x3] }
 0x1bb   : > { %2868 = vrot.lane.b32.xlu1 %v6284_v18, %s5361_s21  ;;  %1859 = vmatmul.mubr.bf16.gmra.mrb[20].mxu0 %v1427_v40  ;;  %7972 = vst [vmem:[#allocation23_spill] sm:$0xff] %v6465_v36  ;;  %v6469_v0 = vpop.f32.mrb[6].mxu1  ;;  %v992_v57 = vshll.u32 %v5989_v51, 16  ;;  %v4712_v32 = vmul.f32 -1.442695, %v2142_v33  ;;  %v7981_v33 = vld [vmem:[#allocation25_spill] sm:$0xff] }
 0x1bc   : > { %1300 = vrot.lane.b32.xlu0 %v5989_v51, %s5361_s21  ;;  %7973 = vst [vmem:[#allocation37_spill] sm:$0xff] %v6469_v0  ;;  %v6473_v16 = vpop.f32.mrb[7].mxu1  ;;  %v6483_v0 = vsel %vm1069_vm1, %v2763_v49, %v2764_v61  ;;  %v5240_v49 = vld [vmem:[%s5582_s17 + $0x98] sm:$0xff]  ;;  %s4753_s22 = sld [smem:[#allocation2 + $0x6]] }
 0x1bd   : > { %v6471_v54 = vpop.permute.xlu1 %2323  ;;  %7975 = vst [vmem:[#allocation39_spill] sm:$0xff] %v6473_v16  ;;  %7976 = vst [vmem:[#allocation40_spill] sm:$0xff] %v6483_v0  ;;  %v2453_v10 = vmul.f32 %v5240_v49, %v6008_v4  ;;  %v994_v19 = vrot.slane %v992_v57, 1  ;;  %v5242_v4 = vld [vmem:[%s5582_s17 + $0xa0] sm:$0x3]  ;;  %5222 = vpow2.f32 %v4712_v32 }
 0x1be   : > { %7974 = vst [vmem:[#allocation38_spill] sm:$0xff] %v6471_v54  ;;  %v2927_v55 = vpop.permute.xlu0 %2926  ;;  %v2454_v7 = vmul.f32 %v5242_v4, %v6028_v37 }
 0x1bf   : > { %2900 = vrot.lane.b32.xlu1 %v6310_v44, %s7921_s24  ;;  %v997_v44 = vshll.u32 %v6006_v45, 16 }
 0x1c0   : > { %1204 = vrot.lane.b32.xlu0 %v7960_v2, %s5361_s21  ;;  %v6523_v37 = vpack.c.bf16 %v2454_v7, %v2454_v7 }
 0x1c1   : > { %v1165_v40 = vpop.permute.xlu1 %1164  ;;  %v999_v34 = vrot.slane %v997_v44, 1 }
 0x1c2   : > { %v2831_v18 = vpop.permute.xlu0 %2830  ;;  %v1358_v25 = vsel %vm1344_vm0, %v5783_v41, %v1165_v40 }
 0x1c3   : > { %2383 = vbcast.lane.b32.xlu1 %v6439_v31, 264 }
 0x1c4   : > { %2934 = vrot.lane.b32.xlu0 %v6483_v0, %s5363_s28 }
 0x1c5   : > { %v6490_v16 = vpop.permute.xlu1 %2327  ;;  %v6492_v2 = vpop.f32.mrb[8].mxu1 }
 0x1c6   : > { %7977 = vst [vmem:[#allocation41_spill] sm:$0xff] %v6490_v16  ;;  %v2863_v36 = vpop.permute.xlu0 %2862  ;;  %7978 = vst [vmem:[#allocation42_spill] sm:$0xff] %v6492_v2  ;;  %v6496_v61 = vpop.f32.mrb[9].mxu1  ;;  %v5241_v2 = vld [vmem:[%s5582_s17 + $0x90] sm:$0xff] }
 0x1c7   : > { %1172 = vrot.lane.b32.xlu1 %v6327_v8, %s5363_s28  ;;  %7979 = vst [vmem:[#allocation43_spill] sm:$0xff] %v6496_v61  ;;  %v6504_v45 = vpop.f32.mrb[10].mxu1  ;;  %v2452_v50 = vmul.f32 %v5241_v2, %v7981_v33  ;;  %v990_v61 = vshrl.u32 %v5989_v51, 16  ;;  %v1391_v2 = vsel %vm1377_vm3, %v1358_v25, %v1197_v3  ;;  %v7985_v25 = vld [vmem:[#allocation28_spill] sm:$0xff] }
 0x1c8   : > { %2838 = vrot.lane.b32.xlu0 %v6368_v52, %s5363_s28  ;;  %7980 = vst [vmem:[#allocation44_spill] sm:$0xff] %v6504_v45  ;;  %v6510_v54 = vpop.f32.mrb[11].mxu1 }
 0x1c9   : > { %v1325_v16 = vpop.permute.xlu1 %1324  ;;  %v6518_v44 = vpack.c.bf16 %v2453_v10, %v2452_v50  ;;  %v995_v26 = vor.u32 %v994_v19, %v990_v61  ;;  %v7983_v10 = vld [vmem:[#allocation13_spill] sm:$0xff]  ;;  %v2604_v50 = vshll.u32 %v6523_v37, 16 }
 0x1ca   : > { %v2895_v49 = vpop.permute.xlu0 %2894  ;;  %v1558_v57 = vsel %vm1410_vm4, %v1520_v58, %v1325_v16  ;;  %v2392_v32 = vrot.slane %v5884_v24, %v7983_v10  ;;  %v3136_v16 = vsel %vm1344_vm0, %v6247_v6, %v2927_v55  ;;  %v7984_v61 = vld [vmem:[#allocation17_spill] sm:$0xff] }
 0x1cb   : > { %2387 = vbcast.lane.b32.xlu1 %v6439_v31, 272  ;;  %1866 = vmatprep.mubr.bf16.mxu0 %v1558_v57  ;;  %7982 = vst [vmem:[#allocation25_spill] sm:$0xff] %v6518_v44  ;;  %v6528_v41 = vsel %vm844_vm2, %v995_v26, %v999_v34  ;;  %v2599_v19 = vshll.u32 %v6518_v44, 16  ;;  %v5223_v34 = vpop.eup %5222  ;;  %v3023_v4 = vsel %vm1344_vm0, %v7984_v61, %v2831_v18  ;;  %v1004_v57 = vshll.u32 %v7985_v25, 16  ;;  %v7986_v55 = vld [vmem:[#allocation29_spill] sm:$0xff] }
 0x1cc   : > { %2870 = vrot.lane.b32.xlu0 %v6447_v28, %s5361_s21  ;;  %v2606_v26 = vrot.slane %v2604_v50, 1  ;;  %v2597_v6 = vshrl.u32 %v6518_v44, 16  ;;  %v1009_v10 = vshll.u32 %v7986_v55, 16  ;;  %v7987_v50 = vld [vmem:[#allocation30_spill] sm:$0xff] }
 0x1cd   : > { %v1229_v38 = vpop.permute.xlu1 %1228  ;;  %v2601_v40 = vrot.slane %v2599_v19, 1  ;;  %v2154_v19 = vadd.f32 1.0, %v5223_v34  ;;  %v5245_v34 = vld [vmem:[%s5582_s17 + $0xb8] sm:$0x3] }
 0x1ce   : > { %v6525_v33 = vpop.permute.xlu0 %2338  ;;  %v1430_v58 = vsel %vm1410_vm4, %v1391_v2, %v1229_v38  ;;  %v3055_v38 = vsel %vm1377_vm3, %v3023_v4, %v2863_v36  ;;  %v1006_v4 = vrot.slane %v1004_v57, 1  ;;  %v2457_v28 = vmul.f32 %v5245_v34, %v6199_v42 }
 0x1cf   : > { %1332 = vrot.lane.b32.xlu1 %v6528_v41, %s7921_s24  ;;  %1867 = vmatmul.mubr.bf16.gmra.mrb[24].mxu0 %v1430_v58  ;;  %v3087_v18 = vsel %vm1410_vm4, %v3055_v38, %v2895_v49  ;;  %v2602_v36 = vor.u32 %v2601_v40, %v2597_v6  ;;  %v1002_v40 = vshrl.u32 %v7985_v25, 16  ;;  %5224 = vrcp.f32 %v2154_v19 }
 0x1d0   : > { %2902 = vrot.lane.b32.xlu0 %v6370_v11, %s7921_s24 }
 0x1d1   : > { %v2959_v31 = vpop.permute.xlu1 %2958  ;;  %v6565_v55 = vsel %vm844_vm2, %v2602_v36, %v2606_v26 }
 0x1d2   : > { %v1167_v3 = vpop.permute.xlu0 %1166  ;;  %v3183_v24 = vsel %vm1377_vm3, %v3136_v16, %v2959_v31  ;;  %v5243_v31 = vld [vmem:[%s5582_s17 + $0xb0] sm:$0xff] }
 0x1d3   : > { %1236 = vrot.lane.b32.xlu1 %v5957_v30, %s7921_s24  ;;  %v2456_v16 = vmul.f32 %v5243_v31, %v7987_v50  ;;  %v6574_v50 = vpack.c.bf16 %v2457_v28, %v2457_v28  ;;  %v7989_v28 = vld [vmem:[#allocation27_spill] sm:$0xff] }
 0x1d4   : > { %2398 = vbcast.lane.b32.xlu0 %v2392_v32, 264 }
 0x1d5   : > { %v2991_v7 = vpop.permute.xlu1 %2990 }
 0x1d6   : > { %v6548_v2 = vpop.permute.xlu0 %2342  ;;  %v3215_v58 = vsel %vm1410_vm4, %v3183_v24, %v2991_v7  ;;  %v5244_v24 = vld [vmem:[%s5582_s17 + $0xa8] sm:$0xff]  ;;  %v7988_v7 = vld [vmem:[#allocation26_spill] sm:$0xff] }
 0x1d7   : > { %2966 = vrot.lane.b32.xlu1 %v6518_v44, %s5361_s21  ;;  %3493 = vmatprep.mubr.bf16.mxu1 %v3215_v58  ;;  %v2455_v49 = vmul.f32 %v5244_v24, %v7988_v7  ;;  %v1011_v58 = vrot.slane %v1009_v10, 1  ;;  %v7990_v7 = vld [vmem:[#allocation16_spill] sm:$0xff] }
 0x1d8   : > { %1174 = vrot.lane.b32.xlu0 %v6383_v5, %s5363_s28  ;;  %3494 = vmatmul.mubr.bf16.vlgmr.msra.gmra.mrb[32].mxu1 %v3087_v18  ;;  %v1007_v18 = vor.u32 %v1006_v4, %v1002_v40  ;;  %v2616_v4 = vshll.u32 %v6574_v50, 16 }
 0x1d9   : > { %v6560_v61 = vpop.permute.xlu1 %2334  ;;  %v6572_v6 = vpack.c.bf16 %v2456_v16, %v2455_v49  ;;  %v5225_v24 = vpop.eup %5224 }
 0x1da   : > { %v1327_v38 = vpop.permute.xlu0 %1326  ;;  %v6577_v26 = vsel %vm844_vm2, %v1007_v18, %v1011_v58 }
 0x1db   : > { %2998 = vrot.lane.b32.xlu1 %v6565_v55, %s7921_s24  ;;  %v2611_v19 = vshll.u32 %v6572_v6, 16 }
 0x1dc   : > { %2402 = vbcast.lane.b32.xlu0 %v2392_v32, 272 }
 0x1dd   : > { %v1263_v57 = vpop.permute.xlu1 %1262  ;;  %v2613_v34 = vrot.slane %v2611_v19, 1  ;;  %v6608_v19 = vadd.f32 1.0, %v5225_v24 }
 0x1de   : > { %v1231_v31 = vpop.permute.xlu0 %1230  ;;  %v1482_v42 = vsel %vm1344_vm0, %v6142_v1, %v1263_v57  ;;  %v1360_v1 = vsel %vm1344_vm0, %v7990_v7, %v1167_v3 }
 0x1df   : > { %2394 = vbcast.lane.b32.xlu1 %v2392_v32, 256 }
 0x1e0   : > { %1334 = vrot.lane.b32.xlu0 %v6577_v26, %s7921_s24 }
 0x1e1   : > { %v1295_v10 = vpop.permute.xlu1 %1294 }
 0x1e2   : > { %v1522_v36 = vsel %vm1377_vm3, %v1482_v42, %v1295_v10  ;;  %v2961_v16 = vpop.permute.xlu0 %2960  ;;  %v2618_v42 = vrot.slane %v2616_v4, 1  ;;  %v2609_v10 = vshrl.u32 %v6572_v6, 16  ;;  %v2767_v4 = vrot.slane %v6523_v37, 1 }
 0x1e3   : > { %1270 = vrot.lane.b32.xlu1 %v7989_v28, %s5363_s28  ;;  %v1561_v32 = vsel %vm1410_vm4, %v1522_v36, %v1327_v38  ;;  %v2766_v37 = vrot.slane %v6518_v44, 1 }
 0x1e4   : > { %1238 = vrot.lane.b32.xlu0 %v5989_v51, %s7921_s24  ;;  %1874 = vmatprep.mubr.bf16.mxu0 %v1561_v32  ;;  %v2614_v7 = vor.u32 %v2613_v34, %v2609_v10  ;;  %v7995_v34 = vld [vmem:[#allocation9_spill] sm:$0xff] }
 0x1e5   : > { %v1199_v49 = vpop.permute.xlu1 %1198  ;;  %v6593_v58 = vpop.f32.mrb[12].mxu1 }
 0x1e6   : > { %7991 = vst [vmem:[#allocation13_spill] sm:$0xff] %v6593_v58  ;;  %v1393_v40 = vsel %vm1377_vm3, %v1360_v1, %v1199_v49  ;;  %v2993_v57 = vpop.permute.xlu0 %2992  ;;  %v6596_v18 = vpop.f32.mrb[13].mxu1  ;;  %v6618_v49 = vsel %vm844_vm2, %v2614_v7, %v2618_v42 }
 0x1e7   : > { %7992 = vst [vmem:[#allocation17_spill] sm:$0xff] %v6596_v18  ;;  %1302 = vrot.lane.b32.xlu1 %v7985_v25, %s5361_s21  ;;  %v1433_v38 = vsel %vm1410_vm4, %v1393_v40, %v1231_v31  ;;  %v6602_v36 = vpop.f32.mrb[14].mxu1 }
 0x1e8   : > { %7993 = vst [vmem:[#allocation28_spill] sm:$0xff] %v6602_v36  ;;  %2968 = vrot.lane.b32.xlu0 %v6572_v6, %s5361_s21  ;;  %1875 = vmatmul.mubr.bf16.gmra.mrb[28].mxu0 %v1433_v38  ;;  %v6606_v3 = vpop.f32.mrb[15].mxu1 }
 0x1e9   : > { %7994 = vst [vmem:[#allocation29_spill] sm:$0xff] %v6606_v3  ;;  %v2929_v32 = vpop.permute.xlu1 %2928  ;;  %v5247_v3 = vld [vmem:[%s5582_s17 + $0xc8] sm:$0xff] }
 0x1ea   : > { %v3139_v1 = vsel %vm1344_vm0, %v6175_v47, %v2929_v32  ;;  %v6613_v31 = vpop.permute.xlu0 %2349  ;;  %v2407_v47 = vrot.slane %v6608_v19, %v7995_v34  ;;  %v7997_v32 = vld [vmem:[#allocation31_spill] sm:$0xff] }
 0x1eb   : > { %1206 = vrot.lane.b32.xlu1 %v7970_v29, %s5361_s21  ;;  %v3185_v40 = vsel %vm1377_vm3, %v3139_v1, %v2961_v16  ;;  %v6628_v29 = vsel %vm1069_vm1, %v2766_v37, %v2767_v4 }
 0x1ec   : > { %3000 = vrot.lane.b32.xlu0 %v6618_v49, %s7921_s24  ;;  %v3218_v24 = vsel %vm1410_vm4, %v3185_v40, %v2993_v57  ;;  %7996 = vst [vmem:[#allocation30_spill] sm:$0xff] %v6628_v29 }
 0x1ed   : > { %v2833_v38 = vpop.permute.xlu1 %2832  ;;  %3501 = vmatprep.mubr.bf16.mxu1 %v3218_v24  ;;  %v5200_v24 = vld [vmem:[%s7876_s6 + $0x80] sm:$0xff]  }
 0x1ee   : > { %v1265_v10 = vpop.permute.xlu0 %1264  ;;  %v3025_v57 = vsel %vm1344_vm0, %v5874_v48, %v2833_v38  ;;  %5061 = vmatprep.subr.bf16.mxu0 %v5200_v24  ;;  %5097 = vmatprep.subr.bf16.mxu1 %v5200_v24  ;;  %v2770_v38 = vrot.slane %v6574_v50, 1  ;;  %v1021_v50 = vshll.u32 %v6263_v21, 16  ;;  %v2459_v21 = vmul.f32 %v5247_v3, %v6308_v9 }
 0x1ef   : > { %2936 = vrot.lane.b32.xlu1 %v6628_v29, %s5363_s28  ;;  %5062 = vmatpush3.bf16.msra.mxu0 %v5200_v24 }
 0x1f0   : > { %2409 = vbcast.lane.b32.xlu0 %v2407_v47, 256  ;;  %5099 = vmatpush3.bf16.msra.mxu1 %v5200_v24 }
 0x1f1   : > { %v2865_v16 = vpop.permute.xlu1 %2864 }
 0x1f2   : > { %v1297_v42 = vpop.permute.xlu0 %1296  ;;  %v3057_v7 = vsel %vm1377_vm3, %v3025_v57, %v2865_v16  ;;  %v2769_v57 = vrot.slane %v6572_v6, 1 }
 0x1f3   : > { %2840 = vrot.lane.b32.xlu1 %v6431_v12, %s5363_s28 }
 0x1f4   : > { %1272 = vrot.lane.b32.xlu0 %v7997_v32, %s5363_s28 }
 0x1f5   : > { %v2897_v1 = vpop.permute.xlu1 %2896 }
 0x1f6   : > { %v1201_v4 = vpop.permute.xlu0 %1200  ;;  %v3090_v40 = vsel %vm1410_vm4, %v3057_v7, %v2897_v1  ;;  %v1016_v1 = vshll.u32 %v6276_v56, 16 }
 0x1f7   : > { %2872 = vrot.lane.b32.xlu1 %v6483_v0, %s5361_s21  ;;  %3502 = vmatmul.mubr.bf16.gmra.mrb[36].mxu1 %v3090_v40  ;;  %v6657_v40 = vsel %vm1069_vm1, %v2769_v57, %v2770_v38  ;;  %v5246_v38 = vld [vmem:[%s5582_s17 + $0xc0] sm:$0xff] }
 0x1f8   : > { %1304 = vrot.lane.b32.xlu0 %v6276_v56, %s5361_s21  ;;  %7998 = vst [vmem:[#allocation26_spill] sm:$0xff] %v6657_v40  ;;  %v1018_v36 = vrot.slane %v1016_v1, 1  ;;  %v2458_v57 = vmul.f32 %v5246_v38, %v6257_v59  ;;  %v1014_v1 = vshrl.u32 %v6276_v56, 16 }
 0x1f9   : > { %v6647_v48 = vpop.permute.xlu1 %2353 }
 0x1fa   : > { %v2931_v37 = vpop.permute.xlu0 %2930  ;;  %v6689_v38 = vpack.c.bf16 %v2459_v21, %v2458_v57 }
 0x1fb   : > { %2904 = vrot.lane.b32.xlu1 %v6518_v44, %s7921_s24  ;;  %v5248_v44 = vld [vmem:[%s5582_s17 + $0xd0] sm:$0x3] }
 0x1fc   : > { %1208 = vrot.lane.b32.xlu0 %v7989_v28, %s5361_s21  ;;  %v2460_v59 = vmul.f32 %v5248_v44, %v6338_v15  ;;  %8003 = vst [vmem:[#allocation46_spill] sm:$0xff] %v6689_v38  ;;  %v8004_v44 = vld [vmem:[#allocation10_spill] sm:$0xff] }
 0x1fd   : > { %v1169_v16 = vpop.permute.xlu1 %1168 }
 0x1fe   : > { %v2835_v7 = vpop.permute.xlu0 %2834  ;;  %v1362_v9 = vsel %vm1344_vm0, %v5841_v43, %v1169_v16  ;;  %v3142_v16 = vsel %vm1344_vm0, %v6227_v63, %v2931_v37  ;;  %v1033_v63 = vshll.u32 %v6304_v20, 16  ;;  %v5249_v37 = vld [vmem:[%s5582_s17 + $0xe0] sm:$0xff] }
 0x1ff   : > { %2413 = vbcast.lane.b32.xlu1 %v2407_v47, 264  ;;  %v3027_v21 = vsel %vm1344_vm0, %v5863_v53, %v2835_v7  ;;  %v5250_v53 = vld [vmem:[%s5582_s17 + $0xd8] sm:$0xff] }
 0x200   : > { %2938 = vrot.lane.b32.xlu0 %v6657_v40, %s5363_s28  ;;  %v2461_v7 = vmul.f32 %v5250_v53, %v6409_v23  ;;  %v1035_v23 = vrot.slane %v1033_v63, 1 }
 0x201   : > { %v6662_v24 = vpop.f32.mrb[16].mxu1  ;;  %v6664_v28 = vpop.permute.xlu1 %2357 }
 0x202   : > { %7999 = vst [vmem:[#allocation27_spill] sm:$0xff] %v6662_v24  ;;  %v6666_v34 = vpop.f32.mrb[17].mxu1  ;;  %v2867_v0 = vpop.permute.xlu0 %2866  ;;  %v1485_v24 = vsel %vm1344_vm0, %v6190_v39, %v1265_v10  ;;  %v1019_v10 = vor.u32 %v1018_v36, %v1014_v1  ;;  %v2422_v36 = vrot.slane %v6608_v19, %v8004_v44 }
 0x203   : > { %8000 = vst [vmem:[#allocation16_spill] sm:$0xff] %v6666_v34  ;;  %v6668_v58 = vpop.f32.mrb[18].mxu1  ;;  %1176 = vrot.lane.b32.xlu1 %v6528_v41, %s5363_s28  ;;  %v1524_v34 = vsel %vm1377_vm3, %v1485_v24, %v1297_v42  ;;  %v1395_v42 = vsel %vm1377_vm3, %v1362_v9, %v1201_v4  ;;  %v6694_v24 = vpack.c.bf16 %v2460_v59, %v2460_v59  ;;  %v1028_v59 = vshll.u32 %v6300_v27, 16 }
 0x204   : > { %8001 = vst [vmem:[#allocation31_spill] sm:$0xff] %v6668_v58  ;;  %v6678_v18 = vpop.f32.mrb[19].mxu1  ;;  %2842 = vrot.lane.b32.xlu0 %v6565_v55, %s5363_s28  ;;  %v1023_v58 = vrot.slane %v1021_v50, 1 }
 0x205   : > { %8002 = vst [vmem:[#allocation45_spill] sm:$0xff] %v6678_v18  ;;  %v1329_v45 = vpop.permute.xlu1 %1328  ;;  %v2628_v4 = vshll.u32 %v6694_v24, 16  ;;  %v1030_v20 = vrot.slane %v1028_v59, 1 }
 0x206   : > { %v2899_v3 = vpop.permute.xlu0 %2898  ;;  %v1564_v39 = vsel %vm1410_vm4, %v1524_v34, %v1329_v45  ;;  %v6699_v43 = vsel %vm844_vm2, %v1019_v10, %v1023_v58  ;;  %v2623_v34 = vshll.u32 %v6689_v38, 16 }
 0x207   : > { %2417 = vbcast.lane.b32.xlu1 %v2407_v47, 272  ;;  %1882 = vmatprep.mubr.bf16.mxu0 %v1564_v39  ;;  %v2630_v9 = vrot.slane %v2628_v4, 1  ;;  %v3059_v39 = vsel %vm1377_vm3, %v3027_v21, %v2867_v0 }
 0x208   : > { %2874 = vrot.lane.b32.xlu0 %v6628_v29, %s5361_s21  ;;  %v2625_v57 = vrot.slane %v2623_v34, 1  ;;  %v3093_v0 = vsel %vm1410_vm4, %v3059_v39, %v2899_v3  ;;  %v1026_v3 = vshrl.u32 %v6300_v27, 16  ;;  %v8020_v29 = vld [vmem:[#allocation11_spill] sm:$0xff] }
 0x209   : > { %v1233_v50 = vpop.permute.xlu1 %1232 }
 0x20a   : > { %v6696_v15 = vpop.permute.xlu0 %2368  ;;  %v1436_v45 = vsel %vm1410_vm4, %v1395_v42, %v1233_v50  ;;  %v2621_v42 = vshrl.u32 %v6689_v38, 16 }
 0x20b   : > { %1336 = vrot.lane.b32.xlu1 %v6699_v43, %s7921_s24  ;;  %1883 = vmatmul.mubr.bf16.gmra.mrb[32].mxu0 %v1436_v45  ;;  %v2462_v45 = vmul.f32 %v5249_v37, %v6365_v62 }
 0x20c   : > { %2906 = vrot.lane.b32.xlu0 %v6572_v6, %s7921_s24  ;;  %v2626_v44 = vor.u32 %v2625_v57, %v2621_v42 }
 0x20d   : > { %v2963_v47 = vpop.permute.xlu1 %2962  ;;  %v6738_v4 = vpack.c.bf16 %v2462_v45, %v2461_v7 }
 0x20e   : > { %v1171_v58 = vpop.permute.xlu0 %1170  ;;  %v3187_v19 = vsel %vm1377_vm3, %v3142_v16, %v2963_v47  ;;  %v6736_v62 = vsel %vm844_vm2, %v2626_v44, %v2630_v9  ;;  %v5251_v16 = vld [vmem:[%s5582_s17 + $0xe8] sm:$0x3] }
 0x20f   : > { %1240 = vrot.lane.b32.xlu1 %v7985_v25, %s7921_s24  ;;  %v2463_v21 = vmul.f32 %v5251_v16, %v6394_v22  ;;  %v2635_v9 = vshll.u32 %v6738_v4, 16  ;;  %v1364_v53 = vsel %vm1344_vm0, %v5895_v35, %v1171_v58 }
 0x210   : > { %2428 = vbcast.lane.b32.xlu0 %v2422_v36, 264 }
 0x211   : > { %v2995_v1 = vpop.permute.xlu1 %2994  ;;  %v6751_v39 = vpack.c.bf16 %v2463_v21, %v2463_v21  ;;  %v2637_v45 = vrot.slane %v2635_v9, 1 }
 0x212   : > { %v6719_v10 = vpop.permute.xlu0 %2372  ;;  %v3221_v50 = vsel %vm1410_vm4, %v3187_v19, %v2995_v1  ;;  %v1031_v19 = vor.u32 %v1030_v20, %v1026_v3 }
 0x213   : > { %2970 = vrot.lane.b32.xlu1 %v6689_v38, %s5361_s21  ;;  %3509 = vmatprep.mubr.bf16.mxu1 %v3221_v50  ;;  %v2640_v37 = vshll.u32 %v6751_v39, 16 }
 0x214   : > { %1178 = vrot.lane.b32.xlu0 %v6577_v26, %s5363_s28  ;;  %3510 = vmatmul.mubr.bf16.gmra.mrb[40].mxu1 %v3093_v0  ;;  %v6746_v59 = vsel %vm844_vm2, %v1031_v19, %v1035_v23  ;;  %v2633_v0 = vshrl.u32 %v6738_v4, 16 }
 0x215   : > { %v6733_v34 = vpop.permute.xlu1 %2364  ;;  %v2642_v3 = vrot.slane %v2640_v37, 1 }
 0x216   : > { %v1331_v47 = vpop.permute.xlu0 %1330  ;;  %v2638_v21 = vor.u32 %v2637_v45, %v2633_v0 }
 0x217   : > { %3002 = vrot.lane.b32.xlu1 %v6736_v62, %s7921_s24 }
 0x218   : > { %2432 = vbcast.lane.b32.xlu0 %v2422_v36, 272 }
 0x219   : > { %v1267_v57 = vpop.permute.xlu1 %1266 }
 0x21a   : > { %v1235_v1 = vpop.permute.xlu0 %1234  ;;  %v1488_v50 = vsel %vm1344_vm0, %v6327_v8, %v1267_v57  ;;  %v2773_v57 = vrot.slane %v6694_v24, 1 }
 0x21b   : > { %2424 = vbcast.lane.b32.xlu1 %v2422_v36, 256 }
 0x21c   : > { %1338 = vrot.lane.b32.xlu0 %v6746_v59, %s7921_s24 }
 0x21d   : > { %v1299_v42 = vpop.permute.xlu1 %1298 }
 0x21e   : > { %v1526_v22 = vsel %vm1377_vm3, %v1488_v50, %v1299_v42  ;;  %v2965_v63 = vpop.permute.xlu0 %2964  ;;  %v2772_v42 = vrot.slane %v6689_v38, 1 }
 0x21f   : > { %1274 = vrot.lane.b32.xlu1 %v6290_v60, %s5363_s28  ;;  %v1567_v36 = vsel %vm1410_vm4, %v1526_v22, %v1331_v47  ;;  %v1121_v22 = vshll.u32 %v6378_v46, 16 }
 0x220   : > { %1242 = vrot.lane.b32.xlu0 %v6276_v56, %s7921_s24  ;;  %1890 = vmatprep.mubr.bf16.mxu0 %v1567_v36  ;;  %v1126_v36 = vshll.u32 %v6389_v14, 16 }
 0x221   : > { %v6764_v8 = vpop.f32.mrb[20].mxu1  ;;  %v1203_v7 = vpop.permute.xlu1 %1202 }
 0x222   : > { %8005 = vst [vmem:[#allocation10_spill] sm:$0xff] %v6764_v8  ;;  %v1397_v44 = vsel %vm1377_vm3, %v1364_v53, %v1203_v7  ;;  %v6768_v20 = vpop.f32.mrb[21].mxu1  ;;  %v2997_v23 = vpop.permute.xlu0 %2996  ;;  %v5253_v53 = vld [vmem:[%s5582_s17 + $0xf8] sm:$0xff]  ;;  %v8009_v7 = vld [vmem:[#allocation38_spill] sm:$0xff]  ;;  %v8014_v8 = vld [vmem:[#allocation12_spill] sm:$0xff] }
 0x223   : > { %8006 = vst [vmem:[#allocation47_spill] sm:$0xff] %v6768_v20  ;;  %v6770_v47 = vpop.f32.mrb[22].mxu1  ;;  %1306 = vrot.lane.b32.xlu1 %v6300_v27, %s5361_s21  ;;  %v1439_v16 = vsel %vm1410_vm4, %v1397_v44, %v1235_v1  ;;  %v6787_v1 = vsel %vm844_vm2, %v2638_v21, %v2642_v3  ;;  %v2465_v0 = vmul.f32 %v5253_v53, %v8009_v7  ;;  %v5254_v21 = vld [vmem:[%s5582_s17 + $0x100] sm:$0x3]  ;;  %v5201_v53 = vld [vmem:[%s7876_s6 + $0x88] sm:$0xff]  }
 0x224   : > { %8007 = vst [vmem:[#allocation48_spill] sm:$0xff] %v6770_v47  ;;  %v6775_v35 = vpop.f32.mrb[23].mxu1  ;;  %2972 = vrot.lane.b32.xlu0 %v6738_v4, %s5361_s21  ;;  %1891 = vmatmul.mubr.bf16.gmra.mrb[36].mxu0 %v1439_v16  ;;  %v1128_v16 = vrot.slane %v1126_v36, 1 }
 0x225   : > { %8008 = vst [vmem:[#allocation49_spill] sm:$0xff] %v6775_v35  ;;  %v2933_v58 = vpop.permute.xlu1 %2932  ;;  %5063 = vmatprep.subr.bf16.mxu0 %v5201_v53  ;;  %5098 = vmatprep.subr.bf16.mxu1 %v5201_v53 }
 0x226   : > { %v3145_v19 = vsel %vm1344_vm0, %v6368_v52, %v2933_v58  ;;  %v6782_v9 = vpop.permute.xlu0 %2379  ;;  %v8010_v58 = vld [vmem:[#allocation41_spill] sm:$0xff]  ;;  %5064 = vmatpush3.bf16.msra.mxu0 %v5201_v53  ;;  %5100 = vmatpush3.bf16.msra.mxu1 %v5201_v53 }
 0x227   : > { %1210 = vrot.lane.b32.xlu1 %v7997_v32, %s5361_s21  ;;  %v3189_v50 = vsel %vm1377_vm3, %v3145_v19, %v2965_v63  ;;  %v6798_v32 = vsel %vm1069_vm1, %v2772_v42, %v2773_v57  ;;  %v5252_v63 = vld [vmem:[%s5582_s17 + $0xf0] sm:$0xff]  ;;  %v2466_v14 = vmul.f32 %v5254_v21, %v8010_v58  ;;  %v1119_v57 = vshrl.u32 %v6378_v46, 16 }
 0x228   : > { %3004 = vrot.lane.b32.xlu0 %v6787_v1, %s7921_s24  ;;  %v3224_v24 = vsel %vm1410_vm4, %v3189_v50, %v2997_v23  ;;  %v2464_v45 = vmul.f32 %v5252_v63, %v6423_v13  ;;  %v1123_v23 = vrot.slane %v1121_v22, 1  ;;  %v8011_v19 = vld [vmem:[#allocation18_spill] sm:$0xff] }
 0x229   : > { %v2837_v52 = vpop.permute.xlu1 %2836  ;;  %3517 = vmatprep.mubr.bf16.mxu1 %v3224_v24  ;;  %v6829_v7 = vpack.c.bf16 %v2466_v14, %v2466_v14 }
 0x22a   : > { %v6795_v37 = vpop.permute.xlu0 %1268  ;;  %v3029_v50 = vsel %vm1344_vm0, %v8011_v19, %v2837_v52  ;;  %v6820_v13 = vpack.c.bf16 %v2465_v0, %v2464_v45  ;;  %v1124_v22 = vor.u32 %v1123_v23, %v1119_v57  ;;  %v6839_v0 = vld [vmem:[%s7875_s5] ss:$0 sm:$0xff] }
 0x22b   : > { %2940 = vrot.lane.b32.xlu1 %v6798_v32, %s5363_s28  ;;  %v2652_v19 = vshll.u32 %v6829_v7, 16 }
 0x22c   : > { %1276 = vrot.lane.b32.xlu0 %v6320_v17, %s5363_s28  ;;  %v6834_v45 = vsel %vm844_vm2, %v1124_v22, %v1128_v16  ;;  %v2647_v14 = vshll.u32 %v6820_v13, 16 }
 0x22d   : > { %v2869_v44 = vpop.permute.xlu1 %2868  ;;  %v2654_v53 = vrot.slane %v2652_v19, 1  ;;  %v2776_v19 = vrot.slane %v6751_v39, 1  ;;  %v1491_v39 = vsel %vm1344_vm0, %v6383_v5, %v6795_v37 }
 0x22e   : > { %v6809_v3 = vpop.permute.xlu0 %1300  ;;  %v3061_v24 = vsel %vm1377_vm3, %v3029_v50, %v2869_v44 }
 0x22f   : > { %2844 = vrot.lane.b32.xlu1 %v6618_v49, %s5363_s28 }
 0x230   : > { %1308 = vrot.lane.b32.xlu0 %v6378_v46, %s5361_s21 }
 0x231   : > { %v2901_v42 = vpop.permute.xlu1 %2900 }
 0x232   : > { %v6823_v36 = vpop.permute.xlu0 %1204  ;;  %v3096_v63 = vsel %vm1410_vm4, %v3061_v24, %v2901_v42  ;;  %v8012_v42 = vld [vmem:[#allocation24_spill] sm:$0xff] }
 0x233   : > { %v4781_v52 = vpop.f32.mrb[0].mxu0  ;;  %2876 = vrot.lane.b32.xlu1 %v6657_v40, %s5361_s21  ;;  %3518 = vmatmul.mubr.bf16.gmra.mrb[44].mxu1 %v3096_v63 }
 0x234   : > { %v4782_v44 = vpop.f32.mrb[1].mxu0  ;;  %1340 = vrot.lane.b32.xlu0 %v6834_v45, %s7921_s24 }
 0x235   : > { %v4783_v23 = vadd.f32 %v4782_v44, %v4781_v52  ;;  %v6843_v21 = vpop.permute.xlu1 %2383  ;;  %v4784_v58 = vpop.f32.mrb[2].mxu0  ;;  %v2649_v44 = vrot.slane %v2647_v14, 1 }
 0x236   : > { %v4785_v16 = vpop.f32.mrb[3].mxu0  ;;  %v6846_v57 = vpop.permute.xlu0 %2934 }
 0x237   : > { %v1821_v50 = vadd.f32 %v4783_v23, %v6839_v0  ;;  %v4786_v24 = vadd.f32 %v4785_v16, %v4784_v58  ;;  %2908 = vrot.lane.b32.xlu1 %v6689_v38, %s7921_s24  ;;  %v2645_v58 = vshrl.u32 %v6820_v13, 16  ;;  %v5255_v38 = vld [vmem:[%s5582_s17 + $0x110] sm:$0xff] }
 0x238   : > { %1244 = vrot.lane.b32.xlu0 %v6300_v27, %s7921_s24  ;;  %v1143_v27 = vshll.u32 %v8020_v29, 16 }
 0x239   : > { %v6855_v22 = vadd.f32 %v8012_v42, %v1821_v50  ;;  %v1824_v63 = vadd.f32 %v4786_v24, %v6839_v0  ;;  %v1173_v52 = vpop.permute.xlu1 %1172  ;;  %v2650_v42 = vor.u32 %v2649_v44, %v2645_v58  ;;  %v1528_v44 = vsel %vm1377_vm3, %v1491_v39, %v6809_v3  ;;  %v8017_v58 = vld [vmem:[#allocation22_spill] sm:$0xff] }
 0x23a   : > { %v6858_v47 = vpop.permute.xlu0 %2838  ;;  %v2468_v3 = vmul.f32 %v5255_v38, %v6525_v33 }
 0x23b   : > { %8013 = vst [vmem:[#allocation38_spill] sm:$0xff] %v6855_v22  ;;  %v6861_v35 = vadd.f32 %v8014_v8, %v1824_v63  ;;  %v4787_v23 = vpop.f32.mrb[4].mxu0  ;;  %1180 = vrot.lane.b32.xlu1 %v6699_v43, %s5363_s28  ;;  %v2775_v63 = vrot.slane %v6738_v4, 1 }
 0x23c   : > { %v4788_v16 = vpop.f32.mrb[5].mxu0  ;;  %2974 = vrot.lane.b32.xlu0 %v6820_v13, %s5361_s21 }
 0x23d   : > { %8015 = vst [vmem:[#allocation41_spill] sm:$0xff] %v6861_v35  ;;  %v4789_v50 = vadd.f32 %v4788_v16, %v4787_v23  ;;  %v6868_v24 = vpop.permute.xlu1 %2387  ;;  %v4790_v14 = vpop.f32.mrb[6].mxu0  ;;  %v8016_v35 = vld [vmem:[#allocation14_spill] sm:$0xff]  ;;  %v6877_v23 = vsel %vm844_vm2, %v2650_v42, %v2654_v53  ;;  %v6893_v42 = vsel %vm1069_vm1, %v2775_v63, %v2776_v19  ;;  %v8022_v19 = vld [vmem:[#allocation21_spill] sm:$0xff] }
 0x23e   : > { %v4791_v22 = vpop.f32.mrb[7].mxu0  ;;  %v2871_v8 = vpop.permute.xlu0 %2870  ;;  %v1138_v20 = vshll.u32 %v8016_v35, 16  ;;  %v1136_v29 = vshrl.u32 %v8016_v35, 16 }
 0x23f   : > { %v1829_v18 = vadd.f32 %v4789_v50, %v6839_v0  ;;  %v4792_v40 = vadd.f32 %v4791_v22, %v4790_v14  ;;  %1212 = vrot.lane.b32.xlu1 %v6290_v60, %s5361_s21  ;;  %v8019_v50 = vld [vmem:[#allocation19_spill] sm:$0xff] }
 0x240   : > { %3006 = vrot.lane.b32.xlu0 %v6877_v23, %s7921_s24  ;;  %v1366_v53 = vsel %vm1344_vm0, %v8019_v50, %v1173_v52  ;;  %v1140_v37 = vrot.slane %v1138_v20, 1  ;;  %v1145_v50 = vrot.slane %v1143_v27, 1 }
 0x241   : > { %v6887_v16 = vadd.f32 %v8017_v58, %v1829_v18  ;;  %v1832_v22 = vadd.f32 %v4792_v40, %v6839_v0  ;;  %v1333_v60 = vpop.permute.xlu1 %1332  ;;  %v5256_v18 = vld [vmem:[%s5582_s17 + $0x108] sm:$0xff]  ;;  %v8021_v40 = vld [vmem:[#allocation20_spill] sm:$0xff] }
 0x242   : > { %v2903_v14 = vpop.permute.xlu0 %2902  ;;  %v1570_v5 = vsel %vm1410_vm4, %v1528_v44, %v1333_v60  ;;  %v2467_v39 = vmul.f32 %v5256_v18, %v6560_v61  ;;  %v1399_v61 = vsel %vm1377_vm3, %v1366_v53, %v6823_v36  ;;  %v1141_v60 = vor.u32 %v1140_v37, %v1136_v29  ;;  %v5257_v36 = vld [vmem:[%s5582_s17 + $0x118] sm:$0x3] }
 0x243   : > { %8018 = vst [vmem:[#allocation18_spill] sm:$0xff] %v6887_v16  ;;  %v6902_v58 = vadd.f32 %v8021_v40, %v1832_v22  ;;  %v4793_v16 = vpop.f32.mrb[8].mxu0  ;;  %2942 = vrot.lane.b32.xlu1 %v6893_v42, %s5363_s28  ;;  %1898 = vmatprep.mubr.bf16.mxu0 %v1570_v5  ;;  %v8023_v53 = vld [vmem:[#allocation23_spill] sm:$0xff] }
 0x244   : > { %v4794_v52 = vpop.f32.mrb[9].mxu0  ;;  %1278 = vrot.lane.b32.xlu0 %v8022_v19, %s5363_s28  ;;  %v6914_v5 = vpack.c.bf16 %v2468_v3, %v2467_v39  ;;  %v8025_v39 = vld [vmem:[#allocation39_spill] sm:$0xff]  ;;  %v1146_v29 = vsel %vm844_vm2, %v1141_v60, %v1145_v50 }
 0x245   : > { %v4795_v20 = vadd.f32 %v4794_v52, %v4793_v16  ;;  %v1237_v33 = vpop.permute.xlu1 %1236  ;;  %v4796_v38 = vpop.f32.mrb[10].mxu0  ;;  %v2469_v16 = vmul.f32 %v5257_v36, %v6548_v2  ;;  %v3148_v2 = vsel %vm1344_vm0, %v6431_v12, %v6846_v57 }
 0x246   : > { %v4797_v63 = vpop.f32.mrb[11].mxu0  ;;  %v6911_v44 = vpop.permute.xlu0 %2398  ;;  %v1442_v22 = vsel %vm1410_vm4, %v1399_v61, %v1237_v33  ;;  %v8027_v33 = vld [vmem:[#allocation35_spill] sm:$0xff] }
 0x247   : > { %v1837_v18 = vadd.f32 %v4795_v20, %v6839_v0  ;;  %v4798_v40 = vadd.f32 %v4797_v63, %v4796_v38  ;;  %2846 = vrot.lane.b32.xlu1 %v6736_v62, %s5363_s28  ;;  %1899 = vmatmul.mubr.bf16.gmra.mrb[40].mxu0 %v1442_v22  ;;  %v2511_v20 = vpack.c.bf16 %v2469_v16, %v2469_v16 }
 0x248   : > { %1310 = vrot.lane.b32.xlu0 %v8016_v35, %s5361_s21  ;;  %v2659_v35 = vshll.u32 %v6914_v5, 16  ;;  %v3031_v38 = vsel %vm1344_vm0, %v8027_v33, %v6858_v47  ;;  %v5258_v47 = vld [vmem:[%s5582_s17 + $0x120] sm:$0xff] }
 0x249   : > { %v6924_v52 = vadd.f32 %v8023_v53, %v1837_v18  ;;  %v1840_v27 = vadd.f32 %v4798_v40, %v6839_v0  ;;  %v2967_v37 = vpop.permute.xlu1 %2966  ;;  %v3063_v22 = vsel %vm1377_vm3, %v3031_v38, %v2871_v8  ;;  %v2664_v18 = vshll.u32 %v2511_v20, 16  ;;  %v5259_v40 = vld [vmem:[%s5582_s17 + $0x128] sm:$0xff] }
 0x24a   : > { %v6927_v3 = vpop.permute.xlu0 %1174  ;;  %v3191_v61 = vsel %vm1377_vm3, %v3148_v2, %v2967_v37  ;;  %v3099_v12 = vsel %vm1410_vm4, %v3063_v22, %v2903_v14  ;;  %v2661_v57 = vrot.slane %v2659_v35, 1  ;;  %v2470_v8 = vmul.f32 %v5258_v47, %v6613_v31 }
 0x24b   : > { %8024 = vst [vmem:[#allocation24_spill] sm:$0xff] %v6924_v52  ;;  %v6930_v19 = vadd.f32 %v8025_v39, %v1840_v27  ;;  %2878 = vrot.lane.b32.xlu1 %v6798_v32, %s5361_s21  ;;  %v2471_v36 = vmul.f32 %v5259_v40, %v6647_v48  ;;  %v2657_v53 = vshrl.u32 %v6914_v5, 16  ;;  %v2666_v39 = vrot.slane %v2664_v18, 1 }
 0x24c   : > { %1342 = vrot.lane.b32.xlu0 %v1146_v29, %s7921_s24  ;;  %v5260_v29 = vld [vmem:[%s5582_s17 + $0x130] sm:$0x3]  ;;  %v2779_v48 = vrot.slane %v6829_v7, 1  ;;  %v2781_v18 = vrot.slane %v6914_v5, 1  ;;  %v8028_v7 = vld [vmem:[#allocation15_spill] sm:$0xff] }
 0x24d   : > { %8026 = vst [vmem:[#allocation12_spill] sm:$0xff] %v6930_v19  ;;  %v2999_v63 = vpop.permute.xlu1 %2998  ;;  %v2472_v14 = vmul.f32 %v5260_v29, %v6664_v28  ;;  %v6967_v33 = vpack.c.bf16 %v2471_v36, %v2470_v8  ;;  %v2778_v8 = vrot.slane %v6820_v13, 1 }
 0x24e   : > { %v6945_v60 = vpop.permute.xlu0 %2402  ;;  %v3227_v50 = vsel %vm1410_vm4, %v3191_v61, %v2999_v63  ;;  %v2782_v63 = vrot.slane %v2511_v20, 1 }
 0x24f   : > { %2910 = vrot.lane.b32.xlu1 %v6738_v4, %s7921_s24  ;;  %3525 = vmatprep.mubr.bf16.mxu1 %v3227_v50 }
 0x250   : > { %1246 = vrot.lane.b32.xlu0 %v6378_v46, %s7921_s24  ;;  %3526 = vmatmul.mubr.bf16.gmra.mrb[48].mxu1 %v3099_v12  ;;  %v2662_v46 = vor.u32 %v2661_v57, %v2657_v53  ;;  %v2513_v12 = vpack.c.bf16 %v2472_v14, %v2472_v14  ;;  %v8030_v53 = vld [vmem:[#allocation37_spill] sm:$0xff]  ;;  %v6991_v14 = vsel %vm1069_vm1, %v2778_v8, %v2779_v48 }
 0x251   : > { %v6957_v16 = vpop.permute.xlu1 %2394  ;;  %v1368_v48 = vsel %vm1344_vm0, %v5957_v30, %v6927_v3  ;;  %v5263_v30 = vld [vmem:[%s5582_s17 + $0x148] sm:$0x3] }
 0x252   : > { %v4799_v27 = vpop.f32.mrb[12].mxu0  ;;  %v1335_v37 = vpop.permute.xlu0 %1334  ;;  %v6974_v57 = vsel %vm844_vm2, %v2662_v46, %v2666_v39  ;;  %v2676_v46 = vshll.u32 %v2513_v12, 16  ;;  %v2475_v3 = vmul.f32 %v5263_v30, %v6719_v10  ;;  %v5266_v30 = vld [vmem:[%s5582_s17 + $0x160] sm:$0x3] }
 0x253   : > { %v4800_v35 = vpop.f32.mrb[13].mxu0  ;;  %1182 = vrot.lane.b32.xlu1 %v6746_v59, %s5363_s28 }
 0x254   : > { %v4801_v2 = vadd.f32 %v4800_v35, %v4799_v27  ;;  %v4802_v31 = vpop.f32.mrb[14].mxu0  ;;  %2976 = vrot.lane.b32.xlu0 %v6914_v5, %s5361_s21  ;;  %v6994_v35 = vsel %vm1069_vm1, %v2781_v18, %v2782_v63  ;;  %v2515_v10 = vpack.c.bf16 %v2475_v3, %v2475_v3  ;;  %v2478_v3 = vmul.f32 %v5266_v30, %v6868_v24 }
 0x255   : > { %v1271_v38 = vpop.permute.xlu1 %1270  ;;  %v4803_v61 = vpop.f32.mrb[15].mxu0 }
 0x256   : > { %v1845_v22 = vadd.f32 %v4801_v2, %v6839_v0  ;;  %v4804_v28 = vadd.f32 %v4803_v61, %v4802_v31  ;;  %v1239_v50 = vpop.permute.xlu0 %1238  ;;  %v1494_v40 = vsel %vm1344_vm0, %v6528_v41, %v1271_v38  ;;  %v5261_v2 = vld [vmem:[%s5582_s17 + $0x140] sm:$0xff]  ;;  %v5262_v41 = vld [vmem:[%s5582_s17 + $0x138] sm:$0xff] }
 0x257   : > { %1214 = vrot.lane.b32.xlu1 %v6320_v17, %s5361_s21  ;;  %v2671_v17 = vshll.u32 %v6967_v33, 16  ;;  %v2474_v31 = vmul.f32 %v5261_v2, %v6696_v15  ;;  %v2473_v38 = vmul.f32 %v5262_v41, %v6733_v34  ;;  %v2678_v34 = vrot.slane %v2676_v46, 1 }
 0x258   : > { %v6977_v47 = vadd.f32 %v8028_v7, %v1845_v22  ;;  %v1848_v20 = vadd.f32 %v4804_v28, %v6839_v0  ;;  %3008 = vrot.lane.b32.xlu0 %v6974_v57, %s7921_s24  ;;  %v2669_v7 = vshrl.u32 %v6967_v33, 16 }
 0x259   : > { %v1303_v36 = vpop.permute.xlu1 %1302  ;;  %v2673_v22 = vrot.slane %v2671_v17, 1  ;;  %v7009_v18 = vpack.c.bf16 %v2474_v31, %v2473_v38  ;;  %v2785_v17 = vrot.slane %v2513_v12, 1  ;;  %v2784_v31 = vrot.slane %v6967_v33, 1 }
 0x25a   : > { %8029 = vst [vmem:[#allocation14_spill] sm:$0xff] %v6977_v47  ;;  %v6987_v27 = vadd.f32 %v8030_v53, %v1848_v20  ;;  %v1530_v39 = vsel %vm1377_vm3, %v1494_v40, %v1303_v36  ;;  %v2969_v29 = vpop.permute.xlu0 %2968  ;;  %v2688_v38 = vshll.u32 %v2515_v10, 16 }
 0x25b   : > { %2944 = vrot.lane.b32.xlu1 %v6991_v14, %s5363_s28  ;;  %v1573_v61 = vsel %vm1410_vm4, %v1530_v39, %v1335_v37  ;;  %v2674_v8 = vor.u32 %v2673_v22, %v2669_v7  ;;  %v2683_v39 = vshll.u32 %v7009_v18, 16  ;;  %v5264_v22 = vld [vmem:[%s5582_s17 + $0x150] sm:$0xff]  ;;  %v2681_v7 = vshrl.u32 %v7009_v18, 16 }
 0x25c   : > { %8031 = vst [vmem:[#allocation22_spill] sm:$0xff] %v6987_v27  ;;  %2946 = vrot.lane.b32.xlu0 %v6994_v35, %s5363_s28  ;;  %1906 = vmatprep.mubr.bf16.mxu0 %v1573_v61 }
 0x25d   : > { %v1207_v63 = vpop.permute.xlu1 %1206 }
 0x25e   : > { %v1401_v15 = vsel %vm1377_vm3, %v1368_v48, %v1207_v63  ;;  %v3001_v28 = vpop.permute.xlu0 %3000  ;;  %v7047_v48 = vsel %vm1069_vm1, %v2784_v31, %v2785_v17  ;;  %v2685_v63 = vrot.slane %v2683_v39, 1  ;;  %v2788_v39 = vrot.slane %v2515_v10, 1 }
 0x25f   : > { %2848 = vrot.lane.b32.xlu1 %v6787_v1, %s5363_s28  ;;  %v1445_v37 = vsel %vm1410_vm4, %v1401_v15, %v1239_v50  ;;  %v7026_v50 = vsel %vm844_vm2, %v2674_v8, %v2678_v34  ;;  %v2476_v15 = vmul.f32 %v5264_v22, %v6782_v9  ;;  %v2690_v8 = vrot.slane %v2688_v38, 1 }
 0x260   : > { %2978 = vrot.lane.b32.xlu0 %v6967_v33, %s5361_s21  ;;  %1907 = vmatmul.mubr.bf16.gmra.mrb[44].mxu0 %v1445_v37  ;;  %v2787_v38 = vrot.slane %v7009_v18, 1 }
 0x261   : > { %v2937_v20 = vpop.permute.xlu1 %2936 }
 0x262   : > { %v3151_v40 = vsel %vm1344_vm0, %v6565_v55, %v2937_v20  ;;  %v7021_v36 = vpop.permute.xlu0 %2409  ;;  %v7082_v30 = vsel %vm1069_vm1, %v2787_v38, %v2788_v39 }
 0x263   : > { %2880 = vrot.lane.b32.xlu1 %v6893_v42, %s5361_s21  ;;  %v3193_v53 = vsel %vm1377_vm3, %v3151_v40, %v2969_v29  ;;  %v2686_v40 = vor.u32 %v2685_v63, %v2681_v7 }
 0x264   : > { %v7030_v46 = vpop.f32.mrb[24].mxu1  ;;  %3010 = vrot.lane.b32.xlu0 %v7026_v50, %s7921_s24  ;;  %v3230_v55 = vsel %vm1410_vm4, %v3193_v53, %v3001_v28  ;;  %v5265_v28 = vld [vmem:[%s5582_s17 + $0x158] sm:$0xff] }
 0x265   : > { %v2841_v12 = vpop.permute.xlu1 %2840  ;;  %v7035_v2 = vpop.f32.mrb[25].mxu1  ;;  %3533 = vmatprep.mubr.bf16.mxu1 %v3230_v55  ;;  %v2477_v34 = vmul.f32 %v5265_v28, %v6843_v21  ;;  %v2517_v55 = vpack.c.bf16 %v2478_v3, %v2478_v3  ;;  %v5267_v3 = vld [vmem:[%s5582_s17 + $0x170] sm:$0xff] }
 0x266   : > { %v7038_v29 = vpop.f32.mrb[26].mxu1  ;;  %v7040_v41 = vpop.permute.xlu0 %1272  ;;  %v3033_v17 = vsel %vm1344_vm0, %v6370_v11, %v2841_v12  ;;  %v7074_v11 = vsel %vm844_vm2, %v2686_v40, %v2690_v8  ;;  %v2480_v8 = vmul.f32 %v5267_v3, %v6911_v44  ;;  %v5268_v40 = vld [vmem:[%s5582_s17 + $0x168] sm:$0xff] }
 0x267   : > { %v7042_v61 = vpop.f32.mrb[27].mxu1  ;;  %2912 = vrot.lane.b32.xlu1 %v6820_v13, %s7921_s24  ;;  %v7064_v9 = vpack.c.bf16 %v2477_v34, %v2476_v15  ;;  %v2700_v34 = vshll.u32 %v2517_v55, 16 }
 0x268   : > { %2948 = vrot.lane.b32.xlu0 %v7047_v48, %s5363_s28 }
 0x269   : > { %v2873_v37 = vpop.permute.xlu1 %2872  ;;  %v2695_v28 = vshll.u32 %v7064_v9, 16  ;;  %v2702_v3 = vrot.slane %v2700_v34, 1  ;;  %v2791_v34 = vrot.slane %v2517_v55, 1 }
 0x26a   : > { %v1305_v20 = vpop.permute.xlu0 %1304  ;;  %v3065_v21 = vsel %vm1377_vm3, %v3033_v17, %v2873_v37  ;;  %v2479_v17 = vmul.f32 %v5268_v40, %v6957_v16 }
 0x26b   : > { %2850 = vrot.lane.b32.xlu1 %v6877_v23, %s5363_s28  ;;  %v2697_v44 = vrot.slane %v2695_v28, 1 }
 0x26c   : > { %2980 = vrot.lane.b32.xlu0 %v7009_v18, %s5361_s21  ;;  %v7097_v16 = vpack.c.bf16 %v2480_v8, %v2479_v17  ;;  %v1497_v17 = vsel %vm1344_vm0, %v6577_v26, %v7040_v41 }
 0x26d   : > { %v2905_v53 = vpop.permute.xlu1 %2904  ;;  %v1532_v55 = vsel %vm1377_vm3, %v1497_v17, %v1305_v20 }
 0x26e   : > { %v7067_v24 = vpop.permute.xlu0 %1208  ;;  %v3102_v31 = vsel %vm1410_vm4, %v3065_v21, %v2905_v53  ;;  %v2707_v8 = vshll.u32 %v7097_v16, 16 }
 0x26f   : > { %v4805_v63 = vpop.f32.mrb[16].mxu0  ;;  %2882 = vrot.lane.b32.xlu1 %v6991_v14, %s5361_s21  ;;  %3534 = vmatmul.mubr.bf16.gmra.mrb[52].mxu1 %v3102_v31  ;;  %v8032_v31 = vld [vmem:[#allocation43_spill] sm:$0xff] }
 0x270   : > { %v4806_v12 = vpop.f32.mrb[17].mxu0  ;;  %3012 = vrot.lane.b32.xlu0 %v7074_v11, %s7921_s24  ;;  %v2709_v41 = vrot.slane %v2707_v8, 1 }
 0x271   : > { %v4807_v10 = vadd.f32 %v4806_v12, %v4805_v63  ;;  %v2414_v22 = vpop.permute.xlu1 %2413  ;;  %v4808_v15 = vpop.f32.mrb[18].mxu0 }
 0x272   : > { %v4809_v37 = vpop.f32.mrb[19].mxu0  ;;  %v7079_v7 = vpop.permute.xlu0 %2938 }
 0x273   : > { %v1853_v21 = vadd.f32 %v4807_v10, %v6839_v0  ;;  %v4810_v53 = vadd.f32 %v4809_v37, %v4808_v15  ;;  %2914 = vrot.lane.b32.xlu1 %v6914_v5, %s7921_s24  ;;  %v2693_v15 = vshrl.u32 %v7064_v9, 16  ;;  %v5269_v37 = vld [vmem:[%s5582_s17 + $0x178] sm:$0x3] }
 0x274   : > { %2950 = vrot.lane.b32.xlu0 %v7082_v30, %s5363_s28  ;;  %v2481_v40 = vmul.f32 %v5269_v37, %v6945_v60 }
 0x275   : > { %v7094_v63 = vadd.f32 %v8032_v31, %v1853_v21  ;;  %v1856_v39 = vadd.f32 %v4810_v53, %v6839_v0  ;;  %v1177_v38 = vpop.permute.xlu1 %1176  ;;  %v2698_v28 = vor.u32 %v2697_v44, %v2693_v15 }
 0x276   : > { %v2843_v12 = vpop.permute.xlu0 %2842  ;;  %v2519_v60 = vpack.c.bf16 %v2481_v40, %v2481_v40  ;;  %v1370_v44 = vsel %vm1344_vm0, %v5989_v51, %v1177_v38  ;;  %v5270_v40 = vld [vmem:[%s5582_s17 + $0x180] sm:$0xff]  ;;  %v5271_v38 = vld [vmem:[%s5582_s17 + $0x188] sm:$0xff] }
 0x277   : > { %8033 = vst [vmem:[#allocation19_spill] sm:$0xff] %v7094_v63  ;;  %v7100_v10 = vadd.f32 %v6510_v54, %v1856_v39  ;;  %2852 = vrot.lane.b32.xlu1 %v6974_v57, %s5363_s28  ;;  %v7112_v54 = vsel %vm844_vm2, %v2698_v28, %v2702_v3  ;;  %v2790_v39 = vrot.slane %v7064_v9, 1  ;;  %v2482_v51 = vmul.f32 %v5270_v40, %v7021_v36  ;;  %v5272_v63 = vld [vmem:[%s5582_s17 + $0x190] sm:$0x3] }
 0x278   : > { %2982 = vrot.lane.b32.xlu0 %v7064_v9, %s5361_s21  ;;  %v2712_v37 = vshll.u32 %v2519_v60, 16  ;;  %v2483_v28 = vmul.f32 %v5271_v38, %v2414_v22  ;;  %v2794_v40 = vrot.slane %v2519_v60, 1 }
 0x279   : > { %8034 = vst [vmem:[#allocation11_spill] sm:$0xff] %v7100_v10  ;;  %v2418_v21 = vpop.permute.xlu1 %2417  ;;  %v7128_v26 = vsel %vm1069_vm1, %v2790_v39, %v2791_v34  ;;  %v2705_v34 = vshrl.u32 %v7097_v16, 16 }
 0x27a   : > { %v2875_v53 = vpop.permute.xlu0 %2874  ;;  %v2714_v10 = vrot.slane %v2712_v37, 1  ;;  %v2484_v19 = vmul.f32 %v5272_v63, %v2418_v21  ;;  %v2793_v21 = vrot.slane %v7097_v16, 1 }
 0x27b   : > { %2884 = vrot.lane.b32.xlu1 %v6994_v35, %s5361_s21  ;;  %v2710_v36 = vor.u32 %v2709_v41, %v2705_v34  ;;  %v3154_v41 = vsel %vm1344_vm0, %v6618_v49, %v7079_v7  ;;  %v5273_v7 = vld [vmem:[%s5582_s17 + $0x1a8] sm:$0x3] }
 0x27c   : > { %3014 = vrot.lane.b32.xlu0 %v7112_v54, %s7921_s24  ;;  %v7156_v37 = vpack.c.bf16 %v2484_v19, %v2484_v19 }
 0x27d   : > { %v1337_v31 = vpop.permute.xlu1 %1336  ;;  %v7161_v63 = vsel %vm844_vm2, %v2710_v36, %v2714_v10  ;;  %v5274_v36 = vld [vmem:[%s5582_s17 + $0x1a0] sm:$0xff] }
 0x27e   : > { %v2907_v3 = vpop.permute.xlu0 %2906  ;;  %v1576_v15 = vsel %vm1410_vm4, %v1532_v55, %v1337_v31  ;;  %v1403_v31 = vsel %vm1377_vm3, %v1370_v44, %v7067_v24  ;;  %v7152_v24 = vpack.c.bf16 %v2483_v28, %v2482_v51  ;;  %v8035_v51 = vld [vmem:[#allocation25_spill] sm:$0xff]  ;;  %v2804_v49 = vshll.u32 %v7156_v37, 16 }
 0x27f   : > { %2916 = vrot.lane.b32.xlu1 %v6967_v33, %s7921_s24  ;;  %1914 = vmatprep.mubr.bf16.mxu0 %v1576_v15  ;;  %v3035_v19 = vsel %vm1344_vm0, %v8035_v51, %v2843_v12  ;;  %v7180_v12 = vsel %vm1069_vm1, %v2793_v21, %v2794_v40  ;;  %v2811_v52 = vrot.slane %v7156_v37, 1 }
 0x280   : > { %v7130_v20 = vpop.f32.mrb[28].mxu1  ;;  %2952 = vrot.lane.b32.xlu0 %v7128_v26, %s5363_s28  ;;  %v2799_v28 = vshll.u32 %v7152_v24, 16  ;;  %v3067_v10 = vsel %vm1377_vm3, %v3035_v19, %v2875_v53  ;;  %v5275_v19 = vld [vmem:[%s5582_s17 + $0x198] sm:$0xff]  ;;  %s4754_s17 = sld [smem:[#allocation2 + $0x7]] }
 0x281   : > { %v1241_v17 = vpop.permute.xlu1 %1240  ;;  %v7137_v55 = vpop.f32.mrb[29].mxu1 }
 0x282   : > { %v7142_v39 = vpop.f32.mrb[30].mxu1  ;;  %v2429_v8 = vpop.permute.xlu0 %2428  ;;  %v1448_v15 = vsel %vm1410_vm4, %v1403_v31, %v1241_v17  ;;  %v2801_v51 = vrot.slane %v2799_v28, 1 }
 0x283   : > { %v7146_v27 = vpop.f32.mrb[31].mxu1  ;;  %2854 = vrot.lane.b32.xlu1 %v7026_v50, %s5363_s28  ;;  %1915 = vmatmul.mubr.bf16.gmra.mrb[48].mxu0 %v1448_v15  ;;  %v3105_v15 = vsel %vm1410_vm4, %v3067_v10, %v2907_v3  ;;  %v2797_v3 = vshrl.u32 %v7152_v24, 16 }
 0x284   : > { %2984 = vrot.lane.b32.xlu0 %v7097_v16, %s5361_s21 }
 0x285   : > { %v2971_v22 = vpop.permute.xlu1 %2970 }
 0x286   : > { %v7154_v44 = vpop.permute.xlu0 %1178  ;;  %v3195_v60 = vsel %vm1377_vm3, %v3154_v41, %v2971_v22  ;;  %v2486_v22 = vmul.f32 %v5274_v36, %v2429_v8 }
 0x287   : > { %2886 = vrot.lane.b32.xlu1 %v7047_v48, %s5361_s21 }
 0x288   : > { %3016 = vrot.lane.b32.xlu0 %v7161_v63, %s7921_s24 }
 0x289   : > { %v3003_v38 = vpop.permute.xlu1 %3002 }
 0x28a   : > { %v2433_v17 = vpop.permute.xlu0 %2432  ;;  %v3233_v31 = vsel %vm1410_vm4, %v3195_v60, %v3003_v38 }
 0x28b   : > { %v2487_v34 = vmul.f32 %v5273_v7, %v2433_v17  ;;  %2918 = vrot.lane.b32.xlu1 %v7009_v18, %s7921_s24  ;;  %3541 = vmatprep.mubr.bf16.mxu1 %v3233_v31  ;;  %v2806_v7 = vrot.slane %v2804_v49, 1 }
 0x28c   : > { %2954 = vrot.lane.b32.xlu0 %v7180_v12, %s5363_s28  ;;  %3542 = vmatmul.mubr.bf16.gmra.mrb[56].mxu1 %v3105_v15  ;;  %v2802_v15 = vor.u32 %v2801_v51, %v2797_v3 }
 0x28d   : > { %v2523_v53 = vpack.c.bf16 %v2487_v34, %v2487_v34  ;;  %v2425_v41 = vpop.permute.xlu1 %2424 }
 0x28e   : > { %v2485_v60 = vmul.f32 %v5275_v19, %v2425_v41  ;;  %v4811_v38 = vpop.f32.mrb[20].mxu0  ;;  %v1339_v17 = vpop.permute.xlu0 %1338 }
 0x28f   : > { %v4812_v31 = vpop.f32.mrb[21].mxu0  ;;  %2856 = vrot.lane.b32.xlu1 %v7074_v11, %s5363_s28  ;;  %v2828_v40 = vrot.slane %v2523_v53, 1 }
 0x290   : > { %v2522_v8 = vpack.c.bf16 %v2486_v22, %v2485_v60  ;;  %v4813_v21 = vadd.f32 %v4812_v31, %v4811_v38  ;;  %v4814_v10 = vpop.f32.mrb[22].mxu0  ;;  %2986 = vrot.lane.b32.xlu0 %v7152_v24, %s5361_s21  ;;  %v7197_v22 = vsel %vm844_vm2, %v2802_v15, %v2806_v7  ;;  %v8036_v38 = vld [vmem:[#allocation42_spill] sm:$0xff]  ;;  %v8037_v7 = vld [vmem:[#allocation44_spill] sm:$0xff] }
 0x291   : > { %v1275_v34 = vpop.permute.xlu1 %1274  ;;  %v4815_v28 = vpop.f32.mrb[23].mxu0 }
 0x292   : > { %v2827_v36 = vrot.slane %v2522_v8, 1  ;;  %v1861_v41 = vadd.f32 %v4813_v21, %v6839_v0  ;;  %v4816_v49 = vadd.f32 %v4815_v28, %v4814_v10  ;;  %v1243_v19 = vpop.permute.xlu0 %1242  ;;  %v2816_v60 = vshll.u32 %v2522_v8, 16 }
 0x293   : > { %2888 = vrot.lane.b32.xlu1 %v7082_v30, %s5361_s21  ;;  %v1500_v37 = vsel %vm1344_vm0, %v6699_v43, %v1275_v34  ;;  %v2810_v21 = vrot.slane %v7152_v24, 1  ;;  %v1372_v43 = vsel %vm1344_vm0, %v7985_v25, %v7154_v44  ;;  %v2814_v34 = vshrl.u32 %v2522_v8, 16 }
 0x294   : > { %v7200_v31 = vadd.f32 %v8036_v38, %v1861_v41  ;;  %v1864_v47 = vadd.f32 %v4816_v49, %v6839_v0  ;;  %3018 = vrot.lane.b32.xlu0 %v7197_v22, %s7921_s24  ;;  %v7206_v51 = vsel %vm1069_vm1, %v2827_v36, %v2828_v40  ;;  %v2821_v41 = vshll.u32 %v2523_v53, 16 }
 0x295   : > { %v1307_v3 = vpop.permute.xlu1 %1306  ;;  %v7218_v49 = vsel %vm1069_vm1, %v2810_v21, %v2811_v52  ;;  %v2818_v36 = vrot.slane %v2816_v60, 1 }
 0x296   : > { %v7212_v10 = vadd.f32 %v8037_v7, %v1864_v47  ;;  %v1534_v28 = vsel %vm1377_vm3, %v1500_v37, %v1307_v3  ;;  %v2973_v15 = vpop.permute.xlu0 %2972  ;;  %v2823_v37 = vrot.slane %v2821_v41, 1 }
 0x297   : > { %2920 = vrot.lane.b32.xlu1 %v7064_v9, %s7921_s24  ;;  %v1579_v40 = vsel %vm1410_vm4, %v1534_v28, %v1339_v17  ;;  %v2819_v17 = vor.u32 %v2818_v36, %v2814_v34 }
 0x298   : > { %2956 = vrot.lane.b32.xlu0 %v7218_v49, %s5363_s28  ;;  %1922 = vmatprep.mubr.bf16.mxu0 %v1579_v40 }
 0x299   : > { %v1211_v47 = vpop.permute.xlu1 %1210  ;;  %v2824_v44 = vsel %vm844_vm2, %v2819_v17, %v2823_v37  ;;  %v8038_v17 = vld [vmem:[#allocation17_spill] sm:$0xff]  ;;  %vm4266_vm2 = vcmask 1045504  }
 0x29a   : > { %v1405_v53 = vsel %vm1377_vm3, %v1372_v43, %v1211_v47  ;;  %v3005_v38 = vpop.permute.xlu0 %3004 }
 0x29b   : > { %2858 = vrot.lane.b32.xlu1 %v7112_v54, %s5363_s28  ;;  %v1451_v52 = vsel %vm1410_vm4, %v1405_v53, %v1243_v19 }
 0x29c   : > { %2988 = vrot.lane.b32.xlu0 %v2522_v8, %s5361_s21  ;;  %1923 = vmatmul.mubr.bf16.gmra.mrb[52].mxu0 %v1451_v52 }
 0x29d   : > { %v2941_v60 = vpop.permute.xlu1 %2940 }
 0x29e   : > { %v3157_v3 = vsel %vm1344_vm0, %v6736_v62, %v2941_v60  ;;  %v1277_v25 = vpop.permute.xlu0 %1276 }
 0x29f   : > { %2890 = vrot.lane.b32.xlu1 %v7128_v26, %s5361_s21  ;;  %v3197_v21 = vsel %vm1377_vm3, %v3157_v3, %v2973_v15  ;;  %v1503_v36 = vsel %vm1344_vm0, %v6746_v59, %v1277_v25 }
 0x2a0   : > { %3020 = vrot.lane.b32.xlu0 %v2824_v44, %s7921_s24  ;;  %v3236_v19 = vsel %vm1410_vm4, %v3197_v21, %v3005_v38  ;;  %v8039_v44 = vld [vmem:[#allocation29_spill] sm:$0xff] }
 0x2a1   : > { %v2845_v7 = vpop.permute.xlu1 %2844  ;;  %3549 = vmatprep.mubr.bf16.mxu1 %v3236_v19 }
 0x2a2   : > { %v4817_v8 = vpop.f32.mrb[24].mxu0  ;;  %v1309_v28 = vpop.permute.xlu0 %1308  ;;  %v3037_v52 = vsel %vm1344_vm0, %v6572_v6, %v2845_v7 }
 0x2a3   : > { %v4818_v41 = vpop.f32.mrb[25].mxu0  ;;  %2922 = vrot.lane.b32.xlu1 %v7097_v16, %s7921_s24  ;;  %v1536_v15 = vsel %vm1377_vm3, %v1503_v36, %v1309_v28 }
 0x2a4   : > { %v4819_v62 = vadd.f32 %v4818_v41, %v4817_v8  ;;  %v4820_v40 = vpop.f32.mrb[26].mxu0 }
 0x2a5   : > { %v2877_v43 = vpop.permute.xlu1 %2876  ;;  %v4821_v47 = vpop.f32.mrb[27].mxu0 }
 0x2a6   : > { %v1869_v34 = vadd.f32 %v4819_v62, %v6839_v0  ;;  %v4822_v53 = vadd.f32 %v4821_v47, %v4820_v40  ;;  %v1341_v38 = vpop.permute.xlu0 %1340  ;;  %v3069_v3 = vsel %vm1377_vm3, %v3037_v52, %v2877_v43 }
 0x2a7   : > { %2860 = vrot.lane.b32.xlu1 %v7161_v63, %s5363_s28  ;;  %v1582_v37 = vsel %vm1410_vm4, %v1536_v15, %v1341_v38 }
 0x2a8   : > { %v7251_v60 = vadd.f32 %v8038_v17, %v1869_v34  ;;  %v1872_v59 = vadd.f32 %v4822_v53, %v6839_v0  ;;  %1930 = vmatprep.mubr.bf16.mxu0 %v1582_v37 }
 0x2a9   : > { %v2909_v25 = vpop.permute.xlu1 %2908 }
 0x2aa   : > { %v7256_v21 = vadd.f32 %v8039_v44, %v1872_v59  ;;  %v1245_v19 = vpop.permute.xlu0 %1244  ;;  %v3108_v8 = vsel %vm1410_vm4, %v3069_v3, %v2909_v25 }
 0x2ab   : > { %v4911_v28 = vpop.f32.mrb[32].mxu1  ;;  %2892 = vrot.lane.b32.xlu1 %v7180_v12, %s5361_s21  ;;  %3550 = vmatmul.mubr.bf16.gmra.mrb[60].mxu1 %v3108_v8 }
 0x2ac   : > { %v4912_v6 = vpop.f32.mrb[33].mxu1 }
 0x2ad   : > { %v7261_v7 = vadd.f32 %v4912_v6, %v4911_v28  ;;  %v1181_v41 = vpop.permute.xlu1 %1180  ;;  %v4914_v62 = vpop.f32.mrb[34].mxu1 }
 0x2ae   : > { %v4915_v40 = vpop.f32.mrb[35].mxu1  ;;  %v2975_v36 = vpop.permute.xlu0 %2974  ;;  %v1374_v47 = vsel %vm1344_vm0, %v6276_v56, %v1181_v41 }
 0x2af   : > { %v7263_v43 = vadd.f32 %v4915_v40, %v4914_v62  ;;  %2924 = vrot.lane.b32.xlu1 %v7152_v24, %s7921_s24  ;;  %s5364_s24 = smov 127  }
 0x2b1   : > { %v1213_v15 = vpop.permute.xlu1 %1212 }
 0x2b2   : > { %v1407_v34 = vsel %vm1377_vm3, %v1374_v47, %v1213_v15  ;;  %v3007_v53 = vpop.permute.xlu0 %3006  ;;  %v8040_v15 = vld [vmem:[#allocation46_spill] sm:$0xff] }
 0x2b3   : > { %v1454_v38 = vsel %vm1410_vm4, %v1407_v34, %v1245_v19 }
 0x2b4   : > { %1931 = vmatmul.mubr.bf16.gmra.mrb[56].mxu0 %v1454_v38 }
 0x2b5   : > { %v2943_v37 = vpop.permute.xlu1 %2942 }
 0x2b6   : > { %v3160_v52 = vsel %vm1344_vm0, %v6787_v1, %v2943_v37  ;;  %v1279_v17 = vpop.permute.xlu0 %1278 }
 0x2b7   : > { %v3199_v59 = vsel %vm1377_vm3, %v3160_v52, %v2975_v36  ;;  %v1506_v8 = vsel %vm1344_vm0, %v6834_v45, %v1279_v17 }
 0x2b8   : > { %v3239_v3 = vsel %vm1410_vm4, %v3199_v59, %v3007_v53  ;;  %v8041_v53 = vld [vmem:[#allocation13_spill] sm:$0xff] }
 0x2b9   : > { %v2847_v24 = vpop.permute.xlu1 %2846  ;;  %3557 = vmatprep.mubr.bf16.mxu1 %v3239_v3  ;;  %v8042_v3 = vld [vmem:[#allocation28_spill] sm:$0xff] }
 0x2ba   : > { %v1311_v25 = vpop.permute.xlu0 %1310  ;;  %v3039_v34 = vsel %vm1344_vm0, %v8040_v15, %v2847_v24 }
 0x2bb   : > { %v4823_v56 = vpop.f32.mrb[28].mxu0  ;;  %v1538_v41 = vsel %vm1377_vm3, %v1506_v8, %v1311_v25  ;;  %v8043_v8 = vld [vmem:[#allocation34_spill] sm:$0xff] }
 0x2bc   : > { %v4824_v44 = vpop.f32.mrb[29].mxu0 }
 0x2bd   : > { %v4825_v28 = vadd.f32 %v4824_v44, %v4823_v56  ;;  %v2879_v19 = vpop.permute.xlu1 %2878  ;;  %v4826_v6 = vpop.f32.mrb[30].mxu0 }
 0x2be   : > { %v4827_v62 = vpop.f32.mrb[31].mxu0  ;;  %v1343_v1 = vpop.permute.xlu0 %1342  ;;  %v3071_v45 = vsel %vm1377_vm3, %v3039_v34, %v2879_v19  ;;  %v8044_v34 = vld [vmem:[#allocation32_spill] sm:$0xff] }
 0x2bf   : > { %v1877_v40 = vadd.f32 %v4825_v28, %v6839_v0  ;;  %v4828_v36 = vadd.f32 %v4827_v62, %v4826_v6  ;;  %v1585_v47 = vsel %vm1410_vm4, %v1538_v41, %v1343_v1 }
 0x2c0   : > { %1938 = vmatprep.mubr.bf16.mxu0 %v1585_v47 }
 0x2c1   : > { %v7283_v38 = vadd.f32 %v8041_v53, %v1877_v40  ;;  %v1880_v37 = vadd.f32 %v4828_v36, %v6839_v0  ;;  %v2911_v52 = vpop.permute.xlu1 %2910 }
 0x2c2   : > { %v1247_v17 = vpop.permute.xlu0 %1246  ;;  %v3111_v59 = vsel %vm1410_vm4, %v3071_v45, %v2911_v52 }
 0x2c3   : > { %v7289_v25 = vadd.f32 %v8042_v3, %v1880_v37  ;;  %3558 = vmatmul.mubr.bf16.gmra.mrb[64].mxu1 %v3111_v59 }
 0x2c5   : > { %v1183_v56 = vpop.permute.xlu1 %1182 }
 0x2c6   : > { %v2977_v44 = vpop.permute.xlu0 %2976  ;;  %v1376_v24 = vsel %vm1344_vm0, %v8043_v8, %v1183_v56  ;;  %v8045_v56 = vld [vmem:[#allocation33_spill] sm:$0xff] }
 0x2c9   : > { %v1215_v28 = vpop.permute.xlu1 %1214 }
 0x2ca   : > { %v1409_v6 = vsel %vm1377_vm3, %v1376_v24, %v1215_v28  ;;  %v4917_v41 = vpop.f32.mrb[36].mxu1  ;;  %v3009_v19 = vpop.permute.xlu0 %3008  ;;  %v8046_v24 = vld [vmem:[#allocation36_spill] sm:$0xff] }
 0x2cb   : > { %v4918_v62 = vpop.f32.mrb[37].mxu1  ;;  %v1457_v1 = vsel %vm1410_vm4, %v1409_v6, %v1247_v17 }
 0x2cc   : > { %v7295_v40 = vadd.f32 %v4918_v62, %v4917_v41  ;;  %1939 = vmatmul.mubr.bf16.gmra.mrb[60].mxu0 %v1457_v1  ;;  %v4920_v36 = vpop.f32.mrb[38].mxu1 }
 0x2cd   : > { %v2945_v47 = vpop.permute.xlu1 %2944  ;;  %v4921_v15 = vpop.f32.mrb[39].mxu1  ;;  %5065 = vmatprep.mubr.msk.bf16.mxu0 %vm1344_vm0, %v8044_v34 }
 0x2ce   : > { %v3163_v53 = vsel %vm1344_vm0, %v6877_v23, %v2945_v47  ;;  %v7301_v45 = vadd.f32 %v4921_v15, %v4920_v36  ;;  %v2947_v37 = vpop.permute.xlu0 %2946  ;;  %v8047_v47 = vld [vmem:[#allocation40_spill] sm:$0xff] }
 0x2cf   : > { %v3201_v52 = vsel %vm1377_vm3, %v3163_v53, %v2977_v44  ;;  %v3166_v6 = vsel %vm1344_vm0, %v6974_v57, %v2947_v37 }
 0x2d0   : > { %v3242_v59 = vsel %vm1410_vm4, %v3201_v52, %v3009_v19 }
 0x2d1   : > { %v2849_v17 = vpop.permute.xlu1 %2848  ;;  %3565 = vmatprep.mubr.bf16.mxu1 %v3242_v59 }
 0x2d2   : > { %v2979_v3 = vpop.permute.xlu0 %2978  ;;  %v3041_v23 = vsel %vm1344_vm0, %v6738_v4, %v2849_v17  ;;  %v8048_v4 = vld [vmem:[#allocation30_spill] sm:$0xff] }
 0x2d3   : > { %v3203_v19 = vsel %vm1377_vm3, %v3166_v6, %v2979_v3 }
 0x2d4   : > { %5066 = vmatmul.mubr.msk.bf16.vlgmr.msra.gmra.mrb[64].mxu0 %vm1344_vm0, %v8045_v56 }
 0x2d5   : > { %v2881_v8 = vpop.permute.xlu1 %2880  ;;  %5069 = vmatprep.mubr.msk.bf16.mxu0 %vm1344_vm0, %v8046_v24 }
 0x2d6   : > { %v3011_v28 = vpop.permute.xlu0 %3010  ;;  %v3073_v44 = vsel %vm1377_vm3, %v3041_v23, %v2881_v8 }
 0x2d7   : > { %v3245_v36 = vsel %vm1410_vm4, %v3203_v19, %v3011_v28  ;;  %v8049_v28 = vld [vmem:[#allocation16_spill] sm:$0xff] }
 0x2d9   : > { %v2913_v41 = vpop.permute.xlu1 %2912 }
 0x2da   : > { %v2949_v62 = vpop.permute.xlu0 %2948  ;;  %v3114_v1 = vsel %vm1410_vm4, %v3073_v44, %v2913_v41  ;;  %v8050_v44 = vld [vmem:[#allocation26_spill] sm:$0xff] }
 0x2db   : > { %3566 = vmatmul.mubr.bf16.gmra.mrb[68].mxu1 %v3114_v1  ;;  %v3169_v41 = vsel %vm1344_vm0, %v7026_v50, %v2949_v62 }
 0x2dc   : > { %3573 = vmatprep.mubr.bf16.mxu1 %v3245_v36  ;;  %5070 = vmatmul.mubr.msk.bf16.gmra.mrb[68].mxu0 %vm1344_vm0, %v8047_v47 }
 0x2dd   : > { %v2851_v15 = vpop.permute.xlu1 %2850  ;;  %5073 = vmatprep.mubr.msk.bf16.mxu0 %vm1344_vm0, %v8048_v4 }
 0x2de   : > { %v4829_v57 = vpop.f32.mrb[32].mxu0  ;;  %v2981_v34 = vpop.permute.xlu0 %2980  ;;  %v3043_v24 = vsel %vm1344_vm0, %v6820_v13, %v2851_v15  ;;  %v8051_v13 = vld [vmem:[#allocation45_spill] sm:$0xff] }
 0x2df   : > { %v4830_v53 = vpop.f32.mrb[33].mxu0  ;;  %v3205_v36 = vsel %vm1377_vm3, %v3169_v41, %v2981_v34 }
 0x2e0   : > { %v4831_v37 = vadd.f32 %v4830_v53, %v4829_v57  ;;  %v4832_v52 = vpop.f32.mrb[34].mxu0 }
 0x2e1   : > { %v2883_v59 = vpop.permute.xlu1 %2882  ;;  %v4833_v17 = vpop.f32.mrb[35].mxu0 }
 0x2e2   : > { %v1885_v3 = vadd.f32 %v4831_v37, %v6839_v0  ;;  %v4834_v56 = vadd.f32 %v4833_v17, %v4832_v52  ;;  %v3013_v8 = vpop.permute.xlu0 %3012  ;;  %v3075_v19 = vsel %vm1377_vm3, %v3043_v24, %v2883_v59 }
 0x2e3   : > { %v3248_v57 = vsel %vm1410_vm4, %v3205_v36, %v3013_v8 }
 0x2e4   : > { %v7325_v23 = vadd.f32 %v8049_v28, %v1885_v3  ;;  %v1888_v6 = vadd.f32 %v4834_v56, %v6839_v0  ;;  %5074 = vmatmul.mubr.msk.bf16.gmra.mrb[72].mxu0 %vm1344_vm0, %v8050_v44 }
 0x2e5   : > { %v2915_v1 = vpop.permute.xlu1 %2914  ;;  %5077 = vmatprep.mubr.msk.bf16.mxu0 %vm1344_vm0, %v6798_v32 }
 0x2e6   : > { %v7337_v47 = vadd.f32 %v8051_v13, %v1888_v6  ;;  %v2951_v15 = vpop.permute.xlu0 %2950  ;;  %v3117_v0 = vsel %vm1410_vm4, %v3075_v19, %v2915_v1 }
 0x2e7   : > { %v4923_v4 = vpop.f32.mrb[40].mxu1  ;;  %3574 = vmatmul.mubr.bf16.gmra.mrb[72].mxu1 %v3117_v0  ;;  %v3172_v56 = vsel %vm1344_vm0, %v7074_v11, %v2951_v15  ;;  %v7364_v0 = vld [vmem:[%s7875_s5] ss:$0 sm:$0xff] }
 0x2e8   : > { %v4924_v53 = vpop.f32.mrb[41].mxu1  ;;  %3581 = vmatprep.mubr.bf16.mxu1 %v3248_v57 }
 0x2e9   : > { %v7341_v50 = vadd.f32 %v4924_v53, %v4923_v4  ;;  %v2853_v62 = vpop.permute.xlu1 %2852  ;;  %v4926_v37 = vpop.f32.mrb[42].mxu1  ;;  %v8052_v53 = vld [vmem:[#allocation27_spill] sm:$0xff] }
 0x2ea   : > { %v4927_v52 = vpop.f32.mrb[43].mxu1  ;;  %v2983_v32 = vpop.permute.xlu0 %2982  ;;  %v3045_v3 = vsel %vm1344_vm0, %v6914_v5, %v2853_v62 }
 0x2eb   : > { %v7343_v59 = vadd.f32 %v4927_v52, %v4926_v37  ;;  %v3207_v28 = vsel %vm1377_vm3, %v3172_v56, %v2983_v32 }
 0x2ec   : > { %5078 = vmatmul.mubr.msk.bf16.gmra.mrb[76].mxu0 %vm1344_vm0, %v6893_v42 }
 0x2ed   : > { %v2885_v34 = vpop.permute.xlu1 %2884  ;;  %5081 = vmatprep.mubr.msk.bf16.mxu0 %vm1344_vm0, %v6991_v14 }
 0x2ee   : > { %v3015_v17 = vpop.permute.xlu0 %3014  ;;  %v3077_v8 = vsel %vm1377_vm3, %v3045_v3, %v2885_v34 }
 0x2ef   : > { %v3251_v42 = vsel %vm1410_vm4, %v3207_v28, %v3015_v17 }
 0x2f1   : > { %v2917_v24 = vpop.permute.xlu1 %2916 }
 0x2f2   : > { %v2953_v6 = vpop.permute.xlu0 %2952  ;;  %v3120_v44 = vsel %vm1410_vm4, %v3077_v8, %v2917_v24 }
 0x2f3   : > { %3582 = vmatmul.mubr.bf16.gmra.mrb[76].mxu1 %v3120_v44 }
 0x2f4   : > { %3589 = vmatprep.mubr.bf16.mxu1 %v3251_v42  ;;  %5082 = vmatmul.mubr.msk.bf16.gmra.mrb[80].mxu0 %vm1344_vm0, %v6994_v35 }
 0x2f5   : > { %v2855_v14 = vpop.permute.xlu1 %2854  ;;  %5085 = vmatprep.mubr.msk.bf16.mxu0 %vm1344_vm0, %v7047_v48  ;;  %v3175_v48 = vsel %vm1344_vm0, %v7112_v54, %v2953_v6 }
 0x2f6   : > { %v2985_v5 = vpop.permute.xlu0 %2984  ;;  %v3047_v57 = vsel %vm1344_vm0, %v6967_v33, %v2855_v14 }
 0x2f7   : > { %v4835_v11 = vpop.f32.mrb[36].mxu0  ;;  %v3209_v34 = vsel %vm1377_vm3, %v3175_v48, %v2985_v5 }
 0x2f8   : > { %v4836_v41 = vpop.f32.mrb[37].mxu0 }
 0x2f9   : > { %v4837_v19 = vadd.f32 %v4836_v41, %v4835_v11  ;;  %v2887_v1 = vpop.permute.xlu1 %2886  ;;  %v4838_v36 = vpop.f32.mrb[38].mxu0 }
 0x2fa   : > { %v4839_v13 = vpop.f32.mrb[39].mxu0  ;;  %v3017_v15 = vpop.permute.xlu0 %3016  ;;  %v3079_v37 = vsel %vm1377_vm3, %v3047_v57, %v2887_v1 }
 0x2fb   : > { %v1893_v4 = vadd.f32 %v7364_v0, %v4837_v19  ;;  %v4840_v35 = vadd.f32 %v4839_v13, %v4838_v36  ;;  %v3254_v54 = vsel %vm1410_vm4, %v3209_v34, %v3017_v15 }
 0x2fc   : > { %5086 = vmatmul.mubr.msk.bf16.gmra.mrb[84].mxu0 %vm1344_vm0, %v7082_v30  ;;  %v8053_v30 = vld [vmem:[#allocation31_spill] sm:$0xff] }
 0x2fd   : > { %v7374_v62 = vadd.f32 %v8052_v53, %v1893_v4  ;;  %v1896_v52 = vadd.f32 %v7364_v0, %v4840_v35  ;;  %v2919_v32 = vpop.permute.xlu1 %2918  ;;  %5089 = vmatprep.mubr.msk.bf16.mxu0 %vm1344_vm0, %v7128_v26 }
 0x2fe   : > { %v2955_v33 = vpop.permute.xlu0 %2954  ;;  %v3123_v17 = vsel %vm1410_vm4, %v3079_v37, %v2919_v32 }
 0x2ff   : > { %v7383_v3 = vadd.f32 %v8053_v30, %v1896_v52  ;;  %3590 = vmatmul.mubr.bf16.gmra.mrb[80].mxu1 %v3123_v17  ;;  %v3178_v5 = vsel %vm1344_vm0, %v7161_v63, %v2955_v33 }
 0x300   : > { %3597 = vmatprep.mubr.bf16.mxu1 %v3254_v54 }
 0x301   : > { %v2857_v56 = vpop.permute.xlu1 %2856 }
 0x302   : > { %v2987_v8 = vpop.permute.xlu0 %2986  ;;  %v3049_v44 = vsel %vm1344_vm0, %v7009_v18, %v2857_v56 }
 0x303   : > { %v3211_v1 = vsel %vm1377_vm3, %v3178_v5, %v2987_v8 }
 0x304   : > { %5090 = vmatmul.mubr.msk.bf16.gmra.mrb[88].mxu0 %vm1344_vm0, %v7180_v12 }
 0x305   : > { %v2889_v24 = vpop.permute.xlu1 %2888 }
 0x306   : > { %v4929_v28 = vpop.f32.mrb[44].mxu1  ;;  %v3019_v26 = vpop.permute.xlu0 %3018  ;;  %v3081_v11 = vsel %vm1377_vm3, %v3049_v44, %v2889_v24 }
 0x307   : > { %v4930_v6 = vpop.f32.mrb[45].mxu1  ;;  %v3257_v18 = vsel %vm1410_vm4, %v3211_v1, %v3019_v26  ;;  %v8054_v26 = vld [vmem:[#allocation47_spill] sm:$0xff] }
 0x308   : > { %v7390_v42 = vadd.f32 %v4930_v6, %v4929_v28  ;;  %v4932_v14 = vpop.f32.mrb[46].mxu1 }
 0x309   : > { %v4933_v41 = vpop.f32.mrb[47].mxu1  ;;  %v2921_v19 = vpop.permute.xlu1 %2920 }
 0x30a   : > { %v7396_v12 = vadd.f32 %v4933_v41, %v4932_v14  ;;  %v2957_v36 = vpop.permute.xlu0 %2956  ;;  %v3126_v13 = vsel %vm1410_vm4, %v3081_v11, %v2921_v19  ;;  %v8055_v11 = vld [vmem:[#allocation49_spill] sm:$0xff] }
 0x30b   : > { %3598 = vmatmul.mubr.bf16.gmra.mrb[84].mxu1 %v3126_v13  ;;  %v3181_v48 = vsel %vm1344_vm0, %v7197_v22, %v2957_v36 }
 0x30c   : > { %3605 = vmatprep.mubr.bf16.mxu1 %v3257_v18 }
 0x30d   : > { %v2859_v15 = vpop.permute.xlu1 %2858 }
 0x30e   : > { %v2989_v4 = vpop.permute.xlu0 %2988  ;;  %v3051_v63 = vsel %vm1344_vm0, %v7064_v9, %v2859_v15 }
 0x30f   : > { %v3213_v52 = vsel %vm1377_vm3, %v3181_v48, %v2989_v4 }
 0x311   : > { %v2891_v35 = vpop.permute.xlu1 %2890 }
 0x312   : > { %v3021_v57 = vpop.permute.xlu0 %3020  ;;  %v3083_v53 = vsel %vm1377_vm3, %v3051_v63, %v2891_v35 }
 0x313   : > { %v3260_v34 = vsel %vm1410_vm4, %v3213_v52, %v3021_v57  ;;  %v8056_v52 = vld [vmem:[#allocation10_spill] sm:$0xff] }
 0x315   : > { %v2923_v37 = vpop.permute.xlu1 %2922 }
 0x316   : > { %v3129_v32 = vsel %vm1410_vm4, %v3083_v53, %v2923_v37 }
 0x317   : > { %3606 = vmatmul.mubr.bf16.gmra.mrb[88].mxu1 %v3129_v32 }
 0x318   : > { %3613 = vmatprep.mubr.bf16.mxu1 %v3260_v34  ;;  %v8057_v34 = vld [vmem:[#allocation48_spill] sm:$0xff] }
 0x319   : > { %v2861_v33 = vpop.permute.xlu1 %2860 }
 0x31a   : > { %v4841_v17 = vpop.f32.mrb[40].mxu0  ;;  %v3053_v28 = vsel %vm1344_vm0, %v7097_v16, %v2861_v33 }
 0x31b   : > { %v4842_v30 = vpop.f32.mrb[41].mxu0 }
 0x31c   : > { %v4843_v54 = vadd.f32 %v4842_v30, %v4841_v17  ;;  %v4844_v9 = vpop.f32.mrb[42].mxu0 }
 0x31d   : > { %v4845_v56 = vpop.f32.mrb[43].mxu0  ;;  %v2893_v8 = vpop.permute.xlu1 %2892 }
 0x31e   : > { %v1901_v22 = vadd.f32 %v7364_v0, %v4843_v54  ;;  %v4846_v24 = vadd.f32 %v4845_v56, %v4844_v9  ;;  %v3085_v14 = vsel %vm1377_vm3, %v3053_v28, %v2893_v8 }
 0x320   : > { %v7412_v6 = vadd.f32 %v8054_v26, %v1901_v22  ;;  %v1904_v44 = vadd.f32 %v7364_v0, %v4846_v24 }
 0x321   : > { %v2925_v5 = vpop.permute.xlu1 %2924 }
 0x322   : > { %v7417_v41 = vadd.f32 %v8055_v11, %v1904_v44  ;;  %v3132_v19 = vsel %vm1410_vm4, %v3085_v14, %v2925_v5 }
 0x323   : > { %v4935_v1 = vpop.f32.mrb[48].mxu1  ;;  %3614 = vmatmul.mubr.bf16.gmra.mrb[92].mxu1 %v3132_v19 }
 0x324   : > { %v4936_v36 = vpop.f32.mrb[49].mxu1  ;;  %5093 = vmatprep.mubr.msk.bf16.mxu1 %vm1344_vm0, %v7218_v49 }
 0x325   : > { %v7422_v16 = vadd.f32 %v4936_v36, %v4935_v1  ;;  %v4938_v13 = vpop.f32.mrb[50].mxu1 }
 0x326   : > { %v4939_v18 = vpop.f32.mrb[51].mxu1 }
 0x327   : > { %v7424_v15 = vadd.f32 %v4939_v18, %v4938_v13 }
 0x32b   : > { %5094 = vmatmul.mubr.msk.bf16.vlgmr.msra.gmra.mrb[96].mxu1 %vm1344_vm0, %v7206_v51 }
 0x333   : > { %v4847_v4 = vpop.f32.mrb[44].mxu0 }
 0x334   : > { %v4848_v35 = vpop.f32.mrb[45].mxu0 }
 0x335   : > { %v4849_v63 = vadd.f32 %v4848_v35, %v4847_v4  ;;  %v4850_v57 = vpop.f32.mrb[46].mxu0 }
 0x336   : > { %v4851_v48 = vpop.f32.mrb[47].mxu0 }
 0x337   : > { %v1909_v53 = vadd.f32 %v7364_v0, %v4849_v63  ;;  %v4852_v37 = vadd.f32 %v4851_v48, %v4850_v57 }
 0x339   : > { %v7430_v32 = vadd.f32 %v8056_v52, %v1909_v53  ;;  %v1912_v49 = vadd.f32 %v7364_v0, %v4852_v37 }
 0x33b   : > { %v7434_v33 = vadd.f32 %v8057_v34, %v1912_v49 }
 0x342   : > { %v4941_v17 = vpop.f32.mrb[52].mxu1 }
 0x343   : > { %v4942_v30 = vpop.f32.mrb[53].mxu1 }
 0x344   : > { %v7436_v54 = vadd.f32 %v4942_v30, %v4941_v17  ;;  %v4944_v51 = vpop.f32.mrb[54].mxu1 }
 0x345   : > { %v4945_v9 = vpop.f32.mrb[55].mxu1 }
 0x346   : > { %v7438_v56 = vadd.f32 %v4945_v9, %v4944_v51 }
 0x356   : > { %v4853_v8 = vpop.f32.mrb[48].mxu0 }
 0x357   : > { %v4854_v22 = vpop.f32.mrb[49].mxu0 }
 0x358   : > { %v4855_v24 = vadd.f32 %v4854_v22, %v4853_v8  ;;  %v4856_v28 = vpop.f32.mrb[50].mxu0 }
 0x359   : > { %v4857_v26 = vpop.f32.mrb[51].mxu0 }
 0x35a   : > { %v1917_v44 = vadd.f32 %v7364_v0, %v4855_v24  ;;  %v4858_v14 = vadd.f32 %v4857_v26, %v4856_v28 }
 0x35c   : > { %v7442_v5 = vadd.f32 %v7035_v2, %v1917_v44  ;;  %v1920_v11 = vadd.f32 %v7364_v0, %v4858_v14 }
 0x35e   : > { %v7446_v19 = vadd.f32 %v7042_v61, %v1920_v11 }
 0x35f   : > { %v4947_v1 = vpop.f32.mrb[56].mxu1 }
 0x360   : > { %v4948_v36 = vpop.f32.mrb[57].mxu1 }
 0x361   : > { %v7448_v13 = vadd.f32 %v4948_v36, %v4947_v1  ;;  %v4950_v18 = vpop.f32.mrb[58].mxu1 }
 0x362   : > { %v4951_v4 = vpop.f32.mrb[59].mxu1 }
 0x363   : > { %v7450_v35 = vadd.f32 %v4951_v4, %v4950_v18 }
 0x36f   : > { %v4859_v63 = vpop.f32.mrb[52].mxu0 }
 0x370   : > { %v4860_v57 = vpop.f32.mrb[53].mxu0 }
 0x371   : > { %v4861_v48 = vadd.f32 %v4860_v57, %v4859_v63  ;;  %v4862_v53 = vpop.f32.mrb[54].mxu0 }
 0x372   : > { %v4863_v37 = vpop.f32.mrb[55].mxu0 }
 0x373   : > { %v1925_v2 = vadd.f32 %v7364_v0, %v4861_v48  ;;  %v4864_v52 = vadd.f32 %v4863_v37, %v4862_v53 }
 0x375   : > { %v7454_v49 = vadd.f32 %v7030_v46, %v1925_v2  ;;  %v1928_v61 = vadd.f32 %v7364_v0, %v4864_v52 }
 0x377   : > { %v7458_v34 = vadd.f32 %v7038_v29, %v1928_v61 }
 0x37e   : > { %v4953_v17 = vpop.f32.mrb[60].mxu1 }
 0x37f   : > { %v4954_v30 = vpop.f32.mrb[61].mxu1 }
 0x380   : > { %v7460_v51 = vadd.f32 %v4954_v30, %v4953_v17  ;;  %v4956_v9 = vpop.f32.mrb[62].mxu1 }
 0x381   : > { %v4957_v8 = vpop.f32.mrb[63].mxu1 }
 0x382   : > { %v7462_v22 = vadd.f32 %v4957_v8, %v4956_v9 }
 0x387   : > { %v4865_v24 = vpop.f32.mrb[56].mxu0 }
 0x388   : > { %v4866_v28 = vpop.f32.mrb[57].mxu0 }
 0x389   : > { %v4867_v26 = vadd.f32 %v4866_v28, %v4865_v24  ;;  %v4868_v44 = vpop.f32.mrb[58].mxu0 }
 0x38a   : > { %v4869_v14 = vpop.f32.mrb[59].mxu0 }
 0x38b   : > { %v1933_v46 = vadd.f32 %v7364_v0, %v4867_v26  ;;  %v4870_v11 = vadd.f32 %v4869_v14, %v4868_v44 }
 0x38d   : > { %v7466_v1 = vadd.f32 %v7137_v55, %v1933_v46  ;;  %v1936_v29 = vadd.f32 %v7364_v0, %v4870_v11 }
 0x38f   : > { %v7470_v36 = vadd.f32 %v7146_v27, %v1936_v29  ;;  %v7480_v27 = vld [vmem:[%s7877_s7] ss:$0 sm:$0xff] }
 0x390   : > { %v3504_v24 = vadd.f32 %v7295_v40, %v7480_v27  ;;  %v3496_v44 = vadd.f32 %v7261_v7, %v7480_v27  ;;  %v3507_v11 = vadd.f32 %v7301_v45, %v7480_v27  ;;  %v8060_v45 = vld [vmem:[#allocation41_spill] sm:$0xff] }
 0x396   : > { %v4959_v18 = vpop.f32.mrb[64].mxu1 }
 0x397   : > { %v4960_v4 = vpop.f32.mrb[65].mxu1 }
 0x398   : > { %v7472_v63 = vadd.f32 %v4960_v4, %v4959_v18  ;;  %v4962_v57 = vpop.f32.mrb[66].mxu1  ;;  %v8058_v18 = vld [vmem:[#allocation18_spill] sm:$0xff] }
 0x399   : > { %v4963_v48 = vpop.f32.mrb[67].mxu1  ;;  %v2110_v4 = vmax.f32 %v8058_v18, 0.0 }
 0x39a   : > { %v7474_v53 = vadd.f32 %v4963_v48, %v4962_v57  ;;  %v8059_v48 = vld [vmem:[#allocation38_spill] sm:$0xff] }
 0x39f   : > { %v4871_v37 = vpop.f32.mrb[60].mxu0 }
 0x3a0   : > { %v4872_v2 = vpop.f32.mrb[61].mxu0 }
 0x3a1   : > { %v4873_v52 = vadd.f32 %v4872_v2, %v4871_v37  ;;  %v4874_v61 = vpop.f32.mrb[62].mxu0  ;;  %v2108_v37 = vmax.f32 %v8059_v48, 0.0 }
 0x3a2   : > { %v4875_v17 = vpop.f32.mrb[63].mxu0 }
 0x3a3   : > { %v1941_v55 = vadd.f32 %v7364_v0, %v4873_v52  ;;  %v4876_v30 = vadd.f32 %v4875_v17, %v4874_v61  ;;  %v2111_v61 = vmax.f32 %v6902_v58, 0.0 }
 0x3a5   : > { %v7483_v9 = vadd.f32 %v7130_v20, %v1941_v55  ;;  %v1944_v8 = vadd.f32 %v7364_v0, %v4876_v30  ;;  %v3499_v0 = vadd.f32 %v7263_v43, %v7480_v27  ;;  %v2109_v30 = vmax.f32 %v8060_v45, 0.0 }
 0x3a6   : > { %v3520_v43 = vadd.f32 %v7390_v42, %v7480_v27 }
 0x3a7   : > { %v7489_v28 = vadd.f32 %v7142_v39, %v1944_v8  ;;  %v5067_v26 = vpop.f32.mrb[64].mxu0 }
 0x3a8   : > { %v3665_v14 = vadd.f32 %v5067_v26, %v3504_v24  ;;  %v3656_v46 = vpop.f32.mrb[65].mxu0 }
 0x3a9   : > { %v3657_v29 = vadd.f32 %v3656_v46, %v3496_v44  ;;  %v5068_v20 = vpop.f32.mrb[66].mxu0 }
 0x3aa   : > { %v3785_v40 = vmax.f32 %v3665_v14, 0.0  ;;  %v3668_v57 = vadd.f32 %v5068_v20, %v3507_v11  ;;  %v3659_v39 = vpop.f32.mrb[67].mxu0  ;;  %v3512_v11 = vadd.f32 %v7341_v50, %v7480_v27  ;;  %v8061_v50 = vld [vmem:[#allocation14_spill] sm:$0xff] }
 0x3ab   : > { %v3783_v2 = vmax.f32 %v3657_v29, 0.0  ;;  %v3660_v52 = vadd.f32 %v3659_v39, %v3499_v0  ;;  %v3515_v39 = vadd.f32 %v7343_v59, %v7480_v27 }
 0x3ac   : > { %v3817_v7 = vadd.f32 %v3785_v40, %v2110_v4  ;;  %v3786_v17 = vmax.f32 %v3668_v57, 0.0  ;;  %v3523_v4 = vadd.f32 %v7396_v12, %v7480_v27 }
 0x3ad   : > { %v3815_v55 = vadd.f32 %v3783_v2, %v2108_v37  ;;  %v3784_v8 = vmax.f32 %v3660_v52, 0.0  ;;  %v2114_v37 = vmax.f32 %v8061_v50, 0.0 }
 0x3ae   : > { %v3818_v24 = vadd.f32 %v3786_v17, %v2111_v61  ;;  %v4965_v26 = vpop.f32.mrb[68].mxu1 }
 0x3af   : > { %v3816_v44 = vadd.f32 %v3784_v8, %v2109_v30  ;;  %v4966_v14 = vpop.f32.mrb[69].mxu1  ;;  %v5071_v46 = vpop.f32.mrb[68].mxu0  ;;  %v3847_v29 = vsel %vm1344_vm0, %v3815_v55, -inf  ;;  %v8062_v55 = vld [vmem:[#allocation24_spill] sm:$0xff]  ;;  %v3853_v8 = vsel %vm1344_vm0, %v3817_v7, -inf }
 0x3b0   : > { %v7506_v20 = vadd.f32 %v4966_v14, %v4965_v26  ;;  %v3681_v58 = vadd.f32 %v5071_v46, %v3520_v43  ;;  %v3672_v0 = vpop.f32.mrb[69].mxu0  ;;  %3848 = vmax.xlane.f32.xlu0 %v3847_v29  ;;  %v4968_v18 = vpop.f32.mrb[70].mxu1  ;;  %v2112_v45 = vmax.f32 %v8062_v55, 0.0  ;;  %v8063_v43 = vld [vmem:[#allocation22_spill] sm:$0xff]  ;;  %v8064_v46 = vld [vmem:[#allocation12_spill] sm:$0xff] }
 0x3b1   : > { %v3673_v40 = vadd.f32 %v3672_v0, %v3512_v11  ;;  %v4969_v57 = vpop.f32.mrb[71].mxu1  ;;  %v5072_v42 = vpop.f32.mrb[70].mxu0  ;;  %v3850_v48 = vsel %vm1344_vm0, %v3816_v44, -inf  ;;  %v2115_v14 = vmax.f32 %v8063_v43, 0.0  ;;  %v2113_v11 = vmax.f32 %v8064_v46, 0.0 }
 0x3b2   : > { %v3789_v2 = vmax.f32 %v3681_v58, 0.0  ;;  %v7514_v52 = vadd.f32 %v4969_v57, %v4968_v18  ;;  %v3684_v61 = vadd.f32 %v5072_v42, %v3523_v4  ;;  %v3675_v17 = vpop.f32.mrb[71].mxu0  ;;  %3851 = vmax.xlane.f32.xlu1 %v3850_v48  ;;  %v3536_v0 = vadd.f32 %v7436_v54, %v7480_v27 }
 0x3b3   : > { %v3787_v30 = vmax.f32 %v3673_v40, 0.0  ;;  %v3676_v12 = vadd.f32 %v3675_v17, %v3515_v39  ;;  %v3528_v40 = vadd.f32 %v7422_v16, %v7480_v27  ;;  %v3856_v57 = vsel %vm1344_vm0, %v3818_v24, -inf  ;;  %v8065_v16 = vld [vmem:[#allocation19_spill] sm:$0xff] }
 0x3b4   : > { %v3821_v26 = vadd.f32 %v3789_v2, %v2114_v37  ;;  %v3790_v59 = vmax.f32 %v3684_v61, 0.0  ;;  %3854 = vmax.xlane.f32.xlu0 %v3853_v8  ;;  %v3539_v48 = vadd.f32 %v7438_v56, %v7480_v27  ;;  %v3531_v54 = vadd.f32 %v7424_v15, %v7480_v27 }
 0x3b5   : > { %v3819_v44 = vadd.f32 %v3787_v30, %v2112_v45  ;;  %v3788_v29 = vmax.f32 %v3676_v12, 0.0  ;;  %v2118_v2 = vmax.f32 %v7200_v31, 0.0  ;;  %v2116_v17 = vmax.f32 %v8065_v16, 0.0 }
 0x3b6   : > { %v3822_v58 = vadd.f32 %v3790_v59, %v2115_v14  ;;  %v3865_v43 = vsel %vm1344_vm0, %v3821_v26, -inf  ;;  %v2119_v59 = vmax.f32 %v7212_v10, 0.0  ;;  %v3552_v26 = vadd.f32 %v7460_v51, %v7480_v27 }
 0x3b7   : > { %v3820_v18 = vadd.f32 %v3788_v29, %v2113_v11  ;;  %v5075_v4 = vpop.f32.mrb[72].mxu0  ;;  %v3859_v7 = vsel %vm1344_vm0, %v3819_v44, -inf  ;;  %v8066_v11 = vld [vmem:[#allocation11_spill] sm:$0xff]  ;;  %v3544_v10 = vadd.f32 %v7448_v13, %v7480_v27  ;;  %v3547_v51 = vadd.f32 %v7450_v35, %v7480_v27 }
 0x3b8   : > { %v3697_v42 = vadd.f32 %v5075_v4, %v3536_v0  ;;  %v3688_v39 = vpop.f32.mrb[73].mxu0  ;;  %3860 = vmax.xlane.f32.xlu1 %v3859_v7  ;;  %3857 = vmax.xlane.f32.xlu0 %v3856_v57  ;;  %v2117_v29 = vmax.f32 %v8066_v11, 0.0  ;;  %v2120_v13 = vmax.f32 %v7251_v60, 0.0 }
 0x3b9   : > { %v3689_v50 = vadd.f32 %v3688_v39, %v3528_v40  ;;  %v5076_v37 = vpop.f32.mrb[74].mxu0  ;;  %v3862_v56 = vsel %vm1344_vm0, %v3820_v18, -inf  ;;  %v3868_v39 = vsel %vm1344_vm0, %v3822_v58, -inf }
 0x3ba   : > { %v3793_v61 = vmax.f32 %v3697_v42, 0.0  ;;  %v3700_v55 = vadd.f32 %v5076_v37, %v3539_v48  ;;  %v4971_v45 = vpop.f32.mrb[72].mxu1  ;;  %v3691_v24 = vpop.f32.mrb[75].mxu0  ;;  %v3555_v37 = vadd.f32 %v7462_v22, %v7480_v27  ;;  %v2123_v22 = vmax.f32 %v7289_v25, 0.0 }
 0x3bb   : > { %v3791_v30 = vmax.f32 %v3689_v50, 0.0  ;;  %v3692_v12 = vadd.f32 %v3691_v24, %v3531_v54  ;;  %v4972_v8 = vpop.f32.mrb[73].mxu1 }
 0x3bc   : > { %v3825_v14 = vadd.f32 %v3793_v61, %v2118_v2  ;;  %v3794_v44 = vmax.f32 %v3700_v55, 0.0  ;;  %v7535_v15 = vadd.f32 %v4972_v8, %v4971_v45  ;;  %3866 = vmax.xlane.f32.xlu1 %v3865_v43  ;;  %3863 = vmax.xlane.f32.xlu0 %v3862_v56  ;;  %v4974_v31 = vpop.f32.mrb[74].mxu1  ;;  %v2122_v61 = vmax.f32 %v7283_v38, 0.0 }
 0x3bd   : > { %v3823_v46 = vadd.f32 %v3791_v30, %v2116_v17  ;;  %v3792_v0 = vmax.f32 %v3692_v12, 0.0  ;;  %v4975_v4 = vpop.f32.mrb[75].mxu1  ;;  %v2121_v38 = vmax.f32 %v7256_v21, 0.0 }
 0x3be   : > { %v3826_v40 = vadd.f32 %v3794_v44, %v2119_v59  ;;  %v7538_v7 = vadd.f32 %v4975_v4, %v4974_v31  ;;  %v3877_v24 = vsel %vm1344_vm0, %v3825_v14, -inf  ;;  %v3568_v59 = vadd.f32 %v7506_v20, %v7480_v27 }
 0x3bf   : > { %v3824_v18 = vadd.f32 %v3792_v0, %v2117_v29  ;;  %v5079_v57 = vpop.f32.mrb[76].mxu0  ;;  %v3871_v42 = vsel %vm1344_vm0, %v3823_v46, -inf  ;;  %v3560_v46 = vadd.f32 %v7472_v63, %v7480_v27  ;;  %v2126_v63 = vmax.f32 %v7374_v62, 0.0 }
 0x3c0   : > { %v3713_v48 = vadd.f32 %v5079_v57, %v3552_v26  ;;  %v3704_v50 = vpop.f32.mrb[77].mxu0  ;;  %3872 = vmax.xlane.f32.xlu1 %v3871_v42  ;;  %3869 = vmax.xlane.f32.xlu0 %v3868_v39  ;;  %v3880_v11 = vsel %vm1344_vm0, %v3826_v40, -inf  ;;  %v3571_v26 = vadd.f32 %v7514_v52, %v7480_v27  ;;  %v2127_v52 = vmax.f32 %v7383_v3, 0.0 }
 0x3c1   : > { %v3705_v54 = vadd.f32 %v3704_v50, %v3544_v10  ;;  %v5080_v2 = vpop.f32.mrb[78].mxu0  ;;  %v3874_v30 = vsel %vm1344_vm0, %v3824_v18, -inf  ;;  %v3563_v10 = vadd.f32 %v7474_v53, %v7480_v27  ;;  %v2124_v50 = vmax.f32 %v7325_v23, 0.0 }
 0x3c2   : > { %v3797_v16 = vmax.f32 %v3713_v48, 0.0  ;;  %v3716_v17 = vadd.f32 %v5080_v2, %v3555_v37  ;;  %v3707_v55 = vpop.f32.mrb[79].mxu0  ;;  %v2125_v53 = vmax.f32 %v7337_v47, 0.0 }
 0x3c3   : > { %v3795_v58 = vmax.f32 %v3705_v54, 0.0  ;;  %v3708_v45 = vadd.f32 %v3707_v55, %v3547_v51 }
 0x3c4   : > { %v7554_v12 = vadd.f32 %v3797_v16, %v2122_v61  ;;  %v3798_v8 = vmax.f32 %v3716_v17, 0.0  ;;  %3878 = vmax.xlane.f32.xlu1 %v3877_v24  ;;  %3875 = vmax.xlane.f32.xlu0 %v3874_v30 }
 0x3c5   : > { %v3827_v35 = vadd.f32 %v3795_v58, %v2120_v13  ;;  %v3796_v43 = vmax.f32 %v3708_v45, 0.0  ;;  %v3576_v45 = vadd.f32 %v7535_v15, %v7480_v27 }
 0x3c6   : > { %v7558_v60 = vadd.f32 %v3798_v8, %v2123_v22  ;;  %v4977_v56 = vpop.f32.mrb[76].mxu1 }
 0x3c7   : > { %v3828_v14 = vadd.f32 %v3796_v43, %v2121_v38  ;;  %v4978_v44 = vpop.f32.mrb[77].mxu1  ;;  %v5083_v31 = vpop.f32.mrb[80].mxu0  ;;  %v3883_v25 = vsel %vm1344_vm0, %v3827_v35, -inf  ;;  %v3579_v35 = vadd.f32 %v7538_v7, %v7480_v27  ;;  %v2130_v38 = vmax.f32 %v7430_v32, 0.0 }
 0x3c8   : > { %v4979_v29 = vadd.f32 %v4978_v44, %v4977_v56  ;;  %v3729_v0 = vadd.f32 %v5083_v31, %v3568_v59  ;;  %v3720_v21 = vpop.f32.mrb[81].mxu0  ;;  %3884 = vmax.xlane.f32.xlu1 %v3883_v25  ;;  %3881 = vmax.xlane.f32.xlu0 %v3880_v11  ;;  %v4980_v4 = vpop.f32.mrb[78].mxu1  ;;  %v2128_v44 = vmax.f32 %v7412_v6, 0.0 }
 0x3c9   : > { %v3721_v20 = vadd.f32 %v3720_v21, %v3560_v46  ;;  %v4981_v18 = vpop.f32.mrb[79].mxu1  ;;  %v5084_v57 = vpop.f32.mrb[82].mxu0  ;;  %v3886_v2 = vsel %vm1344_vm0, %v3828_v14, -inf  ;;  %v2131_v46 = vmax.f32 %v7434_v33, 0.0 }
 0x3ca   : > { %v3801_v42 = vmax.f32 %v3729_v0, 0.0  ;;  %v4982_v39 = vadd.f32 %v4981_v18, %v4980_v4  ;;  %v3732_v40 = vadd.f32 %v5084_v57, %v3571_v26  ;;  %v3723_v48 = vpop.f32.mrb[83].mxu0  ;;  %v3584_v17 = vadd.f32 %v4979_v29, %v7480_v27 }
 0x3cb   : > { %v3799_v37 = vmax.f32 %v3721_v20, 0.0  ;;  %v3724_v54 = vadd.f32 %v3723_v48, %v3563_v10  ;;  %v2129_v26 = vmax.f32 %v7417_v41, 0.0 }
 0x3cc   : > { %v3833_v51 = vadd.f32 %v3801_v42, %v2126_v63  ;;  %v3802_v61 = vmax.f32 %v3732_v40, 0.0  ;;  %3887 = vmax.xlane.f32.xlu0 %v3886_v2  ;;  %v3587_v3 = vadd.f32 %v4982_v39, %v7480_v27  ;;  %v2132_v2 = vmax.f32 %v7442_v5, 0.0 }
 0x3cd   : > { %v3831_v16 = vadd.f32 %v3799_v37, %v2124_v50  ;;  %v3800_v13 = vmax.f32 %v3724_v54, 0.0 }
 0x3ce   : > { %v3834_v62 = vadd.f32 %v3802_v61, %v2127_v52  ;;  %v3901_v55 = vsel %vm1344_vm0, %v3833_v51, -inf }
 0x3cf   : > { %v3832_v58 = vadd.f32 %v3800_v13, %v2125_v53  ;;  %v5087_v23 = vpop.f32.mrb[84].mxu0  ;;  %3902 = vmax.xlane.f32.xlu1 %v3901_v55  ;;  %v3895_v15 = vsel %vm1344_vm0, %v3831_v16, -inf  ;;  %v2133_v53 = vmax.f32 %v7446_v19, 0.0  ;;  %v2135_v19 = vmax.f32 %v7458_v34, 0.0 }
 0x3d0   : > { %v3745_v24 = vadd.f32 %v5087_v23, %v3584_v17  ;;  %v3736_v30 = vpop.f32.mrb[85].mxu0  ;;  %v3904_v22 = vsel %vm1344_vm0, %v3834_v62, -inf }
 0x3d1   : > { %v3737_v8 = vadd.f32 %v3736_v30, %v3576_v45  ;;  %v5088_v47 = vpop.f32.mrb[86].mxu0  ;;  %3905 = vmax.xlane.f32.xlu0 %v3904_v22  ;;  %v3898_v32 = vsel %vm1344_vm0, %v3832_v58, -inf  ;;  %v2134_v22 = vmax.f32 %v7454_v49, 0.0 }
 0x3d2   : > { %v3805_v43 = vmax.f32 %v3745_v24, 0.0  ;;  %v3748_v56 = vadd.f32 %v5088_v47, %v3587_v3  ;;  %v4983_v59 = vpop.f32.mrb[80].mxu1  ;;  %v3739_v14 = vpop.f32.mrb[87].mxu0 }
 0x3d3   : > { %v3803_v31 = vmax.f32 %v3737_v8, 0.0  ;;  %v3740_v25 = vadd.f32 %v3739_v14, %v3579_v35  ;;  %3896 = vmax.xlane.f32.xlu1 %v3895_v15  ;;  %v4984_v11 = vpop.f32.mrb[81].mxu1 }
 0x3d4   : > { %v3837_v29 = vadd.f32 %v3805_v43, %v2130_v38  ;;  %v3806_v0 = vmax.f32 %v3748_v56, 0.0  ;;  %v4985_v21 = vadd.f32 %v4984_v11, %v4983_v59  ;;  %v4986_v7 = vpop.f32.mrb[82].mxu1 }
 0x3d5   : > { %v3835_v4 = vadd.f32 %v3803_v31, %v2128_v44  ;;  %v3804_v20 = vmax.f32 %v3740_v25, 0.0  ;;  %3899 = vmax.xlane.f32.xlu0 %v3898_v32  ;;  %v4987_v18 = vpop.f32.mrb[83].mxu1 }
 0x3d6   : > { %v3838_v57 = vadd.f32 %v3806_v0, %v2131_v46  ;;  %v4988_v6 = vadd.f32 %v4987_v18, %v4986_v7  ;;  %v3913_v10 = vsel %vm1344_vm0, %v3837_v29, -inf  ;;  %v3592_v33 = vadd.f32 %v4985_v21, %v7480_v27 }
 0x3d7   : > { %v3836_v63 = vadd.f32 %v3804_v20, %v2129_v26  ;;  %v5091_v42 = vpop.f32.mrb[88].mxu0  ;;  %3914 = vmax.xlane.f32.xlu1 %v3913_v10  ;;  %v3907_v54 = vsel %vm1344_vm0, %v3835_v4, -inf }
 0x3d8   : > { %v3752_v39 = vpop.f32.mrb[89].mxu0  ;;  %v3916_v40 = vsel %vm1344_vm0, %v3838_v57, -inf  ;;  %v3595_v48 = vadd.f32 %v4988_v6, %v7480_v27 }
 0x3d9   : > { %v3753_v50 = vadd.f32 %v3752_v39, %v3592_v33  ;;  %v5092_v37 = vpop.f32.mrb[90].mxu0  ;;  %3917 = vmax.xlane.f32.xlu0 %v3916_v40  ;;  %v3910_v61 = vsel %vm1344_vm0, %v3836_v63, -inf }
 0x3da   : > { %v3755_v41 = vpop.f32.mrb[91].mxu0 }
 0x3db   : > { %v3807_v51 = vmax.f32 %v3753_v50, 0.0  ;;  %v3756_v52 = vadd.f32 %v3755_v41, %v3595_v48  ;;  %3908 = vmax.xlane.f32.xlu1 %v3907_v54  ;;  %v2136_v50 = vmax.f32 %v7466_v1, 0.0  ;;  %v3889_v1 = vsel %vm1344_vm0, %v7554_v12, -inf }
 0x3dd   : > { %v3839_v16 = vadd.f32 %v3807_v51, %v2132_v2  ;;  %v3808_v13 = vmax.f32 %v3756_v52, 0.0  ;;  %3911 = vmax.xlane.f32.xlu0 %v3910_v61  ;;  %v2139_v2 = vmax.f32 %v7489_v28, 0.0  ;;  %v2137_v61 = vmax.f32 %v7470_v36, 0.0 }
 0x3de   : > { %v4989_v62 = vpop.f32.mrb[84].mxu1  ;;  %v3892_v28 = vsel %vm1344_vm0, %v7558_v60, -inf }
 0x3df   : > { %v3840_v17 = vadd.f32 %v3808_v13, %v2133_v53  ;;  %v4990_v55 = vpop.f32.mrb[85].mxu1  ;;  %v3919_v49 = vsel %vm1344_vm0, %v3839_v16, -inf }
 0x3e0   : > { %v4991_v58 = vadd.f32 %v4990_v55, %v4989_v62  ;;  %v4992_v23 = vpop.f32.mrb[86].mxu1 }
 0x3e1   : > { %v4993_v45 = vpop.f32.mrb[87].mxu1  ;;  %v3922_v34 = vsel %vm1344_vm0, %v3840_v17, -inf }
 0x3e2   : > { %v3600_v24 = vadd.f32 %v4991_v58, %v7480_v27  ;;  %v4994_v30 = vadd.f32 %v4993_v45, %v4992_v23 }
 0x3e4   : > { %v3761_v5 = vadd.f32 %v5091_v42, %v3600_v24  ;;  %v3603_v3 = vadd.f32 %v4994_v30, %v7480_v27  ;;  %v2138_v42 = vmax.f32 %v7483_v9, 0.0 }
 0x3e6   : > { %v3809_v8 = vmax.f32 %v3761_v5, 0.0  ;;  %v3764_v47 = vadd.f32 %v5092_v37, %v3603_v3 }
 0x3e8   : > { %v3810_v35 = vmax.f32 %v3764_v47, 0.0  ;;  %v3841_v38 = vadd.f32 %v3809_v8, %v2134_v22 }
 0x3ea   : > { %v4995_v43 = vpop.f32.mrb[88].mxu1  ;;  %v3925_v56 = vsel %vm1344_vm0, %v3841_v38, -inf  ;;  %v3842_v59 = vadd.f32 %v3810_v35, %v2135_v19 }
 0x3eb   : > { %3926 = vmax.xlane.f32.xlu1 %v3925_v56  ;;  %v4996_v14 = vpop.f32.mrb[89].mxu1 }
 0x3ec   : > { %v4997_v15 = vadd.f32 %v4996_v14, %v4995_v43  ;;  %v4998_v44 = vpop.f32.mrb[90].mxu1  ;;  %v3928_v31 = vsel %vm1344_vm0, %v3842_v59, -inf  ;;  %v8067_v14 = vlaneseq }
 0x3ed   : > { %3929 = vmax.xlane.f32.xlu0 %v3928_v31  ;;  %v4999_v46 = vpop.f32.mrb[91].mxu1 }
 0x3ee   : > { %v5000_v25 = vadd.f32 %v4999_v46, %v4998_v44  ;;  %v3608_v20 = vadd.f32 %v4997_v15, %v7480_v27  ;;  %v3976_v15 = vand.u32 127, %v8067_v14 }
 0x3ef   : > { %3920 = vmax.xlane.f32.xlu1 %v3919_v49 }
 0x3f0   : > { %v3611_v63 = vadd.f32 %v5000_v25, %v7480_v27  ;;  %v3982_v31 = vadd.s32 4294967287, %v3976_v15  ;;  %v3977_v25 = vadd.s32 4294967295, %v3976_v15 }
 0x3f1   : > { %3923 = vmax.xlane.f32.xlu0 %v3922_v34  ;;  %v8068_v34 = vld [vmem:[#allocation8_spill] sm:$0xff] }
 0x3f6   : > { %v5001_v11 = vpop.f32.mrb[92].mxu1 }
 0x3f7   : > { %v5002_v29 = vpop.f32.mrb[93].mxu1 }
 0x3f8   : > { %v5003_v0 = vadd.f32 %v5002_v29, %v5001_v11  ;;  %v5004_v21 = vpop.f32.mrb[94].mxu1  ;;  %v7639_v11 = vsub.s32 %v3982_v31, %v8068_v34 }
 0x3f9   : > { %v5005_v7 = vpop.f32.mrb[95].mxu1 }
 0x3fa   : > { %v5006_v32 = vadd.f32 %v5005_v7, %v5004_v21  ;;  %v3616_v4 = vadd.f32 %v5003_v0, %v7480_v27  ;;  %v7644_v0 = vsub.s32 %v3977_v25, %v8068_v34 }
 0x3fc   : > { %v3619_v6 = vadd.f32 %v5006_v32, %v7480_v27 }
 0x3fe   : > { %v5095_v26 = vpop.f32.mrb[96].mxu1 }
 0x3ff   : > { %v3777_v18 = vadd.f32 %v5095_v26, %v3616_v4  ;;  %v3768_v57 = vpop.f32.mrb[97].mxu1 }
 0x400   : > { %v3769_v10 = vadd.f32 %v3768_v57, %v3608_v20  ;;  %v5096_v33 = vpop.f32.mrb[98].mxu1 }
 0x401   : > { %v3813_v39 = vmax.f32 %v3777_v18, 0.0  ;;  %v3780_v40 = vadd.f32 %v5096_v33, %v3619_v6  ;;  %v3771_v48 = vpop.f32.mrb[99].mxu1 }
 0x402   : > { %v3811_v37 = vmax.f32 %v3769_v10, 0.0  ;;  %v3772_v41 = vadd.f32 %v3771_v48, %v3611_v63 }
 0x403   : > { %v3845_v54 = vadd.f32 %v3813_v39, %v2138_v42  ;;  %v3814_v51 = vmax.f32 %v3780_v40, 0.0 }
 0x404   : > { %v3843_v52 = vadd.f32 %v3811_v37, %v2136_v50  ;;  %v3812_v16 = vmax.f32 %v3772_v41, 0.0 }
 0x405   : > { %v3846_v53 = vadd.f32 %v3814_v51, %v2139_v2  ;;  %v3937_v62 = vsel %vm1344_vm0, %v3845_v54, -inf }
 0x406   : > { %v3844_v13 = vadd.f32 %v3812_v16, %v2137_v61  ;;  %v3931_v27 = vsel %vm1344_vm0, %v3843_v52, -inf }
 0x407   : > { %3932 = vmax.xlane.f32.xlu1 %v3931_v27  ;;  %v3940_v36 = vsel %vm1344_vm0, %v3846_v53, -inf }
 0x408   : > { %v3934_v9 = vsel %vm1344_vm0, %v3844_v13, -inf }
 0x409   : > { %3935 = vmax.xlane.f32.xlu0 %v3934_v9 }
 0x40b   : > { %3890 = vmax.xlane.f32.xlu1 %v3889_v1 }
 0x40d   : > { %3893 = vmax.xlane.f32.xlu0 %v3892_v28 }
 0x40f   : > { %3938 = vmax.xlane.f32.xlu1 %v3937_v62 }
 0x411   : > { %3941 = vmax.xlane.f32.xlu0 %v3940_v36 }
 0x43d   : > { %v3849_v17 = vpop.xlane.xlu0 %3848 }
 0x43e   : > { %v3981_v20 = vrot.slane %v3849_v17, %v7644_v0 }
 0x43f   : > { %v3852_v23 = vpop.xlane.xlu1 %3851 }
 0x440   : > { %v3986_v7 = vrot.slane %v3852_v23, %v7639_v11 }
 0x441   : > { %v3855_v55 = vpop.xlane.xlu0 %3854 }
 0x442   : > { %v3992_v32 = vrot.slane %v3855_v55, %v7644_v0  ;;  %v3988_v42 = vsel %vm3987_vm5, %v3986_v7, %v3981_v20 }
 0x445   : > { %v3858_v58 = vpop.xlane.xlu0 %3857  ;;  %v3861_v45 = vpop.xlane.xlu1 %3860 }
 0x446   : > { %v3996_v21 = vrot.slane %v3858_v58, %v7639_v11  ;;  %v4001_v6 = vrot.slane %v3861_v45, %v7644_v0 }
 0x448   : > { %v3997_v18 = vsel %vm3987_vm5, %v3996_v21, %v3992_v32 }
 0x449   : > { %v3864_v24 = vpop.xlane.xlu0 %3863  ;;  %v3867_v30 = vpop.xlane.xlu1 %3866  ;;  %v4125_v50 = vsel %vm4124_vm6, %v3997_v18, %v3988_v42 }
 0x44a   : > { %v4005_v4 = vrot.slane %v3864_v24, %v7639_v11  ;;  %v4010_v37 = vrot.slane %v3867_v30, %v7644_v0 }
 0x44c   : > { %v4006_v41 = vsel %vm3987_vm5, %v4005_v4, %v4001_v6 }
 0x44d   : > { %v3870_v5 = vpop.xlane.xlu0 %3869  ;;  %v7621_v12 = vpop.xlane.xlu1 %3872  ;;  %v4127_v55 = vsel %vm4126_vm7, %v4006_v41, %v4125_v50 }
 0x44e   : > { %v4014_v10 = vrot.slane %v3870_v5, %v7639_v11  ;;  %v4019_v51 = vrot.slane %v7621_v12, %v7644_v0 }
 0x450   : > { %v4015_v53 = vsel %vm3987_vm5, %v4014_v10, %v4010_v37  ;;  %v4185_v37 = vstv %s7712_s14  ;;  %s5370_s14 = smov 48  }
 0x451   : > { %v3876_v3 = vpop.xlane.xlu0 %3875  ;;  %v7623_v22 = vpop.xlane.xlu1 %3878  ;;  %v4129_v30 = vsel %vm4128_vm8, %v4015_v53, %v4127_v55 }
 0x452   : > { %v4023_v39 = vrot.slane %v3876_v3, %v7639_v11  ;;  %v4028_v28 = vrot.slane %v7623_v22, %v7644_v0 }
 0x454   : > { %v4024_v62 = vsel %vm3987_vm5, %v4023_v39, %v4019_v51  ;;  %v4217_v39 = vstv %s7702_s29  ;;  %v4238_v51 = vstv %s4752_s16  ;;  %s4164_s29 = sld [smem:[#allocation2]]  ;;  %s5371_s16 = smov 80  }
 0x455   : > { %v7625_v60 = vpop.xlane.xlu0 %3881  ;;  %v7627_v8 = vpop.xlane.xlu1 %3884  ;;  %v4131_v22 = vsel %vm4130_vm9, %v4024_v62, %v4129_v30 }
 0x456   : > { %v4032_v52 = vrot.slane %v7625_v60, %v7639_v11  ;;  %v4037_v58 = vrot.slane %v7627_v8, %v7644_v0 }
 0x458   : > { %v4033_v5 = vsel %vm3987_vm5, %v4032_v52, %v4028_v28 }
 0x459   : > { %v7629_v47 = vpop.xlane.xlu0 %3887 }
 0x45a   : > { %v4041_v13 = vrot.slane %v7629_v47, %v7639_v11 }
 0x45c   : > { %v3903_v19 = vpop.xlane.xlu1 %3902  ;;  %v4042_v60 = vsel %vm3987_vm5, %v4041_v13, %v4037_v58  ;;  %v4298_v58 = vstv %s4755_s25 }
 0x45d   : > { %v4064_v61 = vrot.slane %v3903_v19, %v7644_v0 }
 0x45e   : > { %v3906_v35 = vpop.xlane.xlu0 %3905 }
 0x45f   : > { %v4068_v40 = vrot.slane %v3906_v35, %v7639_v11 }
 0x460   : > { %v3897_v38 = vpop.xlane.xlu1 %3896 }
 0x461   : > { %v4055_v48 = vrot.slane %v3897_v38, %v7644_v0  ;;  %v4069_v36 = vsel %vm3987_vm5, %v4068_v40, %v4064_v61 }
 0x462   : > { %v3900_v43 = vpop.xlane.xlu0 %3899 }
 0x463   : > { %v4059_v57 = vrot.slane %v3900_v43, %v7639_v11 }
 0x464   : > { %v7631_v56 = vpop.xlane.xlu1 %3914 }
 0x465   : > { %v4060_v16 = vsel %vm3987_vm5, %v4059_v57, %v4055_v48  ;;  %v4082_v12 = vrot.slane %v7631_v56, %v7644_v0 }
 0x466   : > { %v7633_v59 = vpop.xlane.xlu0 %3917  ;;  %v4138_v23 = vsel %vm4124_vm6, %v4069_v36, %v4060_v16  ;;  %v4259_v36 = vstv %s4753_s22  ;;  %vm4490_vm6 = vcmask 654336   ;;  %s5373_s22 = smov [#allocation5]  }
 0x467   : > { %v4086_v17 = vrot.slane %v7633_v59, %v7639_v11  ;;  %v4133_v59 = vsel %vm4132_vm10, %v4033_v5, %v4131_v22 }
 0x468   : > { %v3909_v44 = vpop.xlane.xlu1 %3908  ;;  %v4135_v31 = vsel %vm4134_vm11, %v4042_v60, %v4133_v59 }
 0x469   : > { %v4073_v54 = vrot.slane %v3909_v44, %v7644_v0  ;;  %v4087_v35 = vsel %vm3987_vm5, %v4086_v17, %v4082_v12 }
 0x46a   : > { %v3912_v46 = vpop.xlane.xlu0 %3911 }
 0x46b   : > { %v4077_v33 = vrot.slane %v3912_v46, %v7639_v11 }
 0x46d   : > { %v4078_v27 = vsel %vm3987_vm5, %v4077_v33, %v4073_v54 }
 0x46e   : > { %v4139_v3 = vsel %vm4126_vm7, %v4078_v27, %v4138_v23  ;;  %v4277_v27 = vstv %s4754_s17  ;;  %s8069_s17 = smov 96   ;;  %vm4493_vm7 = vcmask 916480  }
 0x46f   : > { %v4140_v14 = vsel %vm4128_vm8, %v4087_v35, %v4139_v3 }
 0x478   : > { %v7636_v49 = vpop.xlane.xlu1 %3926 }
 0x479   : > { %v4100_v46 = vrot.slane %v7636_v49, %v7644_v0 }
 0x47a   : > { %v7641_v29 = vpop.xlane.xlu0 %3929 }
 0x47b   : > { %v4104_v38 = vrot.slane %v7641_v29, %v7639_v11 }
 0x47c   : > { %v3921_v26 = vpop.xlane.xlu1 %3920 }
 0x47d   : > { %v4091_v45 = vrot.slane %v3921_v26, %v7644_v0  ;;  %v4105_v4 = vsel %vm3987_vm5, %v4104_v38, %v4100_v46 }
 0x47e   : > { %v3924_v63 = vpop.xlane.xlu0 %3923 }
 0x47f   : > { %v4095_v9 = vrot.slane %v3924_v63, %v7639_v11  ;;  %v4171_v63 = vstv %s7691_s26  ;;  %s5365_s26 = smov 126  }
 0x481   : > { %v4096_v8 = vsel %vm3987_vm5, %v4095_v9, %v4091_v45  ;;  %v4199_v9 = vstv %s4750_s23 }
 0x482   : > { %v4141_v25 = vsel %vm4130_vm9, %v4096_v8, %v4140_v14 }
 0x483   : > { %v4142_v18 = vsel %vm4132_vm10, %v4105_v4, %v4141_v25 }
 0x494   : > { %v3933_v2 = vpop.xlane.xlu1 %3932 }
 0x495   : > { %v4109_v15 = vrot.slane %v3933_v2, %v7644_v0 }
 0x496   : > { %v3936_v1 = vpop.xlane.xlu0 %3935 }
 0x497   : > { %v4113_v47 = vrot.slane %v3936_v1, %v7639_v11 }
 0x498   : > { %v3891_v24 = vpop.xlane.xlu1 %3890 }
 0x499   : > { %v4046_v43 = vrot.slane %v3891_v24, %v7644_v0  ;;  %v4114_v21 = vsel %vm3987_vm5, %v4113_v47, %v4109_v15 }
 0x49a   : > { %v3894_v19 = vpop.xlane.xlu0 %3893  ;;  %v4143_v6 = vsel %vm4134_vm11, %v4114_v21, %v4142_v18 }
 0x49b   : > { %v4050_v56 = vrot.slane %v3894_v19, %v7639_v11 }
 0x49c   : > { %v3939_v44 = vpop.xlane.xlu1 %3938 }
 0x49d   : > { %v4051_v29 = vsel %vm3987_vm5, %v4050_v56, %v4046_v43  ;;  %v4118_v20 = vrot.slane %v3939_v44, %v7644_v0 }
 0x49e   : > { %v4137_v7 = vsel %vm4136_vm12, %v4051_v29, %v4135_v31  ;;  %v3942_v32 = vpop.xlane.xlu0 %3941 }
 0x49f   : > { %v4148_v26 = vsel %vm4147_vm13, 0.0, %v4137_v7  ;;  %v4122_v49 = vrot.slane %v3942_v32, %v7639_v11 }
 0x4a0   : > { %v4151_v57 = vsel %vm4150_vm14, %v4148_v26, 0.0 }
 0x4a1   : > { %v4156_v10 = vrot.slane %v4151_v57, 7  ;;  %v4123_v33 = vsel %vm3987_vm5, %v4122_v49, %v4118_v20  ;;  %vm4487_vm5 = vcmask 392192  }
 0x4a2   : > { %v4144_v0 = vsel %vm4136_vm12, %v4123_v33, %v4143_v6 }
 0x4a3   : > { %v7727_v11 = vsel %vm4155_vm15, 0.0, %v4156_v10  ;;  %v4149_v42 = vsel %vm4147_vm13, 0.0, %v4144_v0 }
 0x4a4   : > { %v4152_v40 = vsel %vm4150_vm14, %v4149_v42, 0.0  ;;  %v4172_v48 = vmul.f32 %v4171_v63, %v7727_v11  ;;  %v4218_v41 = vmul.f32 %v4217_v39, %v7727_v11  ;;  %v4186_v52 = vmul.f32 %v4185_v37, %v7727_v11 }
 0x4a5   : > { %v4157_v50 = vrot.slane %v4152_v40, 7  ;;  %v4239_v62 = vmul.f32 %v4238_v51, %v7727_v11  ;;  %v4200_v30 = vmul.f32 %v4199_v9, %v7727_v11  ;;  %v4278_v12 = vmul.f32 %v4277_v27, %v7727_v11 }
 0x4a6   : > { %4176 = vrot.lane.b32.xlu1 %v4172_v48, %s5364_s24  ;;  %v4224_v1 = vrot.slane %v4218_v41, 1  ;;  %v4260_v3 = vmul.f32 %v4259_v36, %v7727_v11  ;;  %v4299_v32 = vmul.f32 %v4298_v58, %v7727_v11  ;;  %v4165_v40 = vstv %s4164_s29  ;;  %s4764_s29 = sshll.u32 %s5446_s13, 10 }
 0x4a7   : > { %v7737_v54 = vsel %vm4155_vm15, %v4156_v10, %v4157_v50  ;;  %v4163_v2 = vsel %vm4155_vm15, %v4157_v50, 0.0  ;;  %v4245_v22 = vrot.slane %v4239_v62, 1  ;;  %v4207_v59 = vrot.slane %v4200_v30, 1 }
 0x4a8   : > { %v4173_v61 = vmul.f32 %v4171_v63, %v7737_v54  ;;  %v4219_v16 = vmul.f32 %v4217_v39, %v7737_v54  ;;  %v4220_v53 = vmul.f32 %v4217_v39, %v4163_v2  ;;  %v4240_v13 = vmul.f32 %v4238_v51, %v7737_v54 }
 0x4a9   : > { %v4241_v17 = vmul.f32 %v4238_v51, %v4163_v2  ;;  %v4279_v55 = vmul.f32 %v4277_v27, %v7737_v54  ;;  %v4187_v23 = vmul.f32 %v4185_v37, %v7737_v54  ;;  %v4280_v60 = vmul.f32 %v4277_v27, %v4163_v2 }
 0x4aa   : > { %4190 = vrot.lane.b32.xlu1 %v4186_v52, %s5365_s26  ;;  %4178 = vrot.lane.b32.xlu0 %v4173_v61, %s5364_s24  ;;  %v4225_v28 = vrot.slane %v4219_v16, 1  ;;  %v4227_v24 = vrot.slane %v4220_v53, 1  ;;  %v4246_v5 = vrot.slane %v4240_v13, 1  ;;  %v4300_v8 = vmul.f32 %v4298_v58, %v7737_v54 }
 0x4ab   : > { %v4201_v47 = vmul.f32 %v4199_v9, %v7737_v54  ;;  %v4248_v19 = vrot.slane %v4241_v17, 1  ;;  %v4285_v35 = vrot.slane %v4279_v55, 2  ;;  %v4202_v38 = vmul.f32 %v4199_v9, %v4163_v2 }
 0x4ac   : > { %v4226_v45 = vsel %vm1069_vm1, %v4224_v1, %v4225_v28  ;;  %v4261_v43 = vmul.f32 %v4259_v36, %v7737_v54  ;;  %v4228_v56 = vsel %vm1069_vm1, %v4225_v28, %v4227_v24  ;;  %v4262_v15 = vmul.f32 %v4259_v36, %v4163_v2 }
 0x4ad   : > { %v4208_v14 = vrot.slane %v4201_v47, 1  ;;  %v4247_v44 = vsel %vm1069_vm1, %v4245_v22, %v4246_v5  ;;  %v4210_v31 = vrot.slane %v4202_v38, 1  ;;  %v4267_v46 = vrot.slane %v4260_v3, 2 }
 0x4ae   : > { %4192 = vrot.lane.b32.xlu1 %v4187_v23, %s5365_s26  ;;  %4229 = vrot.lane.b32.xlu0 %v4226_v45, %s5364_s24  ;;  %v4268_v25 = vrot.slane %v4261_v43, 2  ;;  %v4270_v21 = vrot.slane %v4262_v15, 2  ;;  %v4284_v7 = vrot.slane %v4278_v12, 2  ;;  %v4287_v20 = vrot.slane %v4280_v60, 2 }
 0x4af   : > { %v4209_v29 = vsel %vm1069_vm1, %v4207_v59, %v4208_v14  ;;  %v4211_v4 = vsel %vm1069_vm1, %v4208_v14, %v4210_v31  ;;  %v4249_v18 = vsel %vm1069_vm1, %v4246_v5, %v4248_v19  ;;  %v4306_v6 = vrot.slane %v4300_v8, 2 }
 0x4b0   : > { %v4269_v26 = vsel %vm4266_vm2, %v4267_v46, %v4268_v25  ;;  %v4271_v49 = vsel %vm4266_vm2, %v4268_v25, %v4270_v21  ;;  %v4286_v57 = vsel %vm4266_vm2, %v4284_v7, %v4285_v35  ;;  %v4301_v10 = vmul.f32 %v4298_v58, %v4163_v2 }
 0x4b1   : > { %v4305_v33 = vrot.slane %v4299_v32, 2  ;;  %v4288_v63 = vsel %vm4266_vm2, %v4285_v35, %v4287_v20  ;;  %v4166_v50 = vmul.f32 %v4165_v40, %v7727_v11  ;;  %v4167_v52 = vmul.f32 %v4165_v40, %v7737_v54 }
 0x4b2   : > { %4231 = vrot.lane.b32.xlu1 %v4228_v56, %s5364_s24  ;;  %4250 = vrot.lane.b32.xlu0 %v4247_v44, %s5365_s26  ;;  %v4308_v42 = vrot.slane %v4301_v10, 2  ;;  %v5366_v35 = vmov 1983009808   ;;  %v5367_v56 = vmov 1934713408   ;;  %v5368_v32 = vmov 0.0  }
 0x4b3   : > { %v4307_v0 = vsel %vm4266_vm2, %v4305_v33, %v4306_v6  ;;  %v4332_v38 = vunpack.c.l.s4 %v5366_v35  ;;  %v4347_v59 = vunpack.c.l.s4 %v5367_v56  ;;  %vm4484_vm1 = vcmask 130048  }
 0x4b4   : > { %v4309_v39 = vsel %vm4266_vm2, %v4306_v6, %v4308_v42 }
 0x4b5   : > { %v4333_v15 = vunpack.c.0.s8 %v4332_v38  ;;  %v4348_v44 = vunpack.c.0.s8 %v4347_v59 }
 0x4b6   : > { %4252 = vrot.lane.b32.xlu1 %v4249_v18, %s5365_s26  ;;  %4289 = vrot.lane.b32.xlu0 %v4286_v57, %s5364_s24 }
 0x4b7   : > { %v4336_v31 = vsub.s32 %v4333_v15, %v8068_v34  ;;  %v4351_v46 = vsub.s32 %v4348_v44, %v8068_v34 }
 0x4ba   : > { %4291 = vrot.lane.b32.xlu1 %v4288_v63, %s5364_s24  ;;  %4310 = vrot.lane.b32.xlu0 %v4307_v0, %s5365_s26  ;;  %s5369_s24 = smov 16  }
 0x4be   : > { %4312 = vrot.lane.b32.xlu1 %v4309_v39, %s5365_s26  ;;  %s382_s26 = sand.u32 1, %s5350_s10  }
 0x4bf   : > { %s7828_s13 = scalar_lea.sflag [#allocation3], %s382_s26 }
 0x518   : > { %v4177_v48 = vpop.permute.xlu1 %4176 }
 0x519   : > { %v4182_v37 = vadd.f32 %v4177_v48, %v4166_v50 }
 0x51c   : > { %v4191_v41 = vpop.permute.xlu1 %4190  ;;  %v4179_v2 = vpop.permute.xlu0 %4178 }
 0x51d   : > { %v4196_v51 = vadd.f32 %v4191_v41, %v4182_v37  ;;  %v4183_v61 = vadd.f32 %v4179_v2, %v4167_v52 }
 0x51f   : > { %v4214_v16 = vadd.f32 %v4209_v29, %v4196_v51 }
 0x520   : > { %v4193_v53 = vpop.permute.xlu1 %4192  ;;  %v4230_v13 = vpop.permute.xlu0 %4229 }
 0x521   : > { %v4197_v27 = vadd.f32 %v4193_v53, %v4183_v61  ;;  %v4235_v9 = vadd.f32 %v4230_v13, %v4214_v16 }
 0x523   : > { %v4215_v1 = vadd.f32 %v4211_v4, %v4197_v27 }
 0x524   : > { %v4232_v28 = vpop.permute.xlu1 %4231  ;;  %v4251_v62 = vpop.permute.xlu0 %4250 }
 0x525   : > { %v4256_v36 = vadd.f32 %v4251_v62, %v4235_v9  ;;  %v4236_v17 = vadd.f32 %v4232_v28, %v4215_v1 }
 0x527   : > { %v4274_v55 = vadd.f32 %v4269_v26, %v4256_v36 }
 0x528   : > { %v4253_v58 = vpop.permute.xlu1 %4252  ;;  %v4290_v11 = vpop.permute.xlu0 %4289 }
 0x529   : > { %v4257_v23 = vadd.f32 %v4253_v58, %v4236_v17  ;;  %v4295_v45 = vadd.f32 %v4290_v11, %v4274_v55 }
 0x52b   : > { %v4275_v24 = vadd.f32 %v4271_v49, %v4257_v23 }
 0x52c   : > { %v4292_v30 = vpop.permute.xlu1 %4291  ;;  %v4311_v5 = vpop.permute.xlu0 %4310 }
 0x52d   : > { %v4316_v54 = vadd.f32 %v4311_v5, %v4295_v45  ;;  %v4296_v12 = vadd.f32 %v4292_v30, %v4275_v24 }
 0x52f   : > { %v4756_v3 = vmul.f32 -1.442695, %v4316_v54 }
 0x530   : > { %v4313_v22 = vpop.permute.xlu1 %4312 }
 0x531   : > { %5226 = vpow2.f32 %v4756_v3  ;;  %v4317_v60 = vadd.f32 %v4313_v22, %v4296_v12 }
 0x533   : > { %v4757_v8 = vmul.f32 -1.442695, %v4317_v60 }
 0x535   : > { %5228 = vpow2.f32 %v4757_v8 }
 0x53b   : > { %v5227_v47 = vpop.eup %5226 }
 0x53c   : > { %v4324_v19 = vadd.f32 1.0, %v5227_v47 }
 0x53e   : > { %5230 = vrcp.f32 %v4324_v19 }
 0x53f   : > { %v5229_v43 = vpop.eup %5228 }
 0x540   : > { %v4325_v14 = vadd.f32 1.0, %v5229_v43 }
 0x542   : > { %5232 = vrcp.f32 %v4325_v14  ;;  %v8070_v14 = vld [vmem:[#allocation9_spill] sm:$0xff] }
 0x548   : > { %v5231_v25 = vpop.eup %5230 }
 0x549   : > { %v4337_v29 = vrot.slane %v5231_v25, %v4336_v31  ;;  %v4330_v4 = vcombine.high %v5231_v25, %v5368_v32 }
 0x54b   : > { %v4352_v21 = vrot.slane %v4337_v29, %v4351_v46  ;;  %v4345_v20 = vcombine.high %v4337_v29, %v5368_v32  ;;  %v4344_v57 = vrot.slane %v4330_v4, %v4336_v31 }
 0x54c   : > { %v5233_v7 = vpop.eup %5232 }
 0x54d   : > { %v4375_v26 = vcombine.high %v4352_v21, %v5368_v32  ;;  %v4386_v49 = vrot.slane %v5233_v7, %v4336_v31  ;;  %v4359_v6 = vrot.slane %v4345_v20, %v4351_v46  ;;  %v4379_v63 = vcombine.high %v5233_v7, %v5368_v32 }
 0x54e   : > { %v4367_v34 = vrot.slane %v4344_v57, %v4351_v46  ;;  %v4360_v37 = vcombine.high %v4344_v57, %v5368_v32 }
 0x54f   : > { %4429 = vrot.lane.b32.xlu0 %v4375_v26, %s5369_s24  ;;  %v4401_v18 = vrot.slane %v4386_v49, %v4351_v46  ;;  %v4394_v33 = vcombine.high %v4386_v49, %v5368_v32  ;;  %v4393_v42 = vrot.slane %v4379_v63, %v4336_v31  ;;  %v4376_v39 = vcombine.high %v4359_v6, %v5368_v32 }
 0x550   : > { %v4377_v48 = vcombine.high %v4367_v34, %v5368_v32  ;;  %v4374_v41 = vrot.slane %v4360_v37, %v4351_v46 }
 0x551   : > { %v4424_v10 = vcombine.high %v4401_v18, %v5368_v32  ;;  %v4408_v0 = vrot.slane %v4394_v33, %v4351_v46  ;;  %v4416_v40 = vrot.slane %v4393_v42, %v4351_v46  ;;  %v4409_v51 = vcombine.high %v4393_v42, %v5368_v32 }
 0x552   : > { %v4378_v52 = vcombine.high %v4374_v41, %v5368_v32 }
 0x553   : > { %4433 = vrot.lane.b32.xlu0 %v4359_v6, %s5363_s28  ;;  %4457 = vrot.lane.b32.xlu1 %v4424_v10, %s5369_s24  ;;  %v4425_v50 = vcombine.high %v4408_v0, %v5368_v32  ;;  %v4426_v2 = vcombine.high %v4416_v40, %v5368_v32  ;;  %v4423_v61 = vrot.slane %v4409_v51, %v4351_v46 }
 0x555   : > { %v4427_v16 = vcombine.high %v4423_v61, %v5368_v32 }
 0x557   : > { %4441 = vrot.lane.b32.xlu0 %v4367_v34, %s5361_s21  ;;  %4461 = vrot.lane.b32.xlu1 %v4408_v0, %s5363_s28  ;;  %s5372_s28 = smov 112  }
 0x55b   : > { %4437 = vrot.lane.b32.xlu0 %v4376_v39, %s5370_s14  ;;  %4469 = vrot.lane.b32.xlu1 %v4416_v40, %s5361_s21  ;;  %s4763_s21 = sshll.u32 %s5493_s27, 6  ;;  %s4666_s27 = sshll.u32 %s382_s26, 6 }
 0x55c   : > { %s7797_s25 = scalar_lea.vmem %s7873_s3, %s4763_s21  ;;  %s7822_s21 = scalar_lea.hbm %s7879_s9, %s4764_s29 }
 0x55d   : > { %v4502_v19 = vld [vmem:[%s7797_s25] sm:$0xff]  ;;  %v4504_v43 = vld [vmem:[%s7797_s25 + $0x10] sm:$0xff]  ;;  %v4503_v32 = vld [vmem:[%s7797_s25 + $0x8] sm:$0xff] }
 0x55e   : > { %v4506_v56 = vld [vmem:[%s7797_s25 + $0x20] sm:$0xff]  ;;  %v4508_v59 = vld [vmem:[%s7797_s25 + $0x30] sm:$0xff]  ;;  %v4505_v26 = vld [vmem:[%s7797_s25 + $0x18] sm:$0xff] }
 0x55f   : > { %4445 = vrot.lane.b32.xlu0 %v4377_v48, %s5371_s16  ;;  %4465 = vrot.lane.b32.xlu1 %v4425_v50, %s5370_s14  ;;  %s384_s14 = scalar_lea.vmem [#allocation5], %s4666_s27  ;;  %v4507_v20 = vld [vmem:[%s7797_s25 + $0x28] sm:$0xff]  ;;  %v4509_v49 = vld [vmem:[%s7797_s25 + $0x38] sm:$0xff]  ;;  %s5296_s25 = sshll.u32 %s5373_s22, 4  ;;  %s5297_s25 = int_to_ptr.vmem [resolvable:$false] %s5296_s25 }
 0x560   : > { %s5298_s27 = scalar_lea.vmem %s5297_s25, 2048 }
 0x563   : > { %4449 = vrot.lane.b32.xlu0 %v4374_v41, %s8069_s17  ;;  %4473 = vrot.lane.b32.xlu1 %v4426_v2, %s5371_s16  ;;  %s4550_s16 = sshll.u32 %s384_s14, 4  ;;  %s7824_s16 = int_to_ptr.vmem [resolvable:$true] %s4550_s16 }
 0x564   : > { %s5292_s23 = scalar_lea.vmem %s7824_s16, 1024  ;;  %p5299_p13 = scmp.lt.s32.totalorder %s7824_s16, %s5297_s25 }
 0x565   : > { %p5293_p9 = scmp.ne.s32.totalorder %s7824_s16, %s5292_s23  ;;  %p5300_p0 = scmp.lt.s32.totalorder %s5298_s27, %s5292_s23 }
 0x567   : > { %4453 = vrot.lane.b32.xlu0 %v4378_v52, %s5372_s28  ;;  %4477 = vrot.lane.b32.xlu1 %v4423_v61, %s8069_s17  ;;  %p5294_p10 = pnand %p5293_p9, %p5463_p5  ;;  %p5301_p1 = por %p5300_p0, %p5299_p13 }
 0x569   : > { %p5295_p12 = pneg %p5294_p10 }
 0x56b   : > { %4481 = vrot.lane.b32.xlu1 %v4427_v16, %s5372_s28  ;;  %p5302_p2 = pnand %p5301_p1, %p5295_p12 }
 0x5c1   : > { %v4430_v53 = vpop.permute.xlu0 %4429 }
 0x5c2   : > { %v4485_v55 = vsel %vm4484_vm1, %v4352_v21, %v4430_v53 }
 0x5c5   : > { %v4434_v13 = vpop.permute.xlu0 %4433  ;;  %v4458_v27 = vpop.permute.xlu1 %4457 }
 0x5c6   : > { %v4486_v58 = vsel %vm1344_vm0, %v4485_v55, %v4434_v13  ;;  %v4495_v24 = vsel %vm4484_vm1, %v4401_v18, %v4458_v27 }
 0x5c9   : > { %v4442_v9 = vpop.permute.xlu0 %4441  ;;  %v4462_v1 = vpop.permute.xlu1 %4461 }
 0x5ca   : > { %v4496_v30 = vsel %vm1344_vm0, %v4495_v24, %v4462_v1 }
 0x5cd   : > { %v4438_v28 = vpop.permute.xlu0 %4437  ;;  %v4470_v62 = vpop.permute.xlu1 %4469 }
 0x5ce   : > { %v4488_v11 = vsel %vm4487_vm5, %v4486_v58, %v4438_v28 }
 0x5cf   : > { %v4489_v5 = vsel %vm1377_vm3, %v4488_v11, %v4442_v9 }
 0x5d1   : > { %v4446_v36 = vpop.permute.xlu0 %4445  ;;  %v4466_v17 = vpop.permute.xlu1 %4465 }
 0x5d2   : > { %v4491_v54 = vsel %vm4490_vm6, %v4489_v5, %v4446_v36  ;;  %v4497_v12 = vsel %vm4487_vm5, %v4496_v30, %v4466_v17 }
 0x5d3   : > { %v4498_v47 = vsel %vm1377_vm3, %v4497_v12, %v4470_v62 }
 0x5d5   : > { %v4450_v23 = vpop.permute.xlu0 %4449  ;;  %v4474_v45 = vpop.permute.xlu1 %4473 }
 0x5d6   : > { %v4492_v3 = vsel %vm1410_vm4, %v4491_v54, %v4450_v23  ;;  %v4499_v38 = vsel %vm4490_vm6, %v4498_v47, %v4474_v45 }
 0x5d9   : > { %v4454_v22 = vpop.permute.xlu0 %4453  ;;  %v4478_v60 = vpop.permute.xlu1 %4477 }
 0x5da   : > { %v4494_v8 = vsel %vm4493_vm7, %v4492_v3, %v4454_v22  ;;  %v4500_v44 = vsel %vm1410_vm4, %v4499_v38, %v4478_v60 }
 0x5db   : > { %v4510_v35 = vadd.f32 1.0, %v4494_v8 }
 0x5dd   : > { %v4515_v15 = vrot.slane %v4510_v35, %v8070_v14  ;;  %v4482_v31 = vpop.permute.xlu1 %4481 }
 0x5de   : > { %v4501_v46 = vsel %vm4493_vm7, %v4500_v44, %v4482_v31 }
 0x5df   : > { %v4520_v25 = vmul.f32 %v4515_v15, %v4502_v19  ;;  %v4522_v29 = vmul.f32 %v4515_v15, %v4504_v43  ;;  %v4524_v21 = vmul.f32 %v4515_v15, %v4506_v56  ;;  %v4526_v7 = vmul.f32 %v4515_v15, %v4508_v59 }
 0x5e0   : > { %v4511_v4 = vadd.f32 1.0, %v4501_v46 }
 0x5e1   : > { %4528 = vst [vmem:[%s384_s14] sm:$0xff] %v4520_v25  ;;  %4530 = vst [vmem:[%s384_s14 + $0x10] sm:$0xff] %v4522_v29 }
 0x5e2   : > { %4532 = vst [vmem:[%s384_s14 + $0x20] sm:$0xff] %v4524_v21  ;;  %4534 = vst [vmem:[%s384_s14 + $0x30] sm:$0xff] %v4526_v7  ;;  %v4519_v18 = vrot.slane %v4511_v4, %v8070_v14 }
 0x5e4   : > { %v4521_v57 = vmul.f32 %v4519_v18, %v4503_v32  ;;  %v4523_v6 = vmul.f32 %v4519_v18, %v4505_v26  ;;  %v4525_v10 = vmul.f32 %v4519_v18, %v4507_v20  ;;  %v4527_v33 = vmul.f32 %v4519_v18, %v4509_v49 }
 0x5e6   : > { %4529 = vst [vmem:[%s384_s14 + $0x8] sm:$0xff] %v4521_v57  ;;  %4531 = vst [vmem:[%s384_s14 + $0x18] sm:$0xff] %v4523_v6 }
 0x5e7   : > { %4533 = vst [vmem:[%s384_s14 + $0x28] sm:$0xff] %v4525_v10  ;;  %4535 = vst [vmem:[%s384_s14 + $0x38] sm:$0xff] %v4527_v33 }
 0x5e8   : > { %5305 = shalt.err (!%p5302_p2)
}
 0x5e9   : > { %s5306_s26 = scalar_lea.hbm %s7822_s21, 1024  ;;  %s5310_s17 = scalar_lea.hbm %s7879_s9, 2048 }
 0x5ea   : > { %p5307_p3 = scmp.ne.s32.totalorder %s7822_s21, %s5306_s26  ;;  %p5311_p8 = scmp.lt.u32.totalorder %s7822_s21, %s7879_s9 }
 0x5eb   : > { %p5312_p11 = scmp.lt.u32.totalorder %s5310_s17, %s5306_s26  ;;  %p5314_p10 = scmp.lt.u32.totalorder %s5306_s26, %s7822_s21 }
 0x5ec   : > { %p5308_p4 = pnand %p5307_p3, %p5463_p5 }
 0x5ed   : > { %p5313_p9 = por %p5312_p11, %p5311_p8 }
 0x5ee   : > { %p5309_p7 = pneg %p5308_p4 }
 0x5ef   : > { %p5315_p12 = por %p5314_p10, %p5313_p9 }
 0x5f1   : > { %p5316_p13 = pnand %p5315_p12, %p5309_p7 }
 0x5f3   : > { %5319 = shalt.err (!%p5316_p13)
}
 0x5f4   : > { %s5374_s23 = smov 256  }
 0x5f5   : > { %5107 = dma.vmem_to_hbm [thread:$0]  (%p5463_p5), %s7824_s16, 1024, %s7822_s21, %s7828_s13, %s5374_s23, %s5374_s23, %s5369_s24  }
 0x5f6 PF: > { %p5119_p0 = scmp.ge.s32.totalorder %s5358_s12, 2  ;;  %s4565_s25 = sand.u32 1, %s5346_s30  }
 0x5f7   : > { %s4566_s27 = scalar_lea.sflag [#allocation3], %s4565_s25 }
 0x5f8   : > { %p5114_p1 = pnand %p5119_p0, %p5467_p6 }
 0x5fa   : > { %5341 = dma.done.wait (!%p5114_p1), %s4566_s27, 1024  }
 0x5fb   : > { %5343 = vsyncadd (!%p5114_p1), %s4566_s27, 4294966272  ;;  %p20_p2 = scmp.ge.s32.totalorder %s5450_s15, 4   ;;  %s8071_s30 = smov %s5350_s10 }
 0x5fc   : > { %s8072_s10 = smov %s5354_s11  ;;  %s8073_s11 = smov %s5461_s18 }
 0x5fd   : > { %s8074_s12 = smov %s5450_s15  ;;  %22 = sbr.rel (!%p20_p2) target bundleno = 4 (0x4), region = 105 }
 0x604   :  { %4571 = vsyncpa [#allocation3], 1 }
 0x605   :  { %4573 = vsyncpa [#allocation3 + $0x1], 1 }
 0x606   :  { %4574 = vsyncpa [#allocation4], 1 }
 0x607   :  { %4576 = vsyncpa [#allocation4 + $0x1], 1 }

</bundles_post_ra>
